<compile_context>
chip_gen: v7x
topology: tpu7x:2x2x1
jax: 0.10.0
libtpu: 0.0.40
codegen_flags: <defaults>
</compile_context>

<pallas_src>
import jax
import jax.numpy as jnp
from jax import lax
from jax.experimental import pallas as pl
from jax.experimental.pallas import tpu as pltpu


def _lstm_cell(gates, c_prev, hidden):
    """PyTorch LSTM cell update from pre-activations (gate order i, f, g, o)."""
    i = jax.nn.sigmoid(gates[:, 0 * hidden:1 * hidden])
    f = jax.nn.sigmoid(gates[:, 1 * hidden:2 * hidden])
    g = jnp.tanh(gates[:, 2 * hidden:3 * hidden])
    o = jax.nn.sigmoid(gates[:, 3 * hidden:4 * hidden])
    c = f * c_prev + i * g
    h = o * jnp.tanh(c)
    return h, c


def make_fused_kernel(num_layers, seq, b_pad, b_real, hidden):
    """Fused (LSTM stack + attention + heads) kernel, shapes baked in."""
    S, Bp, B, H = seq, b_pad, b_real, hidden
    G, G2 = 4 * H, 8 * H                       # per-direction / packed gate width
    f32, bf16 = jnp.float32, jnp.bfloat16

    def fused_forward_kernel(*refs):
        # refs: x2 (S*Bp, E) f32,
        #       per layer: w_ih (in,8H) bf16, w_hh (H,8H) bf16, b (1,8H) f32,
        #       w_att (2H,8) f32, b_att (1,8) f32, w_head (2H,2) f32, b_head (1,2) f32,
        #       out (Bp, 8) f32.
        x2_ref = refs[0]
        layer_refs = refs[1:1 + 3 * num_layers]
        (w_att_ref, b_att_ref,
         w_head_ref, b_head_ref) = refs[1 + 3 * num_layers:1 + 3 * num_layers + 4]
        out_ref = refs[-1]

        hf2d = None            # (S*Bp, H) fwd hiddens, s-major rows (t*Bp + b)
        hb2d = None
        for l in range(num_layers):
            w_ih_ref = layer_refs[3 * l + 0]   # (in_dim, 8H) bf16, cols [fwd | bwd]
            w_hh_ref = layer_refs[3 * l + 1]   # (H, 8H)      bf16, cols [fwd | bwd]
            b_ref = layer_refs[3 * l + 2]      # (1, 8H)      f32  (b_ih + b_hh)

            # ---- hoisted input projection: one fat 8H(=256)-lane MXU matmul ----
            if l == 0:
                xg = jnp.dot(x2_ref[...].astype(bf16), w_ih_ref[...],
                             preferred_element_type=f32) + b_ref[...]
            else:
                # [hf | hb] @ W  ==  hf @ W[:H] + hb @ W[H:]  (no concat relayout)
                xg = (jnp.dot(hf2d.astype(bf16), w_ih_ref[0:H, :],
                              preferred_element_type=f32)
                      + jnp.dot(hb2d.astype(bf16), w_ih_ref[H:2 * H, :],
                                preferred_element_type=f32)
                      + b_ref[...])
            # xg: (S*Bp, 8H); cols [0:4H] = fwd gates, [4H:8H] = bwd gates.

            w_hh = w_hh_ref[...]               # recurrent weights loaded once

            h_f = jnp.zeros((Bp, H), f32)
            c_f = jnp.zeros((Bp, H), f32)
            h_b = jnp.zeros((Bp, H), f32)
            c_b = jnp.zeros((Bp, H), f32)
            hf_steps = [None] * S
            hb_steps = [None] * S

            # ---- fully unrolled shared time loop: ONE recurrent MXU matmul per
            #      step covering both directions ((2Bp, H) @ (H, 8H)). ----
            # TODO(synk): for S beyond ~32, stage xg in VMEM scratch and switch
            #             to lax.fori_loop + pl.ds slices to bound live ranges.
            for t in range(S):
                tb = S - 1 - t
                h_cat = jnp.concatenate([h_f, h_b], axis=0).astype(bf16)  # (2Bp, H)
                rec = jnp.dot(h_cat, w_hh, preferred_element_type=f32)    # (2Bp, 8H)
                g_f = xg[t * Bp:(t + 1) * Bp, 0:G] + rec[0:Bp, 0:G]
                g_b = xg[tb * Bp:(tb + 1) * Bp, G:G2] + rec[Bp:2 * Bp, G:G2]
                h_f, c_f = _lstm_cell(g_f, c_f, H)
                h_b, c_b = _lstm_cell(g_b, c_b, H)
                hf_steps[t] = h_f                 # fwd hidden at time t
                hb_steps[tb] = h_b                # bwd hidden at time tb

            # tile-aligned concat (each chunk is a full Bp=8-row sublane tile)
            hf2d = jnp.concatenate(hf_steps, axis=0)   # (S*Bp, H)
            hb2d = jnp.concatenate(hb_steps, axis=0)

        # --------------- attention logits + head pre-projection ---------------
        w_att = w_att_ref[...]
        a2 = (jnp.dot(hf2d, w_att[0:H, :], preferred_element_type=f32)
              + jnp.dot(hb2d, w_att[H:2 * H, :], preferred_element_type=f32)
              + b_att_ref[...])                                      # (S*Bp, 8)
        # (P^T H) W_head == P^T (H W_head): project the heads BEFORE pooling so
        # the pooling contraction is over 2 lanes instead of 2H, all batches at once.
        w_head = w_head_ref[...]
        z2 = (jnp.dot(hf2d, w_head[0:H, :], preferred_element_type=f32)
              + jnp.dot(hb2d, w_head[H:2 * H, :], preferred_element_type=f32))  # (S*Bp, 2)

        # ---- F.softmax(attn_scores, -2): over the (real) BATCH axis ----
        a3 = a2.reshape(S, Bp, 8)
        col = lax.broadcasted_iota(jnp.int32, (S, Bp, 8), 1)
        a3 = jnp.where(col < B, a3, -1e30)       # exclude padded batch columns
        m = jnp.max(a3, axis=1, keepdims=True)
        e3 = jnp.exp(a3 - m)
        denom = jnp.sum(e3, axis=1, keepdims=True)
        p3 = e3 * pl.reciprocal(denom, approx=True)                  # (S, Bp, 8)

        # ---- attention pooling fused with both output heads (VPU only) ----
        z3 = z2.reshape(S, Bp, 2)
        bh = b_head_ref[...]                                         # (1, 2)
        out_cls = jnp.sum(p3 * z3[:, :, 0:1], axis=0) + bh[:, 0:1]   # (Bp, 8)
        out_sc = jnp.sum(p3 * z3[:, :, 1:2], axis=0) + bh[:, 1:2]    # (Bp, 8)
        lane = lax.broadcasted_iota(jnp.int32, (Bp, 8), 1)
        out_ref[...] = jnp.where(lane < 4, out_cls, out_sc)          # single store

    return fused_forward_kernel


# ---------------------------------------------------------------------------
# Wrapper: embedding gather in XLA, single pallas_call for everything else.
# ---------------------------------------------------------------------------
def bilstm_forward(params, inputs):
    """inputs: (S, B) int32 token ids -> (cls (B, 4), scores (B, 4))."""
    # TODO(synk): embedding gather left to XLA (single gather); fusing it only
    #             pays at real vocab sizes (scalar-prefetch ids + DMA gather).
    x = jnp.take(params["embedding"], inputs, axis=0)                # (S, B, E)
    S, B, E = x.shape
    L = len(params["lstm"])
    H = params["lstm"][0]["w_hh"].shape[0]

    # Pad batch to a full sublane tile so all (B, .) ops/stores are unmasked.
    B_pad = ((B + 7) // 8) * 8
    if B_pad != B:
        x = jnp.pad(x, ((0, 0), (0, B_pad - B), (0, 0)))
    x2 = x.reshape(S * B_pad, E)                                     # s-major rows

    flat = [x2]
    for layer in params["lstm"]:
        flat += [layer["w_ih"], layer["w_hh"], layer["b"]]
    flat += [params["w_att"], params["b_att"], params["w_head"], params["b_head"]]

    out = pl.pallas_call(
        make_fused_kernel(L, S, B_pad, B, H),
        out_shape=jax.ShapeDtypeStruct((B_pad, 8), jnp.float32),
        in_specs=[pl.BlockSpec(memory_space=pltpu.MemorySpace.VMEM)] * len(flat),
        out_specs=pl.BlockSpec(memory_space=pltpu.MemorySpace.VMEM),
        compiler_params=pltpu.CompilerParams(vmem_limit_bytes=32 * 1024 * 1024),
    )(*flat)
    return out[:B, :4], out[:B, 4:]


# ---------------------------------------------------------------------------
# Pure-JAX reference (for correctness check) — consumes the same packed params.
# ---------------------------------------------------------------------------
def ref_forward(params, inputs):
    x = jnp.take(params["embedding"], inputs, axis=0)
    H = params["lstm"][0]["w_hh"].shape[0]
    G = 4 * H

    def run_dir(xdir, w_ih_t, w_hh_t, b):
        _, Bn, _ = xdir.shape

        def step(carry, x_t):
            h, c = carry
            gates = x_t @ w_ih_t + h @ w_hh_t + b
            i = jax.nn.sigmoid(gates[:, :H])
            f = jax.nn.sigmoid(gates[:, H:2 * H])
            g = jnp.tanh(gates[:, 2 * H:3 * H])
            o = jax.nn.sigmoid(gates[:, 3 * H:])
            c = f * c + i * g
            h = o * jnp.tanh(c)
            return (h, c), h

        init = (jnp.zeros((Bn, H), jnp.float32), jnp.zeros((Bn, H), jnp.float32))
        _, hs = lax.scan(step, init, xdir)
        return hs

    for layer in params["lstm"]:
        w_ih = layer["w_ih"].astype(jnp.float32)
        w_hh = layer["w_hh"].astype(jnp.float32)
        b = layer["b"]
        hf = run_dir(x, w_ih[:, :G], w_hh[:, :G], b[:, :G])
        hb = run_dir(x[::-1], w_ih[:, G:], w_hh[:, G:], b[:, G:])[::-1]
        x = jnp.concatenate([hf, hb], axis=-1)

    attn = jnp.einsum("sbd,de->sbe", x, params["w_att"]) + params["b_att"]
    attn = jax.nn.softmax(attn, axis=1)                      # dim=-2 (batch axis)
    pooled = jnp.einsum("sbk,sbd->bkd", attn, x)             # (B, 8, 2H)
    heads = jnp.einsum("bkd,dh->bkh", pooled, params["w_head"]) + params["b_head"]
    return heads[:, :4, 0], heads[:, 4:, 1]


# ---------------------------------------------------------------------------
# Deterministic parameter init (shapes follow the nn.Module __init__).
# ---------------------------------------------------------------------------
def init_params(key, vocab_size, emb_dim, hidden, layers):
    keys = iter(jax.random.split(key, 64))

    def u(k, shape, bound):
        return jax.random.uniform(k, shape, jnp.float32, -bound, bound)

    emb = jax.random.normal(next(keys), (vocab_size, emb_dim), jnp.float32)
    emb = emb.at[1].set(0.0)                                 # padding_idx = 1

    kb = 1.0 / float(hidden) ** 0.5
    lstm = []
    for l in range(layers):
        in_dim = emb_dim if l == 0 else 2 * hidden
        w_ih_cols, w_hh_cols, b_cols = [], [], []
        for _ in ("fwd", "bwd"):
            w_ih = u(next(keys), (4 * hidden, in_dim), kb)
            w_hh = u(next(keys), (4 * hidden, hidden), kb)
            b_ih = u(next(keys), (4 * hidden,), kb)
            b_hh = u(next(keys), (4 * hidden,), kb)
            w_ih_cols.append(w_ih.T)                         # (in_dim, 4H)
            w_hh_cols.append(w_hh.T)                         # (H, 4H)
            b_cols.append(b_ih + b_hh)
        # packed gate-lane layout: [ fwd i f g o | bwd i f g o ]  -> 8H lanes
        lstm.append(dict(
            w_ih=jnp.concatenate(w_ih_cols, axis=1).astype(jnp.bfloat16),
            w_hh=jnp.concatenate(w_hh_cols, axis=1).astype(jnp.bfloat16),
            b=jnp.concatenate(b_cols).reshape(1, 8 * hidden)))

    d2 = 2 * hidden
    ka = 1.0 / float(d2) ** 0.5
    w_att = u(next(keys), (8, d2), ka).T                     # (2H, 8)
    b_att = u(next(keys), (1, 8), ka)
    w_cls = u(next(keys), (1, d2), ka)                       # Linear(2H, 1) weight
    b_cls = u(next(keys), (1,), ka)
    w_sc = u(next(keys), (1, d2), ka)
    b_sc = u(next(keys), (1,), ka)
    w_head = jnp.concatenate([w_cls, w_sc], axis=0).T        # (2H, 2) fused heads
    b_head = jnp.concatenate([b_cls, b_sc]).reshape(1, 2)
    return dict(embedding=emb, lstm=lstm, w_att=w_att, b_att=b_att,
                w_head=w_head, b_head=b_head)


if __name__ == "__main__":
    VOCAB, EMB, HID, LAYERS = 50, 16, 32, 2
    SEQ, BATCH = 8, 2

    key = jax.random.PRNGKey(0)
    pkey, ikey = jax.random.split(key)
    params = init_params(pkey, VOCAB, EMB, HID, LAYERS)
    inputs = jax.random.randint(ikey, (SEQ, BATCH), 0, VOCAB, dtype=jnp.int32)

    cls_out, sc_out = jax.jit(bilstm_forward)(params, inputs)
    jax.block_until_ready((cls_out, sc_out))

    ref_cls, ref_sc = ref_forward(params, inputs)
    assert cls_out.shape == (BATCH, 4) and sc_out.shape == (BATCH, 4)
    # Kernel uses bf16 MXU operands (f32 accumulation) + approx reciprocal vs an
    # f32 reference, so a looser tolerance than pure-f32 is expected.
    assert jnp.allclose(cls_out, ref_cls, atol=3e-2, rtol=3e-2)
    assert jnp.allclose(sc_out, ref_sc, atol=3e-2, rtol=3e-2)

    print("KERNEL_OK")
</pallas_src>

<mosaic_0001>
module attributes {stable_mosaic.version = 11 : i64} {
  func.func @fused_forward_kernel(%arg0: memref<64x16xf32, #tpu.memory_space<vmem>>, %arg1: memref<16x256xbf16, #tpu.memory_space<vmem>>, %arg2: memref<32x256xbf16, #tpu.memory_space<vmem>>, %arg3: memref<1x256xf32, #tpu.memory_space<vmem>>, %arg4: memref<64x256xbf16, #tpu.memory_space<vmem>>, %arg5: memref<32x256xbf16, #tpu.memory_space<vmem>>, %arg6: memref<1x256xf32, #tpu.memory_space<vmem>>, %arg7: memref<64x8xf32, #tpu.memory_space<vmem>>, %arg8: memref<1x8xf32, #tpu.memory_space<vmem>>, %arg9: memref<64x2xf32, #tpu.memory_space<vmem>>, %arg10: memref<1x2xf32, #tpu.memory_space<vmem>>, %arg11: memref<8x8xf32, #tpu.memory_space<vmem>>) attributes {dimension_semantics = [], scalar_prefetch = 0 : i64, scratch_operands = 0 : i64, tpu.core_type = #tpu.core_type<tc>} {
    %c0 = arith.constant 0 : index
    %c0_0 = arith.constant 0 : index
    %0 = vector.load %arg0[%c0, %c0_0] : memref<64x16xf32, #tpu.memory_space<vmem>>, vector<64x16xf32>
    %1 = arith.truncf %0 : vector<64x16xf32> to vector<64x16xbf16>
    %c0_1 = arith.constant 0 : index
    %c0_2 = arith.constant 0 : index
    %2 = vector.load %arg1[%c0_1, %c0_2] : memref<16x256xbf16, #tpu.memory_space<vmem>>, vector<16x256xbf16>
    %cst = arith.constant dense<0.000000e+00> : vector<64x256xf32>
    %3 = tpu.matmul %1, %2, %cst {dimension_numbers = #tpu.dot_dimension_numbers<[1], [0], [0], [1], [0, 0, 1, 1], [], []>} : vector<64x16xbf16>, vector<16x256xbf16>, vector<64x256xf32> -> vector<64x256xf32>
    %c0_3 = arith.constant 0 : index
    %c0_4 = arith.constant 0 : index
    %4 = vector.load %arg3[%c0_3, %c0_4] : memref<1x256xf32, #tpu.memory_space<vmem>>, vector<1x256xf32>
    %5 = vector.broadcast %4 : vector<1x256xf32> to vector<64x256xf32>
    %6 = arith.addf %3, %5 : vector<64x256xf32>
    %c0_5 = arith.constant 0 : index
    %c0_6 = arith.constant 0 : index
    %7 = vector.load %arg2[%c0_5, %c0_6] : memref<32x256xbf16, #tpu.memory_space<vmem>>, vector<32x256xbf16>
    %cst_7 = arith.constant 0.000000e+00 : f32
    %8 = vector.broadcast %cst_7 : f32 to vector<8x32xf32>
    %cst_8 = arith.constant 0.000000e+00 : f32
    %9 = vector.broadcast %cst_8 : f32 to vector<8x32xf32>
    %cst_9 = arith.constant 0.000000e+00 : f32
    %10 = vector.broadcast %cst_9 : f32 to vector<8x32xf32>
    %cst_10 = arith.constant 0.000000e+00 : f32
    %11 = vector.broadcast %cst_10 : f32 to vector<8x32xf32>
    %12 = tpu.concatenate %8, %10 in 0 : vector<8x32xf32>, vector<8x32xf32> -> vector<16x32xf32>
    %13 = arith.truncf %12 : vector<16x32xf32> to vector<16x32xbf16>
    %cst_11 = arith.constant dense<0.000000e+00> : vector<16x256xf32>
    %14 = tpu.matmul %13, %7, %cst_11 {dimension_numbers = #tpu.dot_dimension_numbers<[1], [0], [0], [1], [0, 0, 1, 1], [], []>} : vector<16x32xbf16>, vector<32x256xbf16>, vector<16x256xf32> -> vector<16x256xf32>
    %15 = vector.extract_strided_slice %6 {offsets = [0, 0], sizes = [8, 128], strides = [1, 1]} : vector<64x256xf32> to vector<8x128xf32>
    %16 = vector.extract_strided_slice %14 {offsets = [0, 0], sizes = [8, 128], strides = [1, 1]} : vector<16x256xf32> to vector<8x128xf32>
    %17 = arith.addf %15, %16 : vector<8x128xf32>
    %18 = vector.extract_strided_slice %6 {offsets = [56, 128], sizes = [8, 128], strides = [1, 1]} : vector<64x256xf32> to vector<8x128xf32>
    %19 = vector.extract_strided_slice %14 {offsets = [8, 128], sizes = [8, 128], strides = [1, 1]} : vector<16x256xf32> to vector<8x128xf32>
    %20 = arith.addf %18, %19 : vector<8x128xf32>
    %21 = vector.extract_strided_slice %17 {offsets = [0, 0], sizes = [8, 32], strides = [1, 1]} : vector<8x128xf32> to vector<8x32xf32>
    %22 = arith.negf %21 : vector<8x32xf32>
    %23 = math.exp %22 : vector<8x32xf32>
    %cst_12 = arith.constant 1.000000e+00 : f32
    %24 = vector.broadcast %cst_12 : f32 to vector<8x32xf32>
    %25 = arith.addf %24, %23 : vector<8x32xf32>
    %26 = arith.divf %24, %25 : vector<8x32xf32>
    %27 = vector.extract_strided_slice %17 {offsets = [0, 32], sizes = [8, 32], strides = [1, 1]} : vector<8x128xf32> to vector<8x32xf32>
    %28 = arith.negf %27 : vector<8x32xf32>
    %29 = math.exp %28 : vector<8x32xf32>
    %cst_13 = arith.constant 1.000000e+00 : f32
    %30 = vector.broadcast %cst_13 : f32 to vector<8x32xf32>
    %31 = arith.addf %30, %29 : vector<8x32xf32>
    %32 = arith.divf %30, %31 : vector<8x32xf32>
    %33 = vector.extract_strided_slice %17 {offsets = [0, 64], sizes = [8, 32], strides = [1, 1]} : vector<8x128xf32> to vector<8x32xf32>
    %34 = math.tanh %33 : vector<8x32xf32>
    %35 = vector.extract_strided_slice %17 {offsets = [0, 96], sizes = [8, 32], strides = [1, 1]} : vector<8x128xf32> to vector<8x32xf32>
    %36 = arith.negf %35 : vector<8x32xf32>
    %37 = math.exp %36 : vector<8x32xf32>
    %cst_14 = arith.constant 1.000000e+00 : f32
    %38 = vector.broadcast %cst_14 : f32 to vector<8x32xf32>
    %39 = arith.addf %38, %37 : vector<8x32xf32>
    %40 = arith.divf %38, %39 : vector<8x32xf32>
    %41 = arith.mulf %32, %9 : vector<8x32xf32>
    %42 = arith.mulf %26, %34 : vector<8x32xf32>
    %43 = arith.addf %41, %42 : vector<8x32xf32>
    %44 = math.tanh %43 : vector<8x32xf32>
    %45 = arith.mulf %40, %44 : vector<8x32xf32>
    %46 = vector.extract_strided_slice %20 {offsets = [0, 0], sizes = [8, 32], strides = [1, 1]} : vector<8x128xf32> to vector<8x32xf32>
    %47 = arith.negf %46 : vector<8x32xf32>
    %48 = math.exp %47 : vector<8x32xf32>
    %cst_15 = arith.constant 1.000000e+00 : f32
    %49 = vector.broadcast %cst_15 : f32 to vector<8x32xf32>
    %50 = arith.addf %49, %48 : vector<8x32xf32>
    %51 = arith.divf %49, %50 : vector<8x32xf32>
    %52 = vector.extract_strided_slice %20 {offsets = [0, 32], sizes = [8, 32], strides = [1, 1]} : vector<8x128xf32> to vector<8x32xf32>
    %53 = arith.negf %52 : vector<8x32xf32>
    %54 = math.exp %53 : vector<8x32xf32>
    %cst_16 = arith.constant 1.000000e+00 : f32
    %55 = vector.broadcast %cst_16 : f32 to vector<8x32xf32>
    %56 = arith.addf %55, %54 : vector<8x32xf32>
    %57 = arith.divf %55, %56 : vector<8x32xf32>
    %58 = vector.extract_strided_slice %20 {offsets = [0, 64], sizes = [8, 32], strides = [1, 1]} : vector<8x128xf32> to vector<8x32xf32>
    %59 = math.tanh %58 : vector<8x32xf32>
    %60 = vector.extract_strided_slice %20 {offsets = [0, 96], sizes = [8, 32], strides = [1, 1]} : vector<8x128xf32> to vector<8x32xf32>
    %61 = arith.negf %60 : vector<8x32xf32>
    %62 = math.exp %61 : vector<8x32xf32>
    %cst_17 = arith.constant 1.000000e+00 : f32
    %63 = vector.broadcast %cst_17 : f32 to vector<8x32xf32>
    %64 = arith.addf %63, %62 : vector<8x32xf32>
    %65 = arith.divf %63, %64 : vector<8x32xf32>
    %66 = arith.mulf %57, %11 : vector<8x32xf32>
    %67 = arith.mulf %51, %59 : vector<8x32xf32>
    %68 = arith.addf %66, %67 : vector<8x32xf32>
    %69 = math.tanh %68 : vector<8x32xf32>
    %70 = arith.mulf %65, %69 : vector<8x32xf32>
    %71 = tpu.concatenate %45, %70 in 0 : vector<8x32xf32>, vector<8x32xf32> -> vector<16x32xf32>
    %72 = arith.truncf %71 : vector<16x32xf32> to vector<16x32xbf16>
    %cst_18 = arith.constant dense<0.000000e+00> : vector<16x256xf32>
    %73 = tpu.matmul %72, %7, %cst_18 {dimension_numbers = #tpu.dot_dimension_numbers<[1], [0], [0], [1], [0, 0, 1, 1], [], []>} : vector<16x32xbf16>, vector<32x256xbf16>, vector<16x256xf32> -> vector<16x256xf32>
    %74 = vector.extract_strided_slice %6 {offsets = [8, 0], sizes = [8, 128], strides = [1, 1]} : vector<64x256xf32> to vector<8x128xf32>
    %75 = vector.extract_strided_slice %73 {offsets = [0, 0], sizes = [8, 128], strides = [1, 1]} : vector<16x256xf32> to vector<8x128xf32>
    %76 = arith.addf %74, %75 : vector<8x128xf32>
    %77 = vector.extract_strided_slice %6 {offsets = [48, 128], sizes = [8, 128], strides = [1, 1]} : vector<64x256xf32> to vector<8x128xf32>
    %78 = vector.extract_strided_slice %73 {offsets = [8, 128], sizes = [8, 128], strides = [1, 1]} : vector<16x256xf32> to vector<8x128xf32>
    %79 = arith.addf %77, %78 : vector<8x128xf32>
    %80 = vector.extract_strided_slice %76 {offsets = [0, 0], sizes = [8, 32], strides = [1, 1]} : vector<8x128xf32> to vector<8x32xf32>
    %81 = arith.negf %80 : vector<8x32xf32>
    %82 = math.exp %81 : vector<8x32xf32>
    %cst_19 = arith.constant 1.000000e+00 : f32
    %83 = vector.broadcast %cst_19 : f32 to vector<8x32xf32>
    %84 = arith.addf %83, %82 : vector<8x32xf32>
    %85 = arith.divf %83, %84 : vector<8x32xf32>
    %86 = vector.extract_strided_slice %76 {offsets = [0, 32], sizes = [8, 32], strides = [1, 1]} : vector<8x128xf32> to vector<8x32xf32>
    %87 = arith.negf %86 : vector<8x32xf32>
    %88 = math.exp %87 : vector<8x32xf32>
    %cst_20 = arith.constant 1.000000e+00 : f32
    %89 = vector.broadcast %cst_20 : f32 to vector<8x32xf32>
    %90 = arith.addf %89, %88 : vector<8x32xf32>
    %91 = arith.divf %89, %90 : vector<8x32xf32>
    %92 = vector.extract_strided_slice %76 {offsets = [0, 64], sizes = [8, 32], strides = [1, 1]} : vector<8x128xf32> to vector<8x32xf32>
    %93 = math.tanh %92 : vector<8x32xf32>
    %94 = vector.extract_strided_slice %76 {offsets = [0, 96], sizes = [8, 32], strides = [1, 1]} : vector<8x128xf32> to vector<8x32xf32>
    %95 = arith.negf %94 : vector<8x32xf32>
    %96 = math.exp %95 : vector<8x32xf32>
    %cst_21 = arith.constant 1.000000e+00 : f32
    %97 = vector.broadcast %cst_21 : f32 to vector<8x32xf32>
    %98 = arith.addf %97, %96 : vector<8x32xf32>
    %99 = arith.divf %97, %98 : vector<8x32xf32>
    %100 = arith.mulf %91, %43 : vector<8x32xf32>
    %101 = arith.mulf %85, %93 : vector<8x32xf32>
    %102 = arith.addf %100, %101 : vector<8x32xf32>
    %103 = math.tanh %102 : vector<8x32xf32>
    %104 = arith.mulf %99, %103 : vector<8x32xf32>
    %105 = vector.extract_strided_slice %79 {offsets = [0, 0], sizes = [8, 32], strides = [1, 1]} : vector<8x128xf32> to vector<8x32xf32>
    %106 = arith.negf %105 : vector<8x32xf32>
    %107 = math.exp %106 : vector<8x32xf32>
    %cst_22 = arith.constant 1.000000e+00 : f32
    %108 = vector.broadcast %cst_22 : f32 to vector<8x32xf32>
    %109 = arith.addf %108, %107 : vector<8x32xf32>
    %110 = arith.divf %108, %109 : vector<8x32xf32>
    %111 = vector.extract_strided_slice %79 {offsets = [0, 32], sizes = [8, 32], strides = [1, 1]} : vector<8x128xf32> to vector<8x32xf32>
    %112 = arith.negf %111 : vector<8x32xf32>
    %113 = math.exp %112 : vector<8x32xf32>
    %cst_23 = arith.constant 1.000000e+00 : f32
    %114 = vector.broadcast %cst_23 : f32 to vector<8x32xf32>
    %115 = arith.addf %114, %113 : vector<8x32xf32>
    %116 = arith.divf %114, %115 : vector<8x32xf32>
    %117 = vector.extract_strided_slice %79 {offsets = [0, 64], sizes = [8, 32], strides = [1, 1]} : vector<8x128xf32> to vector<8x32xf32>
    %118 = math.tanh %117 : vector<8x32xf32>
    %119 = vector.extract_strided_slice %79 {offsets = [0, 96], sizes = [8, 32], strides = [1, 1]} : vector<8x128xf32> to vector<8x32xf32>
    %120 = arith.negf %119 : vector<8x32xf32>
    %121 = math.exp %120 : vector<8x32xf32>
    %cst_24 = arith.constant 1.000000e+00 : f32
    %122 = vector.broadcast %cst_24 : f32 to vector<8x32xf32>
    %123 = arith.addf %122, %121 : vector<8x32xf32>
    %124 = arith.divf %122, %123 : vector<8x32xf32>
    %125 = arith.mulf %116, %68 : vector<8x32xf32>
    %126 = arith.mulf %110, %118 : vector<8x32xf32>
    %127 = arith.addf %125, %126 : vector<8x32xf32>
    %128 = math.tanh %127 : vector<8x32xf32>
    %129 = arith.mulf %124, %128 : vector<8x32xf32>
    %130 = tpu.concatenate %104, %129 in 0 : vector<8x32xf32>, vector<8x32xf32> -> vector<16x32xf32>
    %131 = arith.truncf %130 : vector<16x32xf32> to vector<16x32xbf16>
    %cst_25 = arith.constant dense<0.000000e+00> : vector<16x256xf32>
    %132 = tpu.matmul %131, %7, %cst_25 {dimension_numbers = #tpu.dot_dimension_numbers<[1], [0], [0], [1], [0, 0, 1, 1], [], []>} : vector<16x32xbf16>, vector<32x256xbf16>, vector<16x256xf32> -> vector<16x256xf32>
    %133 = vector.extract_strided_slice %6 {offsets = [16, 0], sizes = [8, 128], strides = [1, 1]} : vector<64x256xf32> to vector<8x128xf32>
    %134 = vector.extract_strided_slice %132 {offsets = [0, 0], sizes = [8, 128], strides = [1, 1]} : vector<16x256xf32> to vector<8x128xf32>
    %135 = arith.addf %133, %134 : vector<8x128xf32>
    %136 = vector.extract_strided_slice %6 {offsets = [40, 128], sizes = [8, 128], strides = [1, 1]} : vector<64x256xf32> to vector<8x128xf32>
    %137 = vector.extract_strided_slice %132 {offsets = [8, 128], sizes = [8, 128], strides = [1, 1]} : vector<16x256xf32> to vector<8x128xf32>
    %138 = arith.addf %136, %137 : vector<8x128xf32>
    %139 = vector.extract_strided_slice %135 {offsets = [0, 0], sizes = [8, 32], strides = [1, 1]} : vector<8x128xf32> to vector<8x32xf32>
    %140 = arith.negf %139 : vector<8x32xf32>
    %141 = math.exp %140 : vector<8x32xf32>
    %cst_26 = arith.constant 1.000000e+00 : f32
    %142 = vector.broadcast %cst_26 : f32 to vector<8x32xf32>
    %143 = arith.addf %142, %141 : vector<8x32xf32>
    %144 = arith.divf %142, %143 : vector<8x32xf32>
    %145 = vector.extract_strided_slice %135 {offsets = [0, 32], sizes = [8, 32], strides = [1, 1]} : vector<8x128xf32> to vector<8x32xf32>
    %146 = arith.negf %145 : vector<8x32xf32>
    %147 = math.exp %146 : vector<8x32xf32>
    %cst_27 = arith.constant 1.000000e+00 : f32
    %148 = vector.broadcast %cst_27 : f32 to vector<8x32xf32>
    %149 = arith.addf %148, %147 : vector<8x32xf32>
    %150 = arith.divf %148, %149 : vector<8x32xf32>
    %151 = vector.extract_strided_slice %135 {offsets = [0, 64], sizes = [8, 32], strides = [1, 1]} : vector<8x128xf32> to vector<8x32xf32>
    %152 = math.tanh %151 : vector<8x32xf32>
    %153 = vector.extract_strided_slice %135 {offsets = [0, 96], sizes = [8, 32], strides = [1, 1]} : vector<8x128xf32> to vector<8x32xf32>
    %154 = arith.negf %153 : vector<8x32xf32>
    %155 = math.exp %154 : vector<8x32xf32>
    %cst_28 = arith.constant 1.000000e+00 : f32
    %156 = vector.broadcast %cst_28 : f32 to vector<8x32xf32>
    %157 = arith.addf %156, %155 : vector<8x32xf32>
    %158 = arith.divf %156, %157 : vector<8x32xf32>
    %159 = arith.mulf %150, %102 : vector<8x32xf32>
    %160 = arith.mulf %144, %152 : vector<8x32xf32>
    %161 = arith.addf %159, %160 : vector<8x32xf32>
    %162 = math.tanh %161 : vector<8x32xf32>
    %163 = arith.mulf %158, %162 : vector<8x32xf32>
    %164 = vector.extract_strided_slice %138 {offsets = [0, 0], sizes = [8, 32], strides = [1, 1]} : vector<8x128xf32> to vector<8x32xf32>
    %165 = arith.negf %164 : vector<8x32xf32>
    %166 = math.exp %165 : vector<8x32xf32>
    %cst_29 = arith.constant 1.000000e+00 : f32
    %167 = vector.broadcast %cst_29 : f32 to vector<8x32xf32>
    %168 = arith.addf %167, %166 : vector<8x32xf32>
    %169 = arith.divf %167, %168 : vector<8x32xf32>
    %170 = vector.extract_strided_slice %138 {offsets = [0, 32], sizes = [8, 32], strides = [1, 1]} : vector<8x128xf32> to vector<8x32xf32>
    %171 = arith.negf %170 : vector<8x32xf32>
    %172 = math.exp %171 : vector<8x32xf32>
    %cst_30 = arith.constant 1.000000e+00 : f32
    %173 = vector.broadcast %cst_30 : f32 to vector<8x32xf32>
    %174 = arith.addf %173, %172 : vector<8x32xf32>
    %175 = arith.divf %173, %174 : vector<8x32xf32>
    %176 = vector.extract_strided_slice %138 {offsets = [0, 64], sizes = [8, 32], strides = [1, 1]} : vector<8x128xf32> to vector<8x32xf32>
    %177 = math.tanh %176 : vector<8x32xf32>
    %178 = vector.extract_strided_slice %138 {offsets = [0, 96], sizes = [8, 32], strides = [1, 1]} : vector<8x128xf32> to vector<8x32xf32>
    %179 = arith.negf %178 : vector<8x32xf32>
    %180 = math.exp %179 : vector<8x32xf32>
    %cst_31 = arith.constant 1.000000e+00 : f32
    %181 = vector.broadcast %cst_31 : f32 to vector<8x32xf32>
    %182 = arith.addf %181, %180 : vector<8x32xf32>
    %183 = arith.divf %181, %182 : vector<8x32xf32>
    %184 = arith.mulf %175, %127 : vector<8x32xf32>
    %185 = arith.mulf %169, %177 : vector<8x32xf32>
    %186 = arith.addf %184, %185 : vector<8x32xf32>
    %187 = math.tanh %186 : vector<8x32xf32>
    %188 = arith.mulf %183, %187 : vector<8x32xf32>
    %189 = tpu.concatenate %163, %188 in 0 : vector<8x32xf32>, vector<8x32xf32> -> vector<16x32xf32>
    %190 = arith.truncf %189 : vector<16x32xf32> to vector<16x32xbf16>
    %cst_32 = arith.constant dense<0.000000e+00> : vector<16x256xf32>
    %191 = tpu.matmul %190, %7, %cst_32 {dimension_numbers = #tpu.dot_dimension_numbers<[1], [0], [0], [1], [0, 0, 1, 1], [], []>} : vector<16x32xbf16>, vector<32x256xbf16>, vector<16x256xf32> -> vector<16x256xf32>
    %192 = vector.extract_strided_slice %6 {offsets = [24, 0], sizes = [8, 128], strides = [1, 1]} : vector<64x256xf32> to vector<8x128xf32>
    %193 = vector.extract_strided_slice %191 {offsets = [0, 0], sizes = [8, 128], strides = [1, 1]} : vector<16x256xf32> to vector<8x128xf32>
    %194 = arith.addf %192, %193 : vector<8x128xf32>
    %195 = vector.extract_strided_slice %6 {offsets = [32, 128], sizes = [8, 128], strides = [1, 1]} : vector<64x256xf32> to vector<8x128xf32>
    %196 = vector.extract_strided_slice %191 {offsets = [8, 128], sizes = [8, 128], strides = [1, 1]} : vector<16x256xf32> to vector<8x128xf32>
    %197 = arith.addf %195, %196 : vector<8x128xf32>
    %198 = vector.extract_strided_slice %194 {offsets = [0, 0], sizes = [8, 32], strides = [1, 1]} : vector<8x128xf32> to vector<8x32xf32>
    %199 = arith.negf %198 : vector<8x32xf32>
    %200 = math.exp %199 : vector<8x32xf32>
    %cst_33 = arith.constant 1.000000e+00 : f32
    %201 = vector.broadcast %cst_33 : f32 to vector<8x32xf32>
    %202 = arith.addf %201, %200 : vector<8x32xf32>
    %203 = arith.divf %201, %202 : vector<8x32xf32>
    %204 = vector.extract_strided_slice %194 {offsets = [0, 32], sizes = [8, 32], strides = [1, 1]} : vector<8x128xf32> to vector<8x32xf32>
    %205 = arith.negf %204 : vector<8x32xf32>
    %206 = math.exp %205 : vector<8x32xf32>
    %cst_34 = arith.constant 1.000000e+00 : f32
    %207 = vector.broadcast %cst_34 : f32 to vector<8x32xf32>
    %208 = arith.addf %207, %206 : vector<8x32xf32>
    %209 = arith.divf %207, %208 : vector<8x32xf32>
    %210 = vector.extract_strided_slice %194 {offsets = [0, 64], sizes = [8, 32], strides = [1, 1]} : vector<8x128xf32> to vector<8x32xf32>
    %211 = math.tanh %210 : vector<8x32xf32>
    %212 = vector.extract_strided_slice %194 {offsets = [0, 96], sizes = [8, 32], strides = [1, 1]} : vector<8x128xf32> to vector<8x32xf32>
    %213 = arith.negf %212 : vector<8x32xf32>
    %214 = math.exp %213 : vector<8x32xf32>
    %cst_35 = arith.constant 1.000000e+00 : f32
    %215 = vector.broadcast %cst_35 : f32 to vector<8x32xf32>
    %216 = arith.addf %215, %214 : vector<8x32xf32>
    %217 = arith.divf %215, %216 : vector<8x32xf32>
    %218 = arith.mulf %209, %161 : vector<8x32xf32>
    %219 = arith.mulf %203, %211 : vector<8x32xf32>
    %220 = arith.addf %218, %219 : vector<8x32xf32>
    %221 = math.tanh %220 : vector<8x32xf32>
    %222 = arith.mulf %217, %221 : vector<8x32xf32>
    %223 = vector.extract_strided_slice %197 {offsets = [0, 0], sizes = [8, 32], strides = [1, 1]} : vector<8x128xf32> to vector<8x32xf32>
    %224 = arith.negf %223 : vector<8x32xf32>
    %225 = math.exp %224 : vector<8x32xf32>
    %cst_36 = arith.constant 1.000000e+00 : f32
    %226 = vector.broadcast %cst_36 : f32 to vector<8x32xf32>
    %227 = arith.addf %226, %225 : vector<8x32xf32>
    %228 = arith.divf %226, %227 : vector<8x32xf32>
    %229 = vector.extract_strided_slice %197 {offsets = [0, 32], sizes = [8, 32], strides = [1, 1]} : vector<8x128xf32> to vector<8x32xf32>
    %230 = arith.negf %229 : vector<8x32xf32>
    %231 = math.exp %230 : vector<8x32xf32>
    %cst_37 = arith.constant 1.000000e+00 : f32
    %232 = vector.broadcast %cst_37 : f32 to vector<8x32xf32>
    %233 = arith.addf %232, %231 : vector<8x32xf32>
    %234 = arith.divf %232, %233 : vector<8x32xf32>
    %235 = vector.extract_strided_slice %197 {offsets = [0, 64], sizes = [8, 32], strides = [1, 1]} : vector<8x128xf32> to vector<8x32xf32>
    %236 = math.tanh %235 : vector<8x32xf32>
    %237 = vector.extract_strided_slice %197 {offsets = [0, 96], sizes = [8, 32], strides = [1, 1]} : vector<8x128xf32> to vector<8x32xf32>
    %238 = arith.negf %237 : vector<8x32xf32>
    %239 = math.exp %238 : vector<8x32xf32>
    %cst_38 = arith.constant 1.000000e+00 : f32
    %240 = vector.broadcast %cst_38 : f32 to vector<8x32xf32>
    %241 = arith.addf %240, %239 : vector<8x32xf32>
    %242 = arith.divf %240, %241 : vector<8x32xf32>
    %243 = arith.mulf %234, %186 : vector<8x32xf32>
    %244 = arith.mulf %228, %236 : vector<8x32xf32>
    %245 = arith.addf %243, %244 : vector<8x32xf32>
    %246 = math.tanh %245 : vector<8x32xf32>
    %247 = arith.mulf %242, %246 : vector<8x32xf32>
    %248 = tpu.concatenate %222, %247 in 0 : vector<8x32xf32>, vector<8x32xf32> -> vector<16x32xf32>
    %249 = arith.truncf %248 : vector<16x32xf32> to vector<16x32xbf16>
    %cst_39 = arith.constant dense<0.000000e+00> : vector<16x256xf32>
    %250 = tpu.matmul %249, %7, %cst_39 {dimension_numbers = #tpu.dot_dimension_numbers<[1], [0], [0], [1], [0, 0, 1, 1], [], []>} : vector<16x32xbf16>, vector<32x256xbf16>, vector<16x256xf32> -> vector<16x256xf32>
    %251 = vector.extract_strided_slice %6 {offsets = [32, 0], sizes = [8, 128], strides = [1, 1]} : vector<64x256xf32> to vector<8x128xf32>
    %252 = vector.extract_strided_slice %250 {offsets = [0, 0], sizes = [8, 128], strides = [1, 1]} : vector<16x256xf32> to vector<8x128xf32>
    %253 = arith.addf %251, %252 : vector<8x128xf32>
    %254 = vector.extract_strided_slice %6 {offsets = [24, 128], sizes = [8, 128], strides = [1, 1]} : vector<64x256xf32> to vector<8x128xf32>
    %255 = vector.extract_strided_slice %250 {offsets = [8, 128], sizes = [8, 128], strides = [1, 1]} : vector<16x256xf32> to vector<8x128xf32>
    %256 = arith.addf %254, %255 : vector<8x128xf32>
    %257 = vector.extract_strided_slice %253 {offsets = [0, 0], sizes = [8, 32], strides = [1, 1]} : vector<8x128xf32> to vector<8x32xf32>
    %258 = arith.negf %257 : vector<8x32xf32>
    %259 = math.exp %258 : vector<8x32xf32>
    %cst_40 = arith.constant 1.000000e+00 : f32
    %260 = vector.broadcast %cst_40 : f32 to vector<8x32xf32>
    %261 = arith.addf %260, %259 : vector<8x32xf32>
    %262 = arith.divf %260, %261 : vector<8x32xf32>
    %263 = vector.extract_strided_slice %253 {offsets = [0, 32], sizes = [8, 32], strides = [1, 1]} : vector<8x128xf32> to vector<8x32xf32>
    %264 = arith.negf %263 : vector<8x32xf32>
    %265 = math.exp %264 : vector<8x32xf32>
    %cst_41 = arith.constant 1.000000e+00 : f32
    %266 = vector.broadcast %cst_41 : f32 to vector<8x32xf32>
    %267 = arith.addf %266, %265 : vector<8x32xf32>
    %268 = arith.divf %266, %267 : vector<8x32xf32>
    %269 = vector.extract_strided_slice %253 {offsets = [0, 64], sizes = [8, 32], strides = [1, 1]} : vector<8x128xf32> to vector<8x32xf32>
    %270 = math.tanh %269 : vector<8x32xf32>
    %271 = vector.extract_strided_slice %253 {offsets = [0, 96], sizes = [8, 32], strides = [1, 1]} : vector<8x128xf32> to vector<8x32xf32>
    %272 = arith.negf %271 : vector<8x32xf32>
    %273 = math.exp %272 : vector<8x32xf32>
    %cst_42 = arith.constant 1.000000e+00 : f32
    %274 = vector.broadcast %cst_42 : f32 to vector<8x32xf32>
    %275 = arith.addf %274, %273 : vector<8x32xf32>
    %276 = arith.divf %274, %275 : vector<8x32xf32>
    %277 = arith.mulf %268, %220 : vector<8x32xf32>
    %278 = arith.mulf %262, %270 : vector<8x32xf32>
    %279 = arith.addf %277, %278 : vector<8x32xf32>
    %280 = math.tanh %279 : vector<8x32xf32>
    %281 = arith.mulf %276, %280 : vector<8x32xf32>
    %282 = vector.extract_strided_slice %256 {offsets = [0, 0], sizes = [8, 32], strides = [1, 1]} : vector<8x128xf32> to vector<8x32xf32>
    %283 = arith.negf %282 : vector<8x32xf32>
    %284 = math.exp %283 : vector<8x32xf32>
    %cst_43 = arith.constant 1.000000e+00 : f32
    %285 = vector.broadcast %cst_43 : f32 to vector<8x32xf32>
    %286 = arith.addf %285, %284 : vector<8x32xf32>
    %287 = arith.divf %285, %286 : vector<8x32xf32>
    %288 = vector.extract_strided_slice %256 {offsets = [0, 32], sizes = [8, 32], strides = [1, 1]} : vector<8x128xf32> to vector<8x32xf32>
    %289 = arith.negf %288 : vector<8x32xf32>
    %290 = math.exp %289 : vector<8x32xf32>
    %cst_44 = arith.constant 1.000000e+00 : f32
    %291 = vector.broadcast %cst_44 : f32 to vector<8x32xf32>
    %292 = arith.addf %291, %290 : vector<8x32xf32>
    %293 = arith.divf %291, %292 : vector<8x32xf32>
    %294 = vector.extract_strided_slice %256 {offsets = [0, 64], sizes = [8, 32], strides = [1, 1]} : vector<8x128xf32> to vector<8x32xf32>
    %295 = math.tanh %294 : vector<8x32xf32>
    %296 = vector.extract_strided_slice %256 {offsets = [0, 96], sizes = [8, 32], strides = [1, 1]} : vector<8x128xf32> to vector<8x32xf32>
    %297 = arith.negf %296 : vector<8x32xf32>
    %298 = math.exp %297 : vector<8x32xf32>
    %cst_45 = arith.constant 1.000000e+00 : f32
    %299 = vector.broadcast %cst_45 : f32 to vector<8x32xf32>
    %300 = arith.addf %299, %298 : vector<8x32xf32>
    %301 = arith.divf %299, %300 : vector<8x32xf32>
    %302 = arith.mulf %293, %245 : vector<8x32xf32>
    %303 = arith.mulf %287, %295 : vector<8x32xf32>
    %304 = arith.addf %302, %303 : vector<8x32xf32>
    %305 = math.tanh %304 : vector<8x32xf32>
    %306 = arith.mulf %301, %305 : vector<8x32xf32>
    %307 = tpu.concatenate %281, %306 in 0 : vector<8x32xf32>, vector<8x32xf32> -> vector<16x32xf32>
    %308 = arith.truncf %307 : vector<16x32xf32> to vector<16x32xbf16>
    %cst_46 = arith.constant dense<0.000000e+00> : vector<16x256xf32>
    %309 = tpu.matmul %308, %7, %cst_46 {dimension_numbers = #tpu.dot_dimension_numbers<[1], [0], [0], [1], [0, 0, 1, 1], [], []>} : vector<16x32xbf16>, vector<32x256xbf16>, vector<16x256xf32> -> vector<16x256xf32>
    %310 = vector.extract_strided_slice %6 {offsets = [40, 0], sizes = [8, 128], strides = [1, 1]} : vector<64x256xf32> to vector<8x128xf32>
    %311 = vector.extract_strided_slice %309 {offsets = [0, 0], sizes = [8, 128], strides = [1, 1]} : vector<16x256xf32> to vector<8x128xf32>
    %312 = arith.addf %310, %311 : vector<8x128xf32>
    %313 = vector.extract_strided_slice %6 {offsets = [16, 128], sizes = [8, 128], strides = [1, 1]} : vector<64x256xf32> to vector<8x128xf32>
    %314 = vector.extract_strided_slice %309 {offsets = [8, 128], sizes = [8, 128], strides = [1, 1]} : vector<16x256xf32> to vector<8x128xf32>
    %315 = arith.addf %313, %314 : vector<8x128xf32>
    %316 = vector.extract_strided_slice %312 {offsets = [0, 0], sizes = [8, 32], strides = [1, 1]} : vector<8x128xf32> to vector<8x32xf32>
    %317 = arith.negf %316 : vector<8x32xf32>
    %318 = math.exp %317 : vector<8x32xf32>
    %cst_47 = arith.constant 1.000000e+00 : f32
    %319 = vector.broadcast %cst_47 : f32 to vector<8x32xf32>
    %320 = arith.addf %319, %318 : vector<8x32xf32>
    %321 = arith.divf %319, %320 : vector<8x32xf32>
    %322 = vector.extract_strided_slice %312 {offsets = [0, 32], sizes = [8, 32], strides = [1, 1]} : vector<8x128xf32> to vector<8x32xf32>
    %323 = arith.negf %322 : vector<8x32xf32>
    %324 = math.exp %323 : vector<8x32xf32>
    %cst_48 = arith.constant 1.000000e+00 : f32
    %325 = vector.broadcast %cst_48 : f32 to vector<8x32xf32>
    %326 = arith.addf %325, %324 : vector<8x32xf32>
    %327 = arith.divf %325, %326 : vector<8x32xf32>
    %328 = vector.extract_strided_slice %312 {offsets = [0, 64], sizes = [8, 32], strides = [1, 1]} : vector<8x128xf32> to vector<8x32xf32>
    %329 = math.tanh %328 : vector<8x32xf32>
    %330 = vector.extract_strided_slice %312 {offsets = [0, 96], sizes = [8, 32], strides = [1, 1]} : vector<8x128xf32> to vector<8x32xf32>
    %331 = arith.negf %330 : vector<8x32xf32>
    %332 = math.exp %331 : vector<8x32xf32>
    %cst_49 = arith.constant 1.000000e+00 : f32
    %333 = vector.broadcast %cst_49 : f32 to vector<8x32xf32>
    %334 = arith.addf %333, %332 : vector<8x32xf32>
    %335 = arith.divf %333, %334 : vector<8x32xf32>
    %336 = arith.mulf %327, %279 : vector<8x32xf32>
    %337 = arith.mulf %321, %329 : vector<8x32xf32>
    %338 = arith.addf %336, %337 : vector<8x32xf32>
    %339 = math.tanh %338 : vector<8x32xf32>
    %340 = arith.mulf %335, %339 : vector<8x32xf32>
    %341 = vector.extract_strided_slice %315 {offsets = [0, 0], sizes = [8, 32], strides = [1, 1]} : vector<8x128xf32> to vector<8x32xf32>
    %342 = arith.negf %341 : vector<8x32xf32>
    %343 = math.exp %342 : vector<8x32xf32>
    %cst_50 = arith.constant 1.000000e+00 : f32
    %344 = vector.broadcast %cst_50 : f32 to vector<8x32xf32>
    %345 = arith.addf %344, %343 : vector<8x32xf32>
    %346 = arith.divf %344, %345 : vector<8x32xf32>
    %347 = vector.extract_strided_slice %315 {offsets = [0, 32], sizes = [8, 32], strides = [1, 1]} : vector<8x128xf32> to vector<8x32xf32>
    %348 = arith.negf %347 : vector<8x32xf32>
    %349 = math.exp %348 : vector<8x32xf32>
    %cst_51 = arith.constant 1.000000e+00 : f32
    %350 = vector.broadcast %cst_51 : f32 to vector<8x32xf32>
    %351 = arith.addf %350, %349 : vector<8x32xf32>
    %352 = arith.divf %350, %351 : vector<8x32xf32>
    %353 = vector.extract_strided_slice %315 {offsets = [0, 64], sizes = [8, 32], strides = [1, 1]} : vector<8x128xf32> to vector<8x32xf32>
    %354 = math.tanh %353 : vector<8x32xf32>
    %355 = vector.extract_strided_slice %315 {offsets = [0, 96], sizes = [8, 32], strides = [1, 1]} : vector<8x128xf32> to vector<8x32xf32>
    %356 = arith.negf %355 : vector<8x32xf32>
    %357 = math.exp %356 : vector<8x32xf32>
    %cst_52 = arith.constant 1.000000e+00 : f32
    %358 = vector.broadcast %cst_52 : f32 to vector<8x32xf32>
    %359 = arith.addf %358, %357 : vector<8x32xf32>
    %360 = arith.divf %358, %359 : vector<8x32xf32>
    %361 = arith.mulf %352, %304 : vector<8x32xf32>
    %362 = arith.mulf %346, %354 : vector<8x32xf32>
    %363 = arith.addf %361, %362 : vector<8x32xf32>
    %364 = math.tanh %363 : vector<8x32xf32>
    %365 = arith.mulf %360, %364 : vector<8x32xf32>
    %366 = tpu.concatenate %340, %365 in 0 : vector<8x32xf32>, vector<8x32xf32> -> vector<16x32xf32>
    %367 = arith.truncf %366 : vector<16x32xf32> to vector<16x32xbf16>
    %cst_53 = arith.constant dense<0.000000e+00> : vector<16x256xf32>
    %368 = tpu.matmul %367, %7, %cst_53 {dimension_numbers = #tpu.dot_dimension_numbers<[1], [0], [0], [1], [0, 0, 1, 1], [], []>} : vector<16x32xbf16>, vector<32x256xbf16>, vector<16x256xf32> -> vector<16x256xf32>
    %369 = vector.extract_strided_slice %6 {offsets = [48, 0], sizes = [8, 128], strides = [1, 1]} : vector<64x256xf32> to vector<8x128xf32>
    %370 = vector.extract_strided_slice %368 {offsets = [0, 0], sizes = [8, 128], strides = [1, 1]} : vector<16x256xf32> to vector<8x128xf32>
    %371 = arith.addf %369, %370 : vector<8x128xf32>
    %372 = vector.extract_strided_slice %6 {offsets = [8, 128], sizes = [8, 128], strides = [1, 1]} : vector<64x256xf32> to vector<8x128xf32>
    %373 = vector.extract_strided_slice %368 {offsets = [8, 128], sizes = [8, 128], strides = [1, 1]} : vector<16x256xf32> to vector<8x128xf32>
    %374 = arith.addf %372, %373 : vector<8x128xf32>
    %375 = vector.extract_strided_slice %371 {offsets = [0, 0], sizes = [8, 32], strides = [1, 1]} : vector<8x128xf32> to vector<8x32xf32>
    %376 = arith.negf %375 : vector<8x32xf32>
    %377 = math.exp %376 : vector<8x32xf32>
    %cst_54 = arith.constant 1.000000e+00 : f32
    %378 = vector.broadcast %cst_54 : f32 to vector<8x32xf32>
    %379 = arith.addf %378, %377 : vector<8x32xf32>
    %380 = arith.divf %378, %379 : vector<8x32xf32>
    %381 = vector.extract_strided_slice %371 {offsets = [0, 32], sizes = [8, 32], strides = [1, 1]} : vector<8x128xf32> to vector<8x32xf32>
    %382 = arith.negf %381 : vector<8x32xf32>
    %383 = math.exp %382 : vector<8x32xf32>
    %cst_55 = arith.constant 1.000000e+00 : f32
    %384 = vector.broadcast %cst_55 : f32 to vector<8x32xf32>
    %385 = arith.addf %384, %383 : vector<8x32xf32>
    %386 = arith.divf %384, %385 : vector<8x32xf32>
    %387 = vector.extract_strided_slice %371 {offsets = [0, 64], sizes = [8, 32], strides = [1, 1]} : vector<8x128xf32> to vector<8x32xf32>
    %388 = math.tanh %387 : vector<8x32xf32>
    %389 = vector.extract_strided_slice %371 {offsets = [0, 96], sizes = [8, 32], strides = [1, 1]} : vector<8x128xf32> to vector<8x32xf32>
    %390 = arith.negf %389 : vector<8x32xf32>
    %391 = math.exp %390 : vector<8x32xf32>
    %cst_56 = arith.constant 1.000000e+00 : f32
    %392 = vector.broadcast %cst_56 : f32 to vector<8x32xf32>
    %393 = arith.addf %392, %391 : vector<8x32xf32>
    %394 = arith.divf %392, %393 : vector<8x32xf32>
    %395 = arith.mulf %386, %338 : vector<8x32xf32>
    %396 = arith.mulf %380, %388 : vector<8x32xf32>
    %397 = arith.addf %395, %396 : vector<8x32xf32>
    %398 = math.tanh %397 : vector<8x32xf32>
    %399 = arith.mulf %394, %398 : vector<8x32xf32>
    %400 = vector.extract_strided_slice %374 {offsets = [0, 0], sizes = [8, 32], strides = [1, 1]} : vector<8x128xf32> to vector<8x32xf32>
    %401 = arith.negf %400 : vector<8x32xf32>
    %402 = math.exp %401 : vector<8x32xf32>
    %cst_57 = arith.constant 1.000000e+00 : f32
    %403 = vector.broadcast %cst_57 : f32 to vector<8x32xf32>
    %404 = arith.addf %403, %402 : vector<8x32xf32>
    %405 = arith.divf %403, %404 : vector<8x32xf32>
    %406 = vector.extract_strided_slice %374 {offsets = [0, 32], sizes = [8, 32], strides = [1, 1]} : vector<8x128xf32> to vector<8x32xf32>
    %407 = arith.negf %406 : vector<8x32xf32>
    %408 = math.exp %407 : vector<8x32xf32>
    %cst_58 = arith.constant 1.000000e+00 : f32
    %409 = vector.broadcast %cst_58 : f32 to vector<8x32xf32>
    %410 = arith.addf %409, %408 : vector<8x32xf32>
    %411 = arith.divf %409, %410 : vector<8x32xf32>
    %412 = vector.extract_strided_slice %374 {offsets = [0, 64], sizes = [8, 32], strides = [1, 1]} : vector<8x128xf32> to vector<8x32xf32>
    %413 = math.tanh %412 : vector<8x32xf32>
    %414 = vector.extract_strided_slice %374 {offsets = [0, 96], sizes = [8, 32], strides = [1, 1]} : vector<8x128xf32> to vector<8x32xf32>
    %415 = arith.negf %414 : vector<8x32xf32>
    %416 = math.exp %415 : vector<8x32xf32>
    %cst_59 = arith.constant 1.000000e+00 : f32
    %417 = vector.broadcast %cst_59 : f32 to vector<8x32xf32>
    %418 = arith.addf %417, %416 : vector<8x32xf32>
    %419 = arith.divf %417, %418 : vector<8x32xf32>
    %420 = arith.mulf %411, %363 : vector<8x32xf32>
    %421 = arith.mulf %405, %413 : vector<8x32xf32>
    %422 = arith.addf %420, %421 : vector<8x32xf32>
    %423 = math.tanh %422 : vector<8x32xf32>
    %424 = arith.mulf %419, %423 : vector<8x32xf32>
    %425 = tpu.concatenate %399, %424 in 0 : vector<8x32xf32>, vector<8x32xf32> -> vector<16x32xf32>
    %426 = arith.truncf %425 : vector<16x32xf32> to vector<16x32xbf16>
    %cst_60 = arith.constant dense<0.000000e+00> : vector<16x256xf32>
    %427 = tpu.matmul %426, %7, %cst_60 {dimension_numbers = #tpu.dot_dimension_numbers<[1], [0], [0], [1], [0, 0, 1, 1], [], []>} : vector<16x32xbf16>, vector<32x256xbf16>, vector<16x256xf32> -> vector<16x256xf32>
    %428 = vector.extract_strided_slice %6 {offsets = [56, 0], sizes = [8, 128], strides = [1, 1]} : vector<64x256xf32> to vector<8x128xf32>
    %429 = vector.extract_strided_slice %427 {offsets = [0, 0], sizes = [8, 128], strides = [1, 1]} : vector<16x256xf32> to vector<8x128xf32>
    %430 = arith.addf %428, %429 : vector<8x128xf32>
    %431 = vector.extract_strided_slice %6 {offsets = [0, 128], sizes = [8, 128], strides = [1, 1]} : vector<64x256xf32> to vector<8x128xf32>
    %432 = vector.extract_strided_slice %427 {offsets = [8, 128], sizes = [8, 128], strides = [1, 1]} : vector<16x256xf32> to vector<8x128xf32>
    %433 = arith.addf %431, %432 : vector<8x128xf32>
    %434 = vector.extract_strided_slice %430 {offsets = [0, 0], sizes = [8, 32], strides = [1, 1]} : vector<8x128xf32> to vector<8x32xf32>
    %435 = arith.negf %434 : vector<8x32xf32>
    %436 = math.exp %435 : vector<8x32xf32>
    %cst_61 = arith.constant 1.000000e+00 : f32
    %437 = vector.broadcast %cst_61 : f32 to vector<8x32xf32>
    %438 = arith.addf %437, %436 : vector<8x32xf32>
    %439 = arith.divf %437, %438 : vector<8x32xf32>
    %440 = vector.extract_strided_slice %430 {offsets = [0, 32], sizes = [8, 32], strides = [1, 1]} : vector<8x128xf32> to vector<8x32xf32>
    %441 = arith.negf %440 : vector<8x32xf32>
    %442 = math.exp %441 : vector<8x32xf32>
    %cst_62 = arith.constant 1.000000e+00 : f32
    %443 = vector.broadcast %cst_62 : f32 to vector<8x32xf32>
    %444 = arith.addf %443, %442 : vector<8x32xf32>
    %445 = arith.divf %443, %444 : vector<8x32xf32>
    %446 = vector.extract_strided_slice %430 {offsets = [0, 64], sizes = [8, 32], strides = [1, 1]} : vector<8x128xf32> to vector<8x32xf32>
    %447 = math.tanh %446 : vector<8x32xf32>
    %448 = vector.extract_strided_slice %430 {offsets = [0, 96], sizes = [8, 32], strides = [1, 1]} : vector<8x128xf32> to vector<8x32xf32>
    %449 = arith.negf %448 : vector<8x32xf32>
    %450 = math.exp %449 : vector<8x32xf32>
    %cst_63 = arith.constant 1.000000e+00 : f32
    %451 = vector.broadcast %cst_63 : f32 to vector<8x32xf32>
    %452 = arith.addf %451, %450 : vector<8x32xf32>
    %453 = arith.divf %451, %452 : vector<8x32xf32>
    %454 = arith.mulf %445, %397 : vector<8x32xf32>
    %455 = arith.mulf %439, %447 : vector<8x32xf32>
    %456 = arith.addf %454, %455 : vector<8x32xf32>
    %457 = math.tanh %456 : vector<8x32xf32>
    %458 = arith.mulf %453, %457 : vector<8x32xf32>
    %459 = vector.extract_strided_slice %433 {offsets = [0, 0], sizes = [8, 32], strides = [1, 1]} : vector<8x128xf32> to vector<8x32xf32>
    %460 = arith.negf %459 : vector<8x32xf32>
    %461 = math.exp %460 : vector<8x32xf32>
    %cst_64 = arith.constant 1.000000e+00 : f32
    %462 = vector.broadcast %cst_64 : f32 to vector<8x32xf32>
    %463 = arith.addf %462, %461 : vector<8x32xf32>
    %464 = arith.divf %462, %463 : vector<8x32xf32>
    %465 = vector.extract_strided_slice %433 {offsets = [0, 32], sizes = [8, 32], strides = [1, 1]} : vector<8x128xf32> to vector<8x32xf32>
    %466 = arith.negf %465 : vector<8x32xf32>
    %467 = math.exp %466 : vector<8x32xf32>
    %cst_65 = arith.constant 1.000000e+00 : f32
    %468 = vector.broadcast %cst_65 : f32 to vector<8x32xf32>
    %469 = arith.addf %468, %467 : vector<8x32xf32>
    %470 = arith.divf %468, %469 : vector<8x32xf32>
    %471 = vector.extract_strided_slice %433 {offsets = [0, 64], sizes = [8, 32], strides = [1, 1]} : vector<8x128xf32> to vector<8x32xf32>
    %472 = math.tanh %471 : vector<8x32xf32>
    %473 = vector.extract_strided_slice %433 {offsets = [0, 96], sizes = [8, 32], strides = [1, 1]} : vector<8x128xf32> to vector<8x32xf32>
    %474 = arith.negf %473 : vector<8x32xf32>
    %475 = math.exp %474 : vector<8x32xf32>
    %cst_66 = arith.constant 1.000000e+00 : f32
    %476 = vector.broadcast %cst_66 : f32 to vector<8x32xf32>
    %477 = arith.addf %476, %475 : vector<8x32xf32>
    %478 = arith.divf %476, %477 : vector<8x32xf32>
    %479 = arith.mulf %470, %422 : vector<8x32xf32>
    %480 = arith.mulf %464, %472 : vector<8x32xf32>
    %481 = arith.addf %479, %480 : vector<8x32xf32>
    %482 = math.tanh %481 : vector<8x32xf32>
    %483 = arith.mulf %478, %482 : vector<8x32xf32>
    %484 = tpu.concatenate %45, %104, %163, %222, %281, %340, %399, %458 in 0 : vector<8x32xf32>, vector<8x32xf32>, vector<8x32xf32>, vector<8x32xf32>, vector<8x32xf32>, vector<8x32xf32>, vector<8x32xf32>, vector<8x32xf32> -> vector<64x32xf32>
    %485 = tpu.concatenate %483, %424, %365, %306, %247, %188, %129, %70 in 0 : vector<8x32xf32>, vector<8x32xf32>, vector<8x32xf32>, vector<8x32xf32>, vector<8x32xf32>, vector<8x32xf32>, vector<8x32xf32>, vector<8x32xf32> -> vector<64x32xf32>
    %486 = arith.truncf %484 : vector<64x32xf32> to vector<64x32xbf16>
    %c0_67 = arith.constant 0 : index
    %c0_68 = arith.constant 0 : index
    %487 = vector.load %arg4[%c0_67, %c0_68] : memref<64x256xbf16, #tpu.memory_space<vmem>>, vector<32x256xbf16>
    %cst_69 = arith.constant dense<0.000000e+00> : vector<64x256xf32>
    %488 = tpu.matmul %486, %487, %cst_69 {dimension_numbers = #tpu.dot_dimension_numbers<[1], [0], [0], [1], [0, 0, 1, 1], [], []>} : vector<64x32xbf16>, vector<32x256xbf16>, vector<64x256xf32> -> vector<64x256xf32>
    %489 = arith.truncf %485 : vector<64x32xf32> to vector<64x32xbf16>
    %c32 = arith.constant 32 : index
    %c0_70 = arith.constant 0 : index
    %490 = vector.load %arg4[%c32, %c0_70] : memref<64x256xbf16, #tpu.memory_space<vmem>>, vector<32x256xbf16>
    %cst_71 = arith.constant dense<0.000000e+00> : vector<64x256xf32>
    %491 = tpu.matmul %489, %490, %cst_71 {dimension_numbers = #tpu.dot_dimension_numbers<[1], [0], [0], [1], [0, 0, 1, 1], [], []>} : vector<64x32xbf16>, vector<32x256xbf16>, vector<64x256xf32> -> vector<64x256xf32>
    %492 = arith.addf %488, %491 : vector<64x256xf32>
    %c0_72 = arith.constant 0 : index
    %c0_73 = arith.constant 0 : index
    %493 = vector.load %arg6[%c0_72, %c0_73] : memref<1x256xf32, #tpu.memory_space<vmem>>, vector<1x256xf32>
    %494 = vector.broadcast %493 : vector<1x256xf32> to vector<64x256xf32>
    %495 = arith.addf %492, %494 : vector<64x256xf32>
    %c0_74 = arith.constant 0 : index
    %c0_75 = arith.constant 0 : index
    %496 = vector.load %arg5[%c0_74, %c0_75] : memref<32x256xbf16, #tpu.memory_space<vmem>>, vector<32x256xbf16>
    %cst_76 = arith.constant 0.000000e+00 : f32
    %497 = vector.broadcast %cst_76 : f32 to vector<8x32xf32>
    %cst_77 = arith.constant 0.000000e+00 : f32
    %498 = vector.broadcast %cst_77 : f32 to vector<8x32xf32>
    %cst_78 = arith.constant 0.000000e+00 : f32
    %499 = vector.broadcast %cst_78 : f32 to vector<8x32xf32>
    %cst_79 = arith.constant 0.000000e+00 : f32
    %500 = vector.broadcast %cst_79 : f32 to vector<8x32xf32>
    %501 = tpu.concatenate %497, %499 in 0 : vector<8x32xf32>, vector<8x32xf32> -> vector<16x32xf32>
    %502 = arith.truncf %501 : vector<16x32xf32> to vector<16x32xbf16>
    %cst_80 = arith.constant dense<0.000000e+00> : vector<16x256xf32>
    %503 = tpu.matmul %502, %496, %cst_80 {dimension_numbers = #tpu.dot_dimension_numbers<[1], [0], [0], [1], [0, 0, 1, 1], [], []>} : vector<16x32xbf16>, vector<32x256xbf16>, vector<16x256xf32> -> vector<16x256xf32>
    %504 = vector.extract_strided_slice %495 {offsets = [0, 0], sizes = [8, 128], strides = [1, 1]} : vector<64x256xf32> to vector<8x128xf32>
    %505 = vector.extract_strided_slice %503 {offsets = [0, 0], sizes = [8, 128], strides = [1, 1]} : vector<16x256xf32> to vector<8x128xf32>
    %506 = arith.addf %504, %505 : vector<8x128xf32>
    %507 = vector.extract_strided_slice %495 {offsets = [56, 128], sizes = [8, 128], strides = [1, 1]} : vector<64x256xf32> to vector<8x128xf32>
    %508 = vector.extract_strided_slice %503 {offsets = [8, 128], sizes = [8, 128], strides = [1, 1]} : vector<16x256xf32> to vector<8x128xf32>
    %509 = arith.addf %507, %508 : vector<8x128xf32>
    %510 = vector.extract_strided_slice %506 {offsets = [0, 0], sizes = [8, 32], strides = [1, 1]} : vector<8x128xf32> to vector<8x32xf32>
    %511 = arith.negf %510 : vector<8x32xf32>
    %512 = math.exp %511 : vector<8x32xf32>
    %cst_81 = arith.constant 1.000000e+00 : f32
    %513 = vector.broadcast %cst_81 : f32 to vector<8x32xf32>
    %514 = arith.addf %513, %512 : vector<8x32xf32>
    %515 = arith.divf %513, %514 : vector<8x32xf32>
    %516 = vector.extract_strided_slice %506 {offsets = [0, 32], sizes = [8, 32], strides = [1, 1]} : vector<8x128xf32> to vector<8x32xf32>
    %517 = arith.negf %516 : vector<8x32xf32>
    %518 = math.exp %517 : vector<8x32xf32>
    %cst_82 = arith.constant 1.000000e+00 : f32
    %519 = vector.broadcast %cst_82 : f32 to vector<8x32xf32>
    %520 = arith.addf %519, %518 : vector<8x32xf32>
    %521 = arith.divf %519, %520 : vector<8x32xf32>
    %522 = vector.extract_strided_slice %506 {offsets = [0, 64], sizes = [8, 32], strides = [1, 1]} : vector<8x128xf32> to vector<8x32xf32>
    %523 = math.tanh %522 : vector<8x32xf32>
    %524 = vector.extract_strided_slice %506 {offsets = [0, 96], sizes = [8, 32], strides = [1, 1]} : vector<8x128xf32> to vector<8x32xf32>
    %525 = arith.negf %524 : vector<8x32xf32>
    %526 = math.exp %525 : vector<8x32xf32>
    %cst_83 = arith.constant 1.000000e+00 : f32
    %527 = vector.broadcast %cst_83 : f32 to vector<8x32xf32>
    %528 = arith.addf %527, %526 : vector<8x32xf32>
    %529 = arith.divf %527, %528 : vector<8x32xf32>
    %530 = arith.mulf %521, %498 : vector<8x32xf32>
    %531 = arith.mulf %515, %523 : vector<8x32xf32>
    %532 = arith.addf %530, %531 : vector<8x32xf32>
    %533 = math.tanh %532 : vector<8x32xf32>
    %534 = arith.mulf %529, %533 : vector<8x32xf32>
    %535 = vector.extract_strided_slice %509 {offsets = [0, 0], sizes = [8, 32], strides = [1, 1]} : vector<8x128xf32> to vector<8x32xf32>
    %536 = arith.negf %535 : vector<8x32xf32>
    %537 = math.exp %536 : vector<8x32xf32>
    %cst_84 = arith.constant 1.000000e+00 : f32
    %538 = vector.broadcast %cst_84 : f32 to vector<8x32xf32>
    %539 = arith.addf %538, %537 : vector<8x32xf32>
    %540 = arith.divf %538, %539 : vector<8x32xf32>
    %541 = vector.extract_strided_slice %509 {offsets = [0, 32], sizes = [8, 32], strides = [1, 1]} : vector<8x128xf32> to vector<8x32xf32>
    %542 = arith.negf %541 : vector<8x32xf32>
    %543 = math.exp %542 : vector<8x32xf32>
    %cst_85 = arith.constant 1.000000e+00 : f32
    %544 = vector.broadcast %cst_85 : f32 to vector<8x32xf32>
    %545 = arith.addf %544, %543 : vector<8x32xf32>
    %546 = arith.divf %544, %545 : vector<8x32xf32>
    %547 = vector.extract_strided_slice %509 {offsets = [0, 64], sizes = [8, 32], strides = [1, 1]} : vector<8x128xf32> to vector<8x32xf32>
    %548 = math.tanh %547 : vector<8x32xf32>
    %549 = vector.extract_strided_slice %509 {offsets = [0, 96], sizes = [8, 32], strides = [1, 1]} : vector<8x128xf32> to vector<8x32xf32>
    %550 = arith.negf %549 : vector<8x32xf32>
    %551 = math.exp %550 : vector<8x32xf32>
    %cst_86 = arith.constant 1.000000e+00 : f32
    %552 = vector.broadcast %cst_86 : f32 to vector<8x32xf32>
    %553 = arith.addf %552, %551 : vector<8x32xf32>
    %554 = arith.divf %552, %553 : vector<8x32xf32>
    %555 = arith.mulf %546, %500 : vector<8x32xf32>
    %556 = arith.mulf %540, %548 : vector<8x32xf32>
    %557 = arith.addf %555, %556 : vector<8x32xf32>
    %558 = math.tanh %557 : vector<8x32xf32>
    %559 = arith.mulf %554, %558 : vector<8x32xf32>
    %560 = tpu.concatenate %534, %559 in 0 : vector<8x32xf32>, vector<8x32xf32> -> vector<16x32xf32>
    %561 = arith.truncf %560 : vector<16x32xf32> to vector<16x32xbf16>
    %cst_87 = arith.constant dense<0.000000e+00> : vector<16x256xf32>
    %562 = tpu.matmul %561, %496, %cst_87 {dimension_numbers = #tpu.dot_dimension_numbers<[1], [0], [0], [1], [0, 0, 1, 1], [], []>} : vector<16x32xbf16>, vector<32x256xbf16>, vector<16x256xf32> -> vector<16x256xf32>
    %563 = vector.extract_strided_slice %495 {offsets = [8, 0], sizes = [8, 128], strides = [1, 1]} : vector<64x256xf32> to vector<8x128xf32>
    %564 = vector.extract_strided_slice %562 {offsets = [0, 0], sizes = [8, 128], strides = [1, 1]} : vector<16x256xf32> to vector<8x128xf32>
    %565 = arith.addf %563, %564 : vector<8x128xf32>
    %566 = vector.extract_strided_slice %495 {offsets = [48, 128], sizes = [8, 128], strides = [1, 1]} : vector<64x256xf32> to vector<8x128xf32>
    %567 = vector.extract_strided_slice %562 {offsets = [8, 128], sizes = [8, 128], strides = [1, 1]} : vector<16x256xf32> to vector<8x128xf32>
    %568 = arith.addf %566, %567 : vector<8x128xf32>
    %569 = vector.extract_strided_slice %565 {offsets = [0, 0], sizes = [8, 32], strides = [1, 1]} : vector<8x128xf32> to vector<8x32xf32>
    %570 = arith.negf %569 : vector<8x32xf32>
    %571 = math.exp %570 : vector<8x32xf32>
    %cst_88 = arith.constant 1.000000e+00 : f32
    %572 = vector.broadcast %cst_88 : f32 to vector<8x32xf32>
    %573 = arith.addf %572, %571 : vector<8x32xf32>
    %574 = arith.divf %572, %573 : vector<8x32xf32>
    %575 = vector.extract_strided_slice %565 {offsets = [0, 32], sizes = [8, 32], strides = [1, 1]} : vector<8x128xf32> to vector<8x32xf32>
    %576 = arith.negf %575 : vector<8x32xf32>
    %577 = math.exp %576 : vector<8x32xf32>
    %cst_89 = arith.constant 1.000000e+00 : f32
    %578 = vector.broadcast %cst_89 : f32 to vector<8x32xf32>
    %579 = arith.addf %578, %577 : vector<8x32xf32>
    %580 = arith.divf %578, %579 : vector<8x32xf32>
    %581 = vector.extract_strided_slice %565 {offsets = [0, 64], sizes = [8, 32], strides = [1, 1]} : vector<8x128xf32> to vector<8x32xf32>
    %582 = math.tanh %581 : vector<8x32xf32>
    %583 = vector.extract_strided_slice %565 {offsets = [0, 96], sizes = [8, 32], strides = [1, 1]} : vector<8x128xf32> to vector<8x32xf32>
    %584 = arith.negf %583 : vector<8x32xf32>
    %585 = math.exp %584 : vector<8x32xf32>
    %cst_90 = arith.constant 1.000000e+00 : f32
    %586 = vector.broadcast %cst_90 : f32 to vector<8x32xf32>
    %587 = arith.addf %586, %585 : vector<8x32xf32>
    %588 = arith.divf %586, %587 : vector<8x32xf32>
    %589 = arith.mulf %580, %532 : vector<8x32xf32>
    %590 = arith.mulf %574, %582 : vector<8x32xf32>
    %591 = arith.addf %589, %590 : vector<8x32xf32>
    %592 = math.tanh %591 : vector<8x32xf32>
    %593 = arith.mulf %588, %592 : vector<8x32xf32>
    %594 = vector.extract_strided_slice %568 {offsets = [0, 0], sizes = [8, 32], strides = [1, 1]} : vector<8x128xf32> to vector<8x32xf32>
    %595 = arith.negf %594 : vector<8x32xf32>
    %596 = math.exp %595 : vector<8x32xf32>
    %cst_91 = arith.constant 1.000000e+00 : f32
    %597 = vector.broadcast %cst_91 : f32 to vector<8x32xf32>
    %598 = arith.addf %597, %596 : vector<8x32xf32>
    %599 = arith.divf %597, %598 : vector<8x32xf32>
    %600 = vector.extract_strided_slice %568 {offsets = [0, 32], sizes = [8, 32], strides = [1, 1]} : vector<8x128xf32> to vector<8x32xf32>
    %601 = arith.negf %600 : vector<8x32xf32>
    %602 = math.exp %601 : vector<8x32xf32>
    %cst_92 = arith.constant 1.000000e+00 : f32
    %603 = vector.broadcast %cst_92 : f32 to vector<8x32xf32>
    %604 = arith.addf %603, %602 : vector<8x32xf32>
    %605 = arith.divf %603, %604 : vector<8x32xf32>
    %606 = vector.extract_strided_slice %568 {offsets = [0, 64], sizes = [8, 32], strides = [1, 1]} : vector<8x128xf32> to vector<8x32xf32>
    %607 = math.tanh %606 : vector<8x32xf32>
    %608 = vector.extract_strided_slice %568 {offsets = [0, 96], sizes = [8, 32], strides = [1, 1]} : vector<8x128xf32> to vector<8x32xf32>
    %609 = arith.negf %608 : vector<8x32xf32>
    %610 = math.exp %609 : vector<8x32xf32>
    %cst_93 = arith.constant 1.000000e+00 : f32
    %611 = vector.broadcast %cst_93 : f32 to vector<8x32xf32>
    %612 = arith.addf %611, %610 : vector<8x32xf32>
    %613 = arith.divf %611, %612 : vector<8x32xf32>
    %614 = arith.mulf %605, %557 : vector<8x32xf32>
    %615 = arith.mulf %599, %607 : vector<8x32xf32>
    %616 = arith.addf %614, %615 : vector<8x32xf32>
    %617 = math.tanh %616 : vector<8x32xf32>
    %618 = arith.mulf %613, %617 : vector<8x32xf32>
    %619 = tpu.concatenate %593, %618 in 0 : vector<8x32xf32>, vector<8x32xf32> -> vector<16x32xf32>
    %620 = arith.truncf %619 : vector<16x32xf32> to vector<16x32xbf16>
    %cst_94 = arith.constant dense<0.000000e+00> : vector<16x256xf32>
    %621 = tpu.matmul %620, %496, %cst_94 {dimension_numbers = #tpu.dot_dimension_numbers<[1], [0], [0], [1], [0, 0, 1, 1], [], []>} : vector<16x32xbf16>, vector<32x256xbf16>, vector<16x256xf32> -> vector<16x256xf32>
    %622 = vector.extract_strided_slice %495 {offsets = [16, 0], sizes = [8, 128], strides = [1, 1]} : vector<64x256xf32> to vector<8x128xf32>
    %623 = vector.extract_strided_slice %621 {offsets = [0, 0], sizes = [8, 128], strides = [1, 1]} : vector<16x256xf32> to vector<8x128xf32>
    %624 = arith.addf %622, %623 : vector<8x128xf32>
    %625 = vector.extract_strided_slice %495 {offsets = [40, 128], sizes = [8, 128], strides = [1, 1]} : vector<64x256xf32> to vector<8x128xf32>
    %626 = vector.extract_strided_slice %621 {offsets = [8, 128], sizes = [8, 128], strides = [1, 1]} : vector<16x256xf32> to vector<8x128xf32>
    %627 = arith.addf %625, %626 : vector<8x128xf32>
    %628 = vector.extract_strided_slice %624 {offsets = [0, 0], sizes = [8, 32], strides = [1, 1]} : vector<8x128xf32> to vector<8x32xf32>
    %629 = arith.negf %628 : vector<8x32xf32>
    %630 = math.exp %629 : vector<8x32xf32>
    %cst_95 = arith.constant 1.000000e+00 : f32
    %631 = vector.broadcast %cst_95 : f32 to vector<8x32xf32>
    %632 = arith.addf %631, %630 : vector<8x32xf32>
    %633 = arith.divf %631, %632 : vector<8x32xf32>
    %634 = vector.extract_strided_slice %624 {offsets = [0, 32], sizes = [8, 32], strides = [1, 1]} : vector<8x128xf32> to vector<8x32xf32>
    %635 = arith.negf %634 : vector<8x32xf32>
    %636 = math.exp %635 : vector<8x32xf32>
    %cst_96 = arith.constant 1.000000e+00 : f32
    %637 = vector.broadcast %cst_96 : f32 to vector<8x32xf32>
    %638 = arith.addf %637, %636 : vector<8x32xf32>
    %639 = arith.divf %637, %638 : vector<8x32xf32>
    %640 = vector.extract_strided_slice %624 {offsets = [0, 64], sizes = [8, 32], strides = [1, 1]} : vector<8x128xf32> to vector<8x32xf32>
    %641 = math.tanh %640 : vector<8x32xf32>
    %642 = vector.extract_strided_slice %624 {offsets = [0, 96], sizes = [8, 32], strides = [1, 1]} : vector<8x128xf32> to vector<8x32xf32>
    %643 = arith.negf %642 : vector<8x32xf32>
    %644 = math.exp %643 : vector<8x32xf32>
    %cst_97 = arith.constant 1.000000e+00 : f32
    %645 = vector.broadcast %cst_97 : f32 to vector<8x32xf32>
    %646 = arith.addf %645, %644 : vector<8x32xf32>
    %647 = arith.divf %645, %646 : vector<8x32xf32>
    %648 = arith.mulf %639, %591 : vector<8x32xf32>
    %649 = arith.mulf %633, %641 : vector<8x32xf32>
    %650 = arith.addf %648, %649 : vector<8x32xf32>
    %651 = math.tanh %650 : vector<8x32xf32>
    %652 = arith.mulf %647, %651 : vector<8x32xf32>
    %653 = vector.extract_strided_slice %627 {offsets = [0, 0], sizes = [8, 32], strides = [1, 1]} : vector<8x128xf32> to vector<8x32xf32>
    %654 = arith.negf %653 : vector<8x32xf32>
    %655 = math.exp %654 : vector<8x32xf32>
    %cst_98 = arith.constant 1.000000e+00 : f32
    %656 = vector.broadcast %cst_98 : f32 to vector<8x32xf32>
    %657 = arith.addf %656, %655 : vector<8x32xf32>
    %658 = arith.divf %656, %657 : vector<8x32xf32>
    %659 = vector.extract_strided_slice %627 {offsets = [0, 32], sizes = [8, 32], strides = [1, 1]} : vector<8x128xf32> to vector<8x32xf32>
    %660 = arith.negf %659 : vector<8x32xf32>
    %661 = math.exp %660 : vector<8x32xf32>
    %cst_99 = arith.constant 1.000000e+00 : f32
    %662 = vector.broadcast %cst_99 : f32 to vector<8x32xf32>
    %663 = arith.addf %662, %661 : vector<8x32xf32>
    %664 = arith.divf %662, %663 : vector<8x32xf32>
    %665 = vector.extract_strided_slice %627 {offsets = [0, 64], sizes = [8, 32], strides = [1, 1]} : vector<8x128xf32> to vector<8x32xf32>
    %666 = math.tanh %665 : vector<8x32xf32>
    %667 = vector.extract_strided_slice %627 {offsets = [0, 96], sizes = [8, 32], strides = [1, 1]} : vector<8x128xf32> to vector<8x32xf32>
    %668 = arith.negf %667 : vector<8x32xf32>
    %669 = math.exp %668 : vector<8x32xf32>
    %cst_100 = arith.constant 1.000000e+00 : f32
    %670 = vector.broadcast %cst_100 : f32 to vector<8x32xf32>
    %671 = arith.addf %670, %669 : vector<8x32xf32>
    %672 = arith.divf %670, %671 : vector<8x32xf32>
    %673 = arith.mulf %664, %616 : vector<8x32xf32>
    %674 = arith.mulf %658, %666 : vector<8x32xf32>
    %675 = arith.addf %673, %674 : vector<8x32xf32>
    %676 = math.tanh %675 : vector<8x32xf32>
    %677 = arith.mulf %672, %676 : vector<8x32xf32>
    %678 = tpu.concatenate %652, %677 in 0 : vector<8x32xf32>, vector<8x32xf32> -> vector<16x32xf32>
    %679 = arith.truncf %678 : vector<16x32xf32> to vector<16x32xbf16>
    %cst_101 = arith.constant dense<0.000000e+00> : vector<16x256xf32>
    %680 = tpu.matmul %679, %496, %cst_101 {dimension_numbers = #tpu.dot_dimension_numbers<[1], [0], [0], [1], [0, 0, 1, 1], [], []>} : vector<16x32xbf16>, vector<32x256xbf16>, vector<16x256xf32> -> vector<16x256xf32>
    %681 = vector.extract_strided_slice %495 {offsets = [24, 0], sizes = [8, 128], strides = [1, 1]} : vector<64x256xf32> to vector<8x128xf32>
    %682 = vector.extract_strided_slice %680 {offsets = [0, 0], sizes = [8, 128], strides = [1, 1]} : vector<16x256xf32> to vector<8x128xf32>
    %683 = arith.addf %681, %682 : vector<8x128xf32>
    %684 = vector.extract_strided_slice %495 {offsets = [32, 128], sizes = [8, 128], strides = [1, 1]} : vector<64x256xf32> to vector<8x128xf32>
    %685 = vector.extract_strided_slice %680 {offsets = [8, 128], sizes = [8, 128], strides = [1, 1]} : vector<16x256xf32> to vector<8x128xf32>
    %686 = arith.addf %684, %685 : vector<8x128xf32>
    %687 = vector.extract_strided_slice %683 {offsets = [0, 0], sizes = [8, 32], strides = [1, 1]} : vector<8x128xf32> to vector<8x32xf32>
    %688 = arith.negf %687 : vector<8x32xf32>
    %689 = math.exp %688 : vector<8x32xf32>
    %cst_102 = arith.constant 1.000000e+00 : f32
    %690 = vector.broadcast %cst_102 : f32 to vector<8x32xf32>
    %691 = arith.addf %690, %689 : vector<8x32xf32>
    %692 = arith.divf %690, %691 : vector<8x32xf32>
    %693 = vector.extract_strided_slice %683 {offsets = [0, 32], sizes = [8, 32], strides = [1, 1]} : vector<8x128xf32> to vector<8x32xf32>
    %694 = arith.negf %693 : vector<8x32xf32>
    %695 = math.exp %694 : vector<8x32xf32>
    %cst_103 = arith.constant 1.000000e+00 : f32
    %696 = vector.broadcast %cst_103 : f32 to vector<8x32xf32>
    %697 = arith.addf %696, %695 : vector<8x32xf32>
    %698 = arith.divf %696, %697 : vector<8x32xf32>
    %699 = vector.extract_strided_slice %683 {offsets = [0, 64], sizes = [8, 32], strides = [1, 1]} : vector<8x128xf32> to vector<8x32xf32>
    %700 = math.tanh %699 : vector<8x32xf32>
    %701 = vector.extract_strided_slice %683 {offsets = [0, 96], sizes = [8, 32], strides = [1, 1]} : vector<8x128xf32> to vector<8x32xf32>
    %702 = arith.negf %701 : vector<8x32xf32>
    %703 = math.exp %702 : vector<8x32xf32>
    %cst_104 = arith.constant 1.000000e+00 : f32
    %704 = vector.broadcast %cst_104 : f32 to vector<8x32xf32>
    %705 = arith.addf %704, %703 : vector<8x32xf32>
    %706 = arith.divf %704, %705 : vector<8x32xf32>
    %707 = arith.mulf %698, %650 : vector<8x32xf32>
    %708 = arith.mulf %692, %700 : vector<8x32xf32>
    %709 = arith.addf %707, %708 : vector<8x32xf32>
    %710 = math.tanh %709 : vector<8x32xf32>
    %711 = arith.mulf %706, %710 : vector<8x32xf32>
    %712 = vector.extract_strided_slice %686 {offsets = [0, 0], sizes = [8, 32], strides = [1, 1]} : vector<8x128xf32> to vector<8x32xf32>
    %713 = arith.negf %712 : vector<8x32xf32>
    %714 = math.exp %713 : vector<8x32xf32>
    %cst_105 = arith.constant 1.000000e+00 : f32
    %715 = vector.broadcast %cst_105 : f32 to vector<8x32xf32>
    %716 = arith.addf %715, %714 : vector<8x32xf32>
    %717 = arith.divf %715, %716 : vector<8x32xf32>
    %718 = vector.extract_strided_slice %686 {offsets = [0, 32], sizes = [8, 32], strides = [1, 1]} : vector<8x128xf32> to vector<8x32xf32>
    %719 = arith.negf %718 : vector<8x32xf32>
    %720 = math.exp %719 : vector<8x32xf32>
    %cst_106 = arith.constant 1.000000e+00 : f32
    %721 = vector.broadcast %cst_106 : f32 to vector<8x32xf32>
    %722 = arith.addf %721, %720 : vector<8x32xf32>
    %723 = arith.divf %721, %722 : vector<8x32xf32>
    %724 = vector.extract_strided_slice %686 {offsets = [0, 64], sizes = [8, 32], strides = [1, 1]} : vector<8x128xf32> to vector<8x32xf32>
    %725 = math.tanh %724 : vector<8x32xf32>
    %726 = vector.extract_strided_slice %686 {offsets = [0, 96], sizes = [8, 32], strides = [1, 1]} : vector<8x128xf32> to vector<8x32xf32>
    %727 = arith.negf %726 : vector<8x32xf32>
    %728 = math.exp %727 : vector<8x32xf32>
    %cst_107 = arith.constant 1.000000e+00 : f32
    %729 = vector.broadcast %cst_107 : f32 to vector<8x32xf32>
    %730 = arith.addf %729, %728 : vector<8x32xf32>
    %731 = arith.divf %729, %730 : vector<8x32xf32>
    %732 = arith.mulf %723, %675 : vector<8x32xf32>
    %733 = arith.mulf %717, %725 : vector<8x32xf32>
    %734 = arith.addf %732, %733 : vector<8x32xf32>
    %735 = math.tanh %734 : vector<8x32xf32>
    %736 = arith.mulf %731, %735 : vector<8x32xf32>
    %737 = tpu.concatenate %711, %736 in 0 : vector<8x32xf32>, vector<8x32xf32> -> vector<16x32xf32>
    %738 = arith.truncf %737 : vector<16x32xf32> to vector<16x32xbf16>
    %cst_108 = arith.constant dense<0.000000e+00> : vector<16x256xf32>
    %739 = tpu.matmul %738, %496, %cst_108 {dimension_numbers = #tpu.dot_dimension_numbers<[1], [0], [0], [1], [0, 0, 1, 1], [], []>} : vector<16x32xbf16>, vector<32x256xbf16>, vector<16x256xf32> -> vector<16x256xf32>
    %740 = vector.extract_strided_slice %495 {offsets = [32, 0], sizes = [8, 128], strides = [1, 1]} : vector<64x256xf32> to vector<8x128xf32>
    %741 = vector.extract_strided_slice %739 {offsets = [0, 0], sizes = [8, 128], strides = [1, 1]} : vector<16x256xf32> to vector<8x128xf32>
    %742 = arith.addf %740, %741 : vector<8x128xf32>
    %743 = vector.extract_strided_slice %495 {offsets = [24, 128], sizes = [8, 128], strides = [1, 1]} : vector<64x256xf32> to vector<8x128xf32>
    %744 = vector.extract_strided_slice %739 {offsets = [8, 128], sizes = [8, 128], strides = [1, 1]} : vector<16x256xf32> to vector<8x128xf32>
    %745 = arith.addf %743, %744 : vector<8x128xf32>
    %746 = vector.extract_strided_slice %742 {offsets = [0, 0], sizes = [8, 32], strides = [1, 1]} : vector<8x128xf32> to vector<8x32xf32>
    %747 = arith.negf %746 : vector<8x32xf32>
    %748 = math.exp %747 : vector<8x32xf32>
    %cst_109 = arith.constant 1.000000e+00 : f32
    %749 = vector.broadcast %cst_109 : f32 to vector<8x32xf32>
    %750 = arith.addf %749, %748 : vector<8x32xf32>
    %751 = arith.divf %749, %750 : vector<8x32xf32>
    %752 = vector.extract_strided_slice %742 {offsets = [0, 32], sizes = [8, 32], strides = [1, 1]} : vector<8x128xf32> to vector<8x32xf32>
    %753 = arith.negf %752 : vector<8x32xf32>
    %754 = math.exp %753 : vector<8x32xf32>
    %cst_110 = arith.constant 1.000000e+00 : f32
    %755 = vector.broadcast %cst_110 : f32 to vector<8x32xf32>
    %756 = arith.addf %755, %754 : vector<8x32xf32>
    %757 = arith.divf %755, %756 : vector<8x32xf32>
    %758 = vector.extract_strided_slice %742 {offsets = [0, 64], sizes = [8, 32], strides = [1, 1]} : vector<8x128xf32> to vector<8x32xf32>
    %759 = math.tanh %758 : vector<8x32xf32>
    %760 = vector.extract_strided_slice %742 {offsets = [0, 96], sizes = [8, 32], strides = [1, 1]} : vector<8x128xf32> to vector<8x32xf32>
    %761 = arith.negf %760 : vector<8x32xf32>
    %762 = math.exp %761 : vector<8x32xf32>
    %cst_111 = arith.constant 1.000000e+00 : f32
    %763 = vector.broadcast %cst_111 : f32 to vector<8x32xf32>
    %764 = arith.addf %763, %762 : vector<8x32xf32>
    %765 = arith.divf %763, %764 : vector<8x32xf32>
    %766 = arith.mulf %757, %709 : vector<8x32xf32>
    %767 = arith.mulf %751, %759 : vector<8x32xf32>
    %768 = arith.addf %766, %767 : vector<8x32xf32>
    %769 = math.tanh %768 : vector<8x32xf32>
    %770 = arith.mulf %765, %769 : vector<8x32xf32>
    %771 = vector.extract_strided_slice %745 {offsets = [0, 0], sizes = [8, 32], strides = [1, 1]} : vector<8x128xf32> to vector<8x32xf32>
    %772 = arith.negf %771 : vector<8x32xf32>
    %773 = math.exp %772 : vector<8x32xf32>
    %cst_112 = arith.constant 1.000000e+00 : f32
    %774 = vector.broadcast %cst_112 : f32 to vector<8x32xf32>
    %775 = arith.addf %774, %773 : vector<8x32xf32>
    %776 = arith.divf %774, %775 : vector<8x32xf32>
    %777 = vector.extract_strided_slice %745 {offsets = [0, 32], sizes = [8, 32], strides = [1, 1]} : vector<8x128xf32> to vector<8x32xf32>
    %778 = arith.negf %777 : vector<8x32xf32>
    %779 = math.exp %778 : vector<8x32xf32>
    %cst_113 = arith.constant 1.000000e+00 : f32
    %780 = vector.broadcast %cst_113 : f32 to vector<8x32xf32>
    %781 = arith.addf %780, %779 : vector<8x32xf32>
    %782 = arith.divf %780, %781 : vector<8x32xf32>
    %783 = vector.extract_strided_slice %745 {offsets = [0, 64], sizes = [8, 32], strides = [1, 1]} : vector<8x128xf32> to vector<8x32xf32>
    %784 = math.tanh %783 : vector<8x32xf32>
    %785 = vector.extract_strided_slice %745 {offsets = [0, 96], sizes = [8, 32], strides = [1, 1]} : vector<8x128xf32> to vector<8x32xf32>
    %786 = arith.negf %785 : vector<8x32xf32>
    %787 = math.exp %786 : vector<8x32xf32>
    %cst_114 = arith.constant 1.000000e+00 : f32
    %788 = vector.broadcast %cst_114 : f32 to vector<8x32xf32>
    %789 = arith.addf %788, %787 : vector<8x32xf32>
    %790 = arith.divf %788, %789 : vector<8x32xf32>
    %791 = arith.mulf %782, %734 : vector<8x32xf32>
    %792 = arith.mulf %776, %784 : vector<8x32xf32>
    %793 = arith.addf %791, %792 : vector<8x32xf32>
    %794 = math.tanh %793 : vector<8x32xf32>
    %795 = arith.mulf %790, %794 : vector<8x32xf32>
    %796 = tpu.concatenate %770, %795 in 0 : vector<8x32xf32>, vector<8x32xf32> -> vector<16x32xf32>
    %797 = arith.truncf %796 : vector<16x32xf32> to vector<16x32xbf16>
    %cst_115 = arith.constant dense<0.000000e+00> : vector<16x256xf32>
    %798 = tpu.matmul %797, %496, %cst_115 {dimension_numbers = #tpu.dot_dimension_numbers<[1], [0], [0], [1], [0, 0, 1, 1], [], []>} : vector<16x32xbf16>, vector<32x256xbf16>, vector<16x256xf32> -> vector<16x256xf32>
    %799 = vector.extract_strided_slice %495 {offsets = [40, 0], sizes = [8, 128], strides = [1, 1]} : vector<64x256xf32> to vector<8x128xf32>
    %800 = vector.extract_strided_slice %798 {offsets = [0, 0], sizes = [8, 128], strides = [1, 1]} : vector<16x256xf32> to vector<8x128xf32>
    %801 = arith.addf %799, %800 : vector<8x128xf32>
    %802 = vector.extract_strided_slice %495 {offsets = [16, 128], sizes = [8, 128], strides = [1, 1]} : vector<64x256xf32> to vector<8x128xf32>
    %803 = vector.extract_strided_slice %798 {offsets = [8, 128], sizes = [8, 128], strides = [1, 1]} : vector<16x256xf32> to vector<8x128xf32>
    %804 = arith.addf %802, %803 : vector<8x128xf32>
    %805 = vector.extract_strided_slice %801 {offsets = [0, 0], sizes = [8, 32], strides = [1, 1]} : vector<8x128xf32> to vector<8x32xf32>
    %806 = arith.negf %805 : vector<8x32xf32>
    %807 = math.exp %806 : vector<8x32xf32>
    %cst_116 = arith.constant 1.000000e+00 : f32
    %808 = vector.broadcast %cst_116 : f32 to vector<8x32xf32>
    %809 = arith.addf %808, %807 : vector<8x32xf32>
    %810 = arith.divf %808, %809 : vector<8x32xf32>
    %811 = vector.extract_strided_slice %801 {offsets = [0, 32], sizes = [8, 32], strides = [1, 1]} : vector<8x128xf32> to vector<8x32xf32>
    %812 = arith.negf %811 : vector<8x32xf32>
    %813 = math.exp %812 : vector<8x32xf32>
    %cst_117 = arith.constant 1.000000e+00 : f32
    %814 = vector.broadcast %cst_117 : f32 to vector<8x32xf32>
    %815 = arith.addf %814, %813 : vector<8x32xf32>
    %816 = arith.divf %814, %815 : vector<8x32xf32>
    %817 = vector.extract_strided_slice %801 {offsets = [0, 64], sizes = [8, 32], strides = [1, 1]} : vector<8x128xf32> to vector<8x32xf32>
    %818 = math.tanh %817 : vector<8x32xf32>
    %819 = vector.extract_strided_slice %801 {offsets = [0, 96], sizes = [8, 32], strides = [1, 1]} : vector<8x128xf32> to vector<8x32xf32>
    %820 = arith.negf %819 : vector<8x32xf32>
    %821 = math.exp %820 : vector<8x32xf32>
    %cst_118 = arith.constant 1.000000e+00 : f32
    %822 = vector.broadcast %cst_118 : f32 to vector<8x32xf32>
    %823 = arith.addf %822, %821 : vector<8x32xf32>
    %824 = arith.divf %822, %823 : vector<8x32xf32>
    %825 = arith.mulf %816, %768 : vector<8x32xf32>
    %826 = arith.mulf %810, %818 : vector<8x32xf32>
    %827 = arith.addf %825, %826 : vector<8x32xf32>
    %828 = math.tanh %827 : vector<8x32xf32>
    %829 = arith.mulf %824, %828 : vector<8x32xf32>
    %830 = vector.extract_strided_slice %804 {offsets = [0, 0], sizes = [8, 32], strides = [1, 1]} : vector<8x128xf32> to vector<8x32xf32>
    %831 = arith.negf %830 : vector<8x32xf32>
    %832 = math.exp %831 : vector<8x32xf32>
    %cst_119 = arith.constant 1.000000e+00 : f32
    %833 = vector.broadcast %cst_119 : f32 to vector<8x32xf32>
    %834 = arith.addf %833, %832 : vector<8x32xf32>
    %835 = arith.divf %833, %834 : vector<8x32xf32>
    %836 = vector.extract_strided_slice %804 {offsets = [0, 32], sizes = [8, 32], strides = [1, 1]} : vector<8x128xf32> to vector<8x32xf32>
    %837 = arith.negf %836 : vector<8x32xf32>
    %838 = math.exp %837 : vector<8x32xf32>
    %cst_120 = arith.constant 1.000000e+00 : f32
    %839 = vector.broadcast %cst_120 : f32 to vector<8x32xf32>
    %840 = arith.addf %839, %838 : vector<8x32xf32>
    %841 = arith.divf %839, %840 : vector<8x32xf32>
    %842 = vector.extract_strided_slice %804 {offsets = [0, 64], sizes = [8, 32], strides = [1, 1]} : vector<8x128xf32> to vector<8x32xf32>
    %843 = math.tanh %842 : vector<8x32xf32>
    %844 = vector.extract_strided_slice %804 {offsets = [0, 96], sizes = [8, 32], strides = [1, 1]} : vector<8x128xf32> to vector<8x32xf32>
    %845 = arith.negf %844 : vector<8x32xf32>
    %846 = math.exp %845 : vector<8x32xf32>
    %cst_121 = arith.constant 1.000000e+00 : f32
    %847 = vector.broadcast %cst_121 : f32 to vector<8x32xf32>
    %848 = arith.addf %847, %846 : vector<8x32xf32>
    %849 = arith.divf %847, %848 : vector<8x32xf32>
    %850 = arith.mulf %841, %793 : vector<8x32xf32>
    %851 = arith.mulf %835, %843 : vector<8x32xf32>
    %852 = arith.addf %850, %851 : vector<8x32xf32>
    %853 = math.tanh %852 : vector<8x32xf32>
    %854 = arith.mulf %849, %853 : vector<8x32xf32>
    %855 = tpu.concatenate %829, %854 in 0 : vector<8x32xf32>, vector<8x32xf32> -> vector<16x32xf32>
    %856 = arith.truncf %855 : vector<16x32xf32> to vector<16x32xbf16>
    %cst_122 = arith.constant dense<0.000000e+00> : vector<16x256xf32>
    %857 = tpu.matmul %856, %496, %cst_122 {dimension_numbers = #tpu.dot_dimension_numbers<[1], [0], [0], [1], [0, 0, 1, 1], [], []>} : vector<16x32xbf16>, vector<32x256xbf16>, vector<16x256xf32> -> vector<16x256xf32>
    %858 = vector.extract_strided_slice %495 {offsets = [48, 0], sizes = [8, 128], strides = [1, 1]} : vector<64x256xf32> to vector<8x128xf32>
    %859 = vector.extract_strided_slice %857 {offsets = [0, 0], sizes = [8, 128], strides = [1, 1]} : vector<16x256xf32> to vector<8x128xf32>
    %860 = arith.addf %858, %859 : vector<8x128xf32>
    %861 = vector.extract_strided_slice %495 {offsets = [8, 128], sizes = [8, 128], strides = [1, 1]} : vector<64x256xf32> to vector<8x128xf32>
    %862 = vector.extract_strided_slice %857 {offsets = [8, 128], sizes = [8, 128], strides = [1, 1]} : vector<16x256xf32> to vector<8x128xf32>
    %863 = arith.addf %861, %862 : vector<8x128xf32>
    %864 = vector.extract_strided_slice %860 {offsets = [0, 0], sizes = [8, 32], strides = [1, 1]} : vector<8x128xf32> to vector<8x32xf32>
    %865 = arith.negf %864 : vector<8x32xf32>
    %866 = math.exp %865 : vector<8x32xf32>
    %cst_123 = arith.constant 1.000000e+00 : f32
    %867 = vector.broadcast %cst_123 : f32 to vector<8x32xf32>
    %868 = arith.addf %867, %866 : vector<8x32xf32>
    %869 = arith.divf %867, %868 : vector<8x32xf32>
    %870 = vector.extract_strided_slice %860 {offsets = [0, 32], sizes = [8, 32], strides = [1, 1]} : vector<8x128xf32> to vector<8x32xf32>
    %871 = arith.negf %870 : vector<8x32xf32>
    %872 = math.exp %871 : vector<8x32xf32>
    %cst_124 = arith.constant 1.000000e+00 : f32
    %873 = vector.broadcast %cst_124 : f32 to vector<8x32xf32>
    %874 = arith.addf %873, %872 : vector<8x32xf32>
    %875 = arith.divf %873, %874 : vector<8x32xf32>
    %876 = vector.extract_strided_slice %860 {offsets = [0, 64], sizes = [8, 32], strides = [1, 1]} : vector<8x128xf32> to vector<8x32xf32>
    %877 = math.tanh %876 : vector<8x32xf32>
    %878 = vector.extract_strided_slice %860 {offsets = [0, 96], sizes = [8, 32], strides = [1, 1]} : vector<8x128xf32> to vector<8x32xf32>
    %879 = arith.negf %878 : vector<8x32xf32>
    %880 = math.exp %879 : vector<8x32xf32>
    %cst_125 = arith.constant 1.000000e+00 : f32
    %881 = vector.broadcast %cst_125 : f32 to vector<8x32xf32>
    %882 = arith.addf %881, %880 : vector<8x32xf32>
    %883 = arith.divf %881, %882 : vector<8x32xf32>
    %884 = arith.mulf %875, %827 : vector<8x32xf32>
    %885 = arith.mulf %869, %877 : vector<8x32xf32>
    %886 = arith.addf %884, %885 : vector<8x32xf32>
    %887 = math.tanh %886 : vector<8x32xf32>
    %888 = arith.mulf %883, %887 : vector<8x32xf32>
    %889 = vector.extract_strided_slice %863 {offsets = [0, 0], sizes = [8, 32], strides = [1, 1]} : vector<8x128xf32> to vector<8x32xf32>
    %890 = arith.negf %889 : vector<8x32xf32>
    %891 = math.exp %890 : vector<8x32xf32>
    %cst_126 = arith.constant 1.000000e+00 : f32
    %892 = vector.broadcast %cst_126 : f32 to vector<8x32xf32>
    %893 = arith.addf %892, %891 : vector<8x32xf32>
    %894 = arith.divf %892, %893 : vector<8x32xf32>
    %895 = vector.extract_strided_slice %863 {offsets = [0, 32], sizes = [8, 32], strides = [1, 1]} : vector<8x128xf32> to vector<8x32xf32>
    %896 = arith.negf %895 : vector<8x32xf32>
    %897 = math.exp %896 : vector<8x32xf32>
    %cst_127 = arith.constant 1.000000e+00 : f32
    %898 = vector.broadcast %cst_127 : f32 to vector<8x32xf32>
    %899 = arith.addf %898, %897 : vector<8x32xf32>
    %900 = arith.divf %898, %899 : vector<8x32xf32>
    %901 = vector.extract_strided_slice %863 {offsets = [0, 64], sizes = [8, 32], strides = [1, 1]} : vector<8x128xf32> to vector<8x32xf32>
    %902 = math.tanh %901 : vector<8x32xf32>
    %903 = vector.extract_strided_slice %863 {offsets = [0, 96], sizes = [8, 32], strides = [1, 1]} : vector<8x128xf32> to vector<8x32xf32>
    %904 = arith.negf %903 : vector<8x32xf32>
    %905 = math.exp %904 : vector<8x32xf32>
    %cst_128 = arith.constant 1.000000e+00 : f32
    %906 = vector.broadcast %cst_128 : f32 to vector<8x32xf32>
    %907 = arith.addf %906, %905 : vector<8x32xf32>
    %908 = arith.divf %906, %907 : vector<8x32xf32>
    %909 = arith.mulf %900, %852 : vector<8x32xf32>
    %910 = arith.mulf %894, %902 : vector<8x32xf32>
    %911 = arith.addf %909, %910 : vector<8x32xf32>
    %912 = math.tanh %911 : vector<8x32xf32>
    %913 = arith.mulf %908, %912 : vector<8x32xf32>
    %914 = tpu.concatenate %888, %913 in 0 : vector<8x32xf32>, vector<8x32xf32> -> vector<16x32xf32>
    %915 = arith.truncf %914 : vector<16x32xf32> to vector<16x32xbf16>
    %cst_129 = arith.constant dense<0.000000e+00> : vector<16x256xf32>
    %916 = tpu.matmul %915, %496, %cst_129 {dimension_numbers = #tpu.dot_dimension_numbers<[1], [0], [0], [1], [0, 0, 1, 1], [], []>} : vector<16x32xbf16>, vector<32x256xbf16>, vector<16x256xf32> -> vector<16x256xf32>
    %917 = vector.extract_strided_slice %495 {offsets = [56, 0], sizes = [8, 128], strides = [1, 1]} : vector<64x256xf32> to vector<8x128xf32>
    %918 = vector.extract_strided_slice %916 {offsets = [0, 0], sizes = [8, 128], strides = [1, 1]} : vector<16x256xf32> to vector<8x128xf32>
    %919 = arith.addf %917, %918 : vector<8x128xf32>
    %920 = vector.extract_strided_slice %495 {offsets = [0, 128], sizes = [8, 128], strides = [1, 1]} : vector<64x256xf32> to vector<8x128xf32>
    %921 = vector.extract_strided_slice %916 {offsets = [8, 128], sizes = [8, 128], strides = [1, 1]} : vector<16x256xf32> to vector<8x128xf32>
    %922 = arith.addf %920, %921 : vector<8x128xf32>
    %923 = vector.extract_strided_slice %919 {offsets = [0, 0], sizes = [8, 32], strides = [1, 1]} : vector<8x128xf32> to vector<8x32xf32>
    %924 = arith.negf %923 : vector<8x32xf32>
    %925 = math.exp %924 : vector<8x32xf32>
    %cst_130 = arith.constant 1.000000e+00 : f32
    %926 = vector.broadcast %cst_130 : f32 to vector<8x32xf32>
    %927 = arith.addf %926, %925 : vector<8x32xf32>
    %928 = arith.divf %926, %927 : vector<8x32xf32>
    %929 = vector.extract_strided_slice %919 {offsets = [0, 32], sizes = [8, 32], strides = [1, 1]} : vector<8x128xf32> to vector<8x32xf32>
    %930 = arith.negf %929 : vector<8x32xf32>
    %931 = math.exp %930 : vector<8x32xf32>
    %cst_131 = arith.constant 1.000000e+00 : f32
    %932 = vector.broadcast %cst_131 : f32 to vector<8x32xf32>
    %933 = arith.addf %932, %931 : vector<8x32xf32>
    %934 = arith.divf %932, %933 : vector<8x32xf32>
    %935 = vector.extract_strided_slice %919 {offsets = [0, 64], sizes = [8, 32], strides = [1, 1]} : vector<8x128xf32> to vector<8x32xf32>
    %936 = math.tanh %935 : vector<8x32xf32>
    %937 = vector.extract_strided_slice %919 {offsets = [0, 96], sizes = [8, 32], strides = [1, 1]} : vector<8x128xf32> to vector<8x32xf32>
    %938 = arith.negf %937 : vector<8x32xf32>
    %939 = math.exp %938 : vector<8x32xf32>
    %cst_132 = arith.constant 1.000000e+00 : f32
    %940 = vector.broadcast %cst_132 : f32 to vector<8x32xf32>
    %941 = arith.addf %940, %939 : vector<8x32xf32>
    %942 = arith.divf %940, %941 : vector<8x32xf32>
    %943 = arith.mulf %934, %886 : vector<8x32xf32>
    %944 = arith.mulf %928, %936 : vector<8x32xf32>
    %945 = arith.addf %943, %944 : vector<8x32xf32>
    %946 = math.tanh %945 : vector<8x32xf32>
    %947 = arith.mulf %942, %946 : vector<8x32xf32>
    %948 = vector.extract_strided_slice %922 {offsets = [0, 0], sizes = [8, 32], strides = [1, 1]} : vector<8x128xf32> to vector<8x32xf32>
    %949 = arith.negf %948 : vector<8x32xf32>
    %950 = math.exp %949 : vector<8x32xf32>
    %cst_133 = arith.constant 1.000000e+00 : f32
    %951 = vector.broadcast %cst_133 : f32 to vector<8x32xf32>
    %952 = arith.addf %951, %950 : vector<8x32xf32>
    %953 = arith.divf %951, %952 : vector<8x32xf32>
    %954 = vector.extract_strided_slice %922 {offsets = [0, 32], sizes = [8, 32], strides = [1, 1]} : vector<8x128xf32> to vector<8x32xf32>
    %955 = arith.negf %954 : vector<8x32xf32>
    %956 = math.exp %955 : vector<8x32xf32>
    %cst_134 = arith.constant 1.000000e+00 : f32
    %957 = vector.broadcast %cst_134 : f32 to vector<8x32xf32>
    %958 = arith.addf %957, %956 : vector<8x32xf32>
    %959 = arith.divf %957, %958 : vector<8x32xf32>
    %960 = vector.extract_strided_slice %922 {offsets = [0, 64], sizes = [8, 32], strides = [1, 1]} : vector<8x128xf32> to vector<8x32xf32>
    %961 = math.tanh %960 : vector<8x32xf32>
    %962 = vector.extract_strided_slice %922 {offsets = [0, 96], sizes = [8, 32], strides = [1, 1]} : vector<8x128xf32> to vector<8x32xf32>
    %963 = arith.negf %962 : vector<8x32xf32>
    %964 = math.exp %963 : vector<8x32xf32>
    %cst_135 = arith.constant 1.000000e+00 : f32
    %965 = vector.broadcast %cst_135 : f32 to vector<8x32xf32>
    %966 = arith.addf %965, %964 : vector<8x32xf32>
    %967 = arith.divf %965, %966 : vector<8x32xf32>
    %968 = arith.mulf %959, %911 : vector<8x32xf32>
    %969 = arith.mulf %953, %961 : vector<8x32xf32>
    %970 = arith.addf %968, %969 : vector<8x32xf32>
    %971 = math.tanh %970 : vector<8x32xf32>
    %972 = arith.mulf %967, %971 : vector<8x32xf32>
    %973 = tpu.concatenate %534, %593, %652, %711, %770, %829, %888, %947 in 0 : vector<8x32xf32>, vector<8x32xf32>, vector<8x32xf32>, vector<8x32xf32>, vector<8x32xf32>, vector<8x32xf32>, vector<8x32xf32>, vector<8x32xf32> -> vector<64x32xf32>
    %974 = tpu.concatenate %972, %913, %854, %795, %736, %677, %618, %559 in 0 : vector<8x32xf32>, vector<8x32xf32>, vector<8x32xf32>, vector<8x32xf32>, vector<8x32xf32>, vector<8x32xf32>, vector<8x32xf32>, vector<8x32xf32> -> vector<64x32xf32>
    %c0_136 = arith.constant 0 : index
    %c0_137 = arith.constant 0 : index
    %975 = vector.load %arg7[%c0_136, %c0_137] : memref<64x8xf32, #tpu.memory_space<vmem>>, vector<64x8xf32>
    %976 = vector.extract_strided_slice %975 {offsets = [0, 0], sizes = [32, 8], strides = [1, 1]} : vector<64x8xf32> to vector<32x8xf32>
    %cst_138 = arith.constant dense<0.000000e+00> : vector<64x8xf32>
    %977 = tpu.matmul %973, %976, %cst_138 {dimension_numbers = #tpu.dot_dimension_numbers<[1], [0], [0], [1], [0, 0, 1, 1], [], []>} : vector<64x32xf32>, vector<32x8xf32>, vector<64x8xf32> -> vector<64x8xf32>
    %978 = vector.extract_strided_slice %975 {offsets = [32, 0], sizes = [32, 8], strides = [1, 1]} : vector<64x8xf32> to vector<32x8xf32>
    %cst_139 = arith.constant dense<0.000000e+00> : vector<64x8xf32>
    %979 = tpu.matmul %974, %978, %cst_139 {dimension_numbers = #tpu.dot_dimension_numbers<[1], [0], [0], [1], [0, 0, 1, 1], [], []>} : vector<64x32xf32>, vector<32x8xf32>, vector<64x8xf32> -> vector<64x8xf32>
    %980 = arith.addf %977, %979 : vector<64x8xf32>
    %c0_140 = arith.constant 0 : index
    %c0_141 = arith.constant 0 : index
    %981 = vector.load %arg8[%c0_140, %c0_141] : memref<1x8xf32, #tpu.memory_space<vmem>>, vector<1x8xf32>
    %982 = vector.broadcast %981 : vector<1x8xf32> to vector<64x8xf32>
    %983 = arith.addf %980, %982 : vector<64x8xf32>
    %c0_142 = arith.constant 0 : index
    %c0_143 = arith.constant 0 : index
    %984 = vector.load %arg9[%c0_142, %c0_143] : memref<64x2xf32, #tpu.memory_space<vmem>>, vector<64x2xf32>
    %985 = vector.extract_strided_slice %984 {offsets = [0, 0], sizes = [32, 2], strides = [1, 1]} : vector<64x2xf32> to vector<32x2xf32>
    %cst_144 = arith.constant dense<0.000000e+00> : vector<64x2xf32>
    %986 = tpu.matmul %973, %985, %cst_144 {dimension_numbers = #tpu.dot_dimension_numbers<[1], [0], [0], [1], [0, 0, 1, 1], [], []>} : vector<64x32xf32>, vector<32x2xf32>, vector<64x2xf32> -> vector<64x2xf32>
    %987 = vector.extract_strided_slice %984 {offsets = [32, 0], sizes = [32, 2], strides = [1, 1]} : vector<64x2xf32> to vector<32x2xf32>
    %cst_145 = arith.constant dense<0.000000e+00> : vector<64x2xf32>
    %988 = tpu.matmul %974, %987, %cst_145 {dimension_numbers = #tpu.dot_dimension_numbers<[1], [0], [0], [1], [0, 0, 1, 1], [], []>} : vector<64x32xf32>, vector<32x2xf32>, vector<64x2xf32> -> vector<64x2xf32>
    %989 = arith.addf %986, %988 : vector<64x2xf32>
    %990 = vector.shape_cast %983 : vector<64x8xf32> to vector<8x8x8xf32>
    %991 = tpu.iota {dimensions = array<i32: 1>} : vector<8x8x8xi32>
    %c2_i32 = arith.constant 2 : i32
    %992 = vector.broadcast %c2_i32 : i32 to vector<8x8x8xi32>
    %993 = arith.cmpi slt, %991, %992 : vector<8x8x8xi32>
    %cst_146 = arith.constant -1.000000e+30 : f32
    %994 = vector.broadcast %cst_146 : f32 to vector<8x8x8xf32>
    %995 = arith.select %993, %990, %994 : vector<8x8x8xi1>, vector<8x8x8xf32>
    %cst_147 = arith.constant dense<0xFF800000> : vector<8x8xf32>
    %996 = vector.multi_reduction <maximumf>, %995, %cst_147 [1] : vector<8x8x8xf32> to vector<8x8xf32>
    %997 = vector.shape_cast %996 : vector<8x8xf32> to vector<8x1x8xf32>
    %998 = vector.broadcast %997 : vector<8x1x8xf32> to vector<8x8x8xf32>
    %999 = arith.subf %995, %998 : vector<8x8x8xf32>
    %1000 = math.exp %999 : vector<8x8x8xf32>
    %cst_148 = arith.constant dense<0.000000e+00> : vector<8x8xf32>
    %1001 = vector.multi_reduction <add>, %1000, %cst_148 [1] : vector<8x8x8xf32> to vector<8x8xf32>
    %1002 = vector.shape_cast %1001 : vector<8x8xf32> to vector<8x1x8xf32>
    %1003 = tpu.reciprocal %1002 {approx = true} : vector<8x1x8xf32> -> vector<8x1x8xf32>
    %1004 = vector.broadcast %1003 : vector<8x1x8xf32> to vector<8x8x8xf32>
    %1005 = arith.mulf %1000, %1004 : vector<8x8x8xf32>
    %1006 = vector.shape_cast %989 : vector<64x2xf32> to vector<8x8x2xf32>
    %c0_149 = arith.constant 0 : index
    %c0_150 = arith.constant 0 : index
    %1007 = vector.load %arg10[%c0_149, %c0_150] : memref<1x2xf32, #tpu.memory_space<vmem>>, vector<1x2xf32>
    %1008 = vector.extract_strided_slice %1006 {offsets = [0, 0, 0], sizes = [8, 8, 1], strides = [1, 1, 1]} : vector<8x8x2xf32> to vector<8x8x1xf32>
    %1009 = vector.broadcast %1008 : vector<8x8x1xf32> to vector<8x8x8xf32>
    %1010 = arith.mulf %1005, %1009 : vector<8x8x8xf32>
    %cst_151 = arith.constant dense<0.000000e+00> : vector<8x8xf32>
    %1011 = vector.multi_reduction <add>, %1010, %cst_151 [0] : vector<8x8x8xf32> to vector<8x8xf32>
    %1012 = vector.extract_strided_slice %1007 {offsets = [0, 0], sizes = [1, 1], strides = [1, 1]} : vector<1x2xf32> to vector<1x1xf32>
    %1013 = vector.broadcast %1012 : vector<1x1xf32> to vector<8x8xf32>
    %1014 = arith.addf %1011, %1013 : vector<8x8xf32>
    %1015 = vector.extract_strided_slice %1006 {offsets = [0, 0, 1], sizes = [8, 8, 1], strides = [1, 1, 1]} : vector<8x8x2xf32> to vector<8x8x1xf32>
    %1016 = vector.broadcast %1015 : vector<8x8x1xf32> to vector<8x8x8xf32>
    %1017 = arith.mulf %1005, %1016 : vector<8x8x8xf32>
    %cst_152 = arith.constant dense<0.000000e+00> : vector<8x8xf32>
    %1018 = vector.multi_reduction <add>, %1017, %cst_152 [0] : vector<8x8x8xf32> to vector<8x8xf32>
    %1019 = vector.extract_strided_slice %1007 {offsets = [0, 1], sizes = [1, 1], strides = [1, 1]} : vector<1x2xf32> to vector<1x1xf32>
    %1020 = vector.broadcast %1019 : vector<1x1xf32> to vector<8x8xf32>
    %1021 = arith.addf %1018, %1020 : vector<8x8xf32>
    %1022 = tpu.iota {dimensions = array<i32: 1>} : vector<8x8xi32>
    %c4_i32 = arith.constant 4 : i32
    %1023 = vector.broadcast %c4_i32 : i32 to vector<8x8xi32>
    %1024 = arith.cmpi slt, %1022, %1023 : vector<8x8xi32>
    %1025 = arith.select %1024, %1014, %1021 : vector<8x8xi1>, vector<8x8xf32>
    %c0_153 = arith.constant 0 : index
    %c0_154 = arith.constant 0 : index
    %1026 = vector.load %arg11[%c0_153, %c0_154] : memref<8x8xf32, #tpu.memory_space<vmem>>, vector<8x8xf32>
    tpu.vector_store %arg11[%c0_153, %c0_154], %1025 {strides = array<i32>} : memref<8x8xf32, #tpu.memory_space<vmem>>, vector<8x8xf32>,
    return
  }
}

</mosaic_0001>

<bundles_post_ra>
// kernel: bilstm_forward.1
= control target key start
LH: loop header
LB: loop body
LE: loop exit
PB: predicated region body
PF: predicated region fallthrough
CT: control target
= control target key end

     0   :  { %v3521_v1 = vmov 0   ;;  %vm75_vm0 = vcmask 130048   ;;  %v3522_v12 = vmov 0.0|0.0   ;;  %v55_v20 = vlaneseq  ;;  %s4339_s1 = inlined_call_operand.vmem [shape: bf16[16,256], index: 1, kind: input, shape index: {}]   ;;  %s4340_s2 = inlined_call_operand.vmem [shape: bf16[32,256], index: 2, kind: input, shape index: {}]   ;;  %s4341_s0 = inlined_call_operand.vmem [shape: f32[64,16], index: 0, kind: input, shape index: {}]   ;;  %s4342_s3 = inlined_call_operand.vmem [shape: f32[1,256], index: 3, kind: input, shape index: {}]   ;;  %s4343_s4 = inlined_call_operand.vmem [shape: bf16[64,256], index: 4, kind: input, shape index: {}]   ;;  %s4344_s5 = inlined_call_operand.vmem [shape: bf16[32,256], index: 5, kind: input, shape index: {}]   ;;  %s4345_s6 = inlined_call_operand.vmem [shape: f32[1,256], index: 6, kind: input, shape index: {}]   ;;  %s4346_s9 = inlined_call_operand.vmem [shape: f32[64,2], index: 9, kind: input, shape index: {}]   ;;  %s4347_s7 = inlined_call_operand.vmem [shape: f32[64,8], index: 7, kind: input, shape index: {}]   ;;  %s4348_s8 = inlined_call_operand.vmem [shape: f32[1,8], index: 8, kind: input, shape index: {}]   ;;  %s4349_s10 = inlined_call_operand.vmem [shape: f32[1,2], index: 10, kind: input, shape index: {}]   ;;  %s4350_s11 = inlined_call_operand.vmem [shape: f32[8,8], index: 11, kind: output, shape index: {}]  }
   0x1   :  { %v3206_v0 = vld [vmem:[%s4339_s1 + $0x4] ss:$8 sps:$4 sm:$0xff]   ;;  %120 = vmatprep.mubr.bf16.mxu0 %v3521_v1  ;;  %222 = vmatprep.mubr.bf16.mxu1 %v3521_v1  ;;  %v3210_v3 = vld [vmem:[%s4339_s1] ss:$8 sps:$4 sm:$0xff]   ;;  %v3616_v8 = vld [vmem:[%s4340_s2 + $0x14] ss:$8 sps:$4 sm:$0xff]  }
   0x2   :  { %v3594_v2 = vld [vmem:[%s4340_s2 + $0x4] ss:$8 sps:$4 sm:$0xff]   ;;  %3191 = vset.pattern.permute.xlu1 %v3521_v1  ;;  %88 = vmatprep.subr.bf16.mxu0 %v3206_v0  ;;  %v3603_v4 = vld [vmem:[%s4340_s2] ss:$8 sps:$4 sm:$0xff]   ;;  %v3621_v9 = vld [vmem:[%s4340_s2 + $0x10] ss:$8 sps:$4 sm:$0xff]  }
   0x3   :  { %v39_v5 = vld [vmem:[%s4341_s0] sm:$0xff]  ;;  %190 = vmatprep.subr.bf16.mxu1 %v3594_v2  ;;  %v40_v6 = vld [vmem:[%s4341_s0 + $0x8] sm:$0xff]  ;;  %89 = vmatpush1.bf16.msra.mxu0 %v3210_v3  ;;  %v41_v10 = vld [vmem:[%s4341_s0 + $0x10] sm:$0xff]  ;;  %v3664_v21 = vshrl.u32 %v55_v20, 7  ;;  %vm186_vm1 = vcmask 261120   ;;  %vm2588_vm3 = vcmask 64512  }
   0x4   :  { %191 = vmatpush1.bf16.msra.mxu1 %v3603_v4  ;;  %v47_v7 = vpack.c.bf16 %v40_v6, %v39_v5  ;;  %582 = vmatprep.subr.bf16.mxu0 %v3594_v2  ;;  %v42_v11 = vld [vmem:[%s4341_s0 + $0x18] sm:$0xff]  ;;  %v43_v14 = vld [vmem:[%s4341_s0 + $0x20] sm:$0xff]  ;;  %v44_v15 = vld [vmem:[%s4341_s0 + $0x28] sm:$0xff] }
   0x5   :  { %192 = vmatprep.subr.bf16.mxu1 %v3616_v8  ;;  %v48_v13 = vpack.c.bf16 %v42_v11, %v41_v10  ;;  %v49_v16 = vpack.c.bf16 %v44_v15, %v43_v14  ;;  %v45_v17 = vld [vmem:[%s4341_s0 + $0x30] sm:$0xff]  ;;  %v46_v18 = vld [vmem:[%s4341_s0 + $0x38] sm:$0xff]  ;;  %v61_v22 = vsub.s32 1, %v3664_v21  ;;  %v53_v23 = vld [vmem:[%s4342_s3] sm:$0x3]  ;;  %v57_v24 = vsub.s32 0, %v3664_v21 }
   0x6   :  { %2886 = vmatmul.mubr.msk.bf16.vlgmr.msra.gmra.mrb[0].mxu0 %vm75_vm0, %v47_v7  ;;  %v50_v19 = vpack.c.bf16 %v46_v18, %v45_v17  ;;  %s3523_s0 = smov 64   ;;  %s3524_s3 = smov 32   ;;  %vm2579_vm2 = vcmp.lt.s32.totalorder %v3664_v21, 2 }
   0x7   :  { %130 = vmatprep.mubr.bf16.mxu0 %v3521_v1  ;;  %583 = vmatpush1.bf16.msra.mxu0 %v3603_v4  ;;  %v62_v25 = vrot.slane %v53_v23, %v61_v22  ;;  %v58_v26 = vrot.slane %v53_v23, %v57_v24 }
   0x8   :  { %193 = vmatpush1.bf16.msra.mxu1 %v3621_v9  ;;  %584 = vmatprep.subr.bf16.mxu0 %v3616_v8 }
   0x9   :  { %288 = vmatprep.subr.bf16.mxu1 %v3594_v2 }
   0xb   :  { %223 = vmatmul.mubr.bf16.vlgmr.msra.gmra.mrb[0].mxu1 %v3522_v12  ;;  %585 = vmatpush1.bf16.msra.mxu0 %v3621_v9 }
   0xc   :  { %289 = vmatpush1.bf16.msra.mxu1 %v3603_v4  ;;  %320 = vmatprep.mubr.bf16.mxu1 %v3521_v1 }
   0xd   :  { %290 = vmatprep.subr.bf16.mxu1 %v3616_v8  ;;  %778 = vmatprep.subr.bf16.mxu0 %v3594_v2 }
   0xe   :  { %2887 = vmatmul.mubr.msk.bf16.gmra.mrb[4].mxu0 %vm75_vm0, %v48_v13 }
   0xf   :  { %140 = vmatprep.mubr.bf16.mxu0 %v3521_v1 }
  0x10   :  { %291 = vmatpush1.bf16.msra.mxu1 %v3621_v9 }
  0x11   :  { %386 = vmatprep.subr.bf16.mxu1 %v3594_v2 }
  0x16   :  { %2888 = vmatmul.mubr.msk.bf16.gmra.mrb[8].mxu0 %vm75_vm0, %v49_v16 }
  0x17   :  { %150 = vmatprep.mubr.bf16.mxu0 %v3521_v1 }
  0x1e   :  { %2889 = vmatmul.mubr.msk.bf16.gmra.mrb[12].mxu0 %vm75_vm0, %v50_v19 }
  0x1f   :  { %614 = vmatprep.mubr.bf16.mxu0 %v3521_v1 }
  0xd9   :  { %v122_v27 = vpop.f32.mrb[0].mxu0 }
  0xda   :  { %v124_v28 = vpop.f32.mrb[1].mxu0  ;;  %v123_v31 = vadd.f32 %v122_v27, %v58_v26 }
  0xdb   :  { %v3675_v29 = vadd.f32 %v124_v28, %v62_v25  ;;  %v126_v30 = vpop.f32.mrb[2].mxu0 }
  0xdc   :  { %v3677_v32 = vadd.f32 %v126_v30, %v58_v26  ;;  %v128_v33 = vpop.f32.mrb[3].mxu0 }
  0xdd   :  { %v3679_v34 = vadd.f32 %v128_v33, %v62_v25 }
  0xde   :  { %v224_v35 = vpop.f32.mrb[0].mxu1 }
  0xdf   :  { %v231_v36 = vadd.f32 %v224_v35, %v123_v31  ;;  %v226_v37 = vpop.f32.mrb[1].mxu1 }
  0xe0   :  { %v227_v38 = vpop.f32.mrb[2].mxu1 }
  0xe1   :  { %3233 = vtanh.f32 %v231_v36  ;;  %v228_v39 = vpop.f32.mrb[3].mxu1  ;;  %v132_v40 = vpop.f32.mrb[4].mxu0  ;;  %v2894_v6 = vmul.f32 -1.442695, %v231_v36 }
  0xe2   :  { %v3681_v41 = vadd.f32 %v132_v40, %v58_v26  ;;  %v134_v42 = vpop.f32.mrb[5].mxu0 }
  0xe3   :  { %v3683_v43 = vadd.f32 %v134_v42, %v62_v25  ;;  %v136_v44 = vpop.f32.mrb[6].mxu0 }
  0xe4   :  { %v3685_v45 = vadd.f32 %v136_v44, %v58_v26  ;;  %v138_v46 = vpop.f32.mrb[7].mxu0 }
  0xe5   :  { %v3687_v47 = vadd.f32 %v138_v46, %v62_v25 }
  0xe9   :  { %v142_v48 = vpop.f32.mrb[8].mxu0 }
  0xea   :  { %v3689_v50 = vadd.f32 %v142_v48, %v58_v26  ;;  %v144_v51 = vpop.f32.mrb[9].mxu0 }
  0xeb   :  { %v3234_v49 = vpop.eup %3233  ;;  %v3691_v52 = vadd.f32 %v144_v51, %v62_v25  ;;  %v146_v53 = vpop.f32.mrb[10].mxu0 }
  0xec   :  { %242 = vrot.lane.b32.xlu0 %v3234_v49, %s3523_s0  ;;  %v3694_v54 = vadd.f32 %v146_v53, %v58_v26  ;;  %v148_v55 = vpop.f32.mrb[11].mxu0 }
  0xed   :  { %v3696_v56 = vadd.f32 %v148_v55, %v62_v25 }
  0xf1   :  { %v152_v57 = vpop.f32.mrb[12].mxu0 }
  0xf2   :  { %v3698_v58 = vadd.f32 %v152_v57, %v58_v26  ;;  %v154_v59 = vpop.f32.mrb[13].mxu0 }
  0xf3   :  { %v155_v60 = vadd.f32 %v154_v59, %v62_v25  ;;  %v156_v61 = vpop.f32.mrb[14].mxu0 }
  0xf4   :  { %v3700_v62 = vadd.f32 %v156_v61, %v58_v26  ;;  %v158_v63 = vpop.f32.mrb[15].mxu0 }
  0xf5   :  { %v159_v0 = vadd.f32 %v158_v63, %v62_v25 }
  0xf7   :  { %v232_v3 = vadd.f32 %v228_v39, %v159_v0 }
  0xf9   :  { %3235 = vtanh.f32 %v232_v3  ;;  %v2895_v11 = vmul.f32 -1.442695, %v232_v3 }
  0xfa   :  { %3237 = vpow2.f32 %v2894_v6 }
 0x103   :  { %v3236_v5 = vpop.eup %3235 }
 0x104   :  { %266 = vrot.lane.b32.xlu0 %v3236_v5, %s3523_s0  ;;  %v3238_v7 = vpop.eup %3237 }
 0x105   :  { %v236_v10 = vadd.f32 1.0, %v3238_v7 }
 0x107   :  { %3239 = vrcp.f32 %v236_v10 }
 0x108   :  { %3241 = vpow2.f32 %v2895_v11 }
 0x111   :  { %v3240_v13 = vpop.eup %3239 }
 0x112   :  { %v3242_v16 = vpop.eup %3241  ;;  %v240_v25 = vmul.f32 0.0, %v3240_v13 }
 0x113   :  { %v260_v17 = vadd.f32 1.0, %v3242_v16 }
 0x115   :  { %3243 = vrcp.f32 %v260_v17 }
 0x11f   :  { %v3244_v18 = vpop.eup %3243 }
 0x120   :  { %v264_v30 = vmul.f32 0.0, %v3244_v18 }
 0x15e   :  { %v243_v14 = vpop.permute.xlu0 %242 }
 0x15f   :  { %v245_v15 = vmul.f32 %v3240_v13, %v243_v14 }
 0x161   :  { %247 = vrot.lane.b32.xlu1 %v245_v15, %s3524_s3 }
 0x176   :  { %v267_v19 = vpop.permute.xlu0 %266 }
 0x177   :  { %v269_v23 = vmul.f32 %v3244_v18, %v267_v19 }
 0x179   :  { %271 = vrot.lane.b32.xlu1 %v269_v23, %s3524_s3 }
 0x1d3   :  { %v248_v26 = vpop.permute.xlu1 %247 }
 0x1d4   :  { %v250_v27 = vadd.f32 %v248_v26, %v240_v25 }
 0x1d6   :  { %3245 = vtanh.f32 %v250_v27 }
 0x1e0   :  { %v3246_v28 = vpop.eup %3245 }
 0x1e1   :  { %253 = vrot.lane.b32.xlu0 %v3246_v28, %s3523_s0 }
 0x1eb   :  { %v272_v31 = vpop.permute.xlu1 %271 }
 0x1ec   :  { %v274_v33 = vadd.f32 %v272_v31, %v264_v30 }
 0x1ee   :  { %3247 = vtanh.f32 %v274_v33 }
 0x1f8   :  { %v3248_v35 = vpop.eup %3247 }
 0x1f9   :  { %277 = vrot.lane.b32.xlu1 %v3248_v35, %s3523_s0 }
 0x253   :  { %v254_v36 = vpop.permute.xlu0 %253 }
 0x254   :  { %v3707_v38 = vmul.f32 %v3240_v13, %v254_v36 }
 0x26b   :  { %v278_v37 = vpop.permute.xlu1 %277 }
 0x26c   :  { %v3709_v39 = vmul.f32 %v3244_v18, %v278_v37 }
 0x26e   :  { %v281_v40 = vpack.c.bf16 %v3709_v39, %v3707_v38 }
 0x270   :  { %283 = vrot.lane.b32.xlu0 %v281_v40, %s3524_s3 }
 0x2e2   :  { %v284_v42 = vpop.permute.xlu0 %283 }
 0x2e3   :  { %2896 = vmatmul.mubr.msk.bf16.vlgmr.msra.gmra.mrb[4].mxu1 %vm186_vm1, %v284_v42 }
 0x2e4   :  { %387 = vmatpush1.bf16.msra.mxu1 %v3603_v4  ;;  %418 = vmatprep.mubr.bf16.mxu1 %v3521_v1 }
 0x2e5   :  { %388 = vmatprep.subr.bf16.mxu1 %v3616_v8 }
 0x2e8   :  { %389 = vmatpush1.bf16.msra.mxu1 %v3621_v9 }
 0x2e9   :  { %484 = vmatprep.subr.bf16.mxu1 %v3594_v2 }
 0x3b6   :  { %v322_v44 = vpop.f32.mrb[4].mxu1 }
 0x3b7   :  { %v329_v46 = vadd.f32 %v322_v44, %v3677_v32  ;;  %v324_v48 = vpop.f32.mrb[5].mxu1 }
 0x3b8   :  { %v325_v49 = vpop.f32.mrb[6].mxu1 }
 0x3b9   :  { %3249 = vtanh.f32 %v329_v46  ;;  %v326_v51 = vpop.f32.mrb[7].mxu1  ;;  %v2897_v59 = vmul.f32 -1.442695, %v329_v46 }
 0x3ba   :  { %v330_v53 = vadd.f32 %v326_v51, %v155_v60 }
 0x3bc   :  { %3251 = vtanh.f32 %v330_v53  ;;  %v2898_v61 = vmul.f32 -1.442695, %v330_v53 }
 0x3bd   :  { %3253 = vpow2.f32 %v2897_v59 }
 0x3be   :  { %3255 = vpow2.f32 %v2898_v61 }
 0x3c3   :  { %v3250_v55 = vpop.eup %3249 }
 0x3c4   :  { %340 = vrot.lane.b32.xlu1 %v3250_v55, %s3523_s0 }
 0x3c6   :  { %v3252_v57 = vpop.eup %3251 }
 0x3c7   :  { %364 = vrot.lane.b32.xlu0 %v3252_v57, %s3523_s0  ;;  %v3254_v63 = vpop.eup %3253 }
 0x3c8   :  { %v3256_v0 = vpop.eup %3255  ;;  %v334_v3 = vadd.f32 1.0, %v3254_v63 }
 0x3c9   :  { %v358_v32 = vadd.f32 1.0, %v3256_v0 }
 0x3ca   :  { %3257 = vrcp.f32 %v334_v3 }
 0x3cb   :  { %3259 = vrcp.f32 %v358_v32 }
 0x3d4   :  { %v3258_v5 = vpop.eup %3257 }
 0x3d5   :  { %v3260_v7 = vpop.eup %3259  ;;  %v338_v13 = vmul.f32 %v3258_v5, %v250_v27 }
 0x3d6   :  { %v362_v16 = vmul.f32 %v3260_v7, %v274_v33 }
 0x436   :  { %v341_v6 = vpop.permute.xlu1 %340 }
 0x437   :  { %v343_v60 = vmul.f32 %v3258_v5, %v341_v6 }
 0x439   :  { %345 = vrot.lane.b32.xlu1 %v343_v60, %s3524_s3  ;;  %v365_v10 = vpop.permute.xlu0 %364 }
 0x43a   :  { %v367_v11 = vmul.f32 %v3260_v7, %v365_v10 }
 0x43c   :  { %369 = vrot.lane.b32.xlu0 %v367_v11, %s3524_s3 }
 0x4ab   :  { %v346_v14 = vpop.permute.xlu1 %345 }
 0x4ac   :  { %v348_v15 = vadd.f32 %v346_v14, %v338_v13 }
 0x4ae   :  { %3261 = vtanh.f32 %v348_v15  ;;  %v370_v17 = vpop.permute.xlu0 %369 }
 0x4af   :  { %v372_v18 = vadd.f32 %v370_v17, %v362_v16 }
 0x4b1   :  { %3263 = vtanh.f32 %v372_v18 }
 0x4b8   :  { %v3262_v19 = vpop.eup %3261 }
 0x4b9   :  { %351 = vrot.lane.b32.xlu1 %v3262_v19, %s3523_s0 }
 0x4bb   :  { %v3264_v23 = vpop.eup %3263 }
 0x4bc   :  { %375 = vrot.lane.b32.xlu0 %v3264_v23, %s3523_s0 }
 0x52b   :  { %v352_v25 = vpop.permute.xlu1 %351 }
 0x52c   :  { %v3727_v28 = vmul.f32 %v3258_v5, %v352_v25 }
 0x52e   :  { %v376_v26 = vpop.permute.xlu0 %375 }
 0x52f   :  { %v3729_v30 = vmul.f32 %v3260_v7, %v376_v26 }
 0x531   :  { %v379_v27 = vpack.c.bf16 %v3729_v30, %v3727_v28 }
 0x533   :  { %381 = vrot.lane.b32.xlu1 %v379_v27, %s3524_s3 }
 0x5a5   :  { %v382_v31 = vpop.permute.xlu1 %381 }
 0x5a6   :  { %2899 = vmatmul.mubr.msk.bf16.vlgmr.msra.gmra.mrb[8].mxu1 %vm186_vm1, %v382_v31 }
 0x5a7   :  { %485 = vmatpush1.bf16.msra.mxu1 %v3603_v4  ;;  %516 = vmatprep.mubr.bf16.mxu1 %v3521_v1 }
 0x5a8   :  { %486 = vmatprep.subr.bf16.mxu1 %v3616_v8 }
 0x5ab   :  { %487 = vmatpush1.bf16.msra.mxu1 %v3621_v9 }
 0x5ac   :  { %680 = vmatprep.subr.bf16.mxu1 %v3594_v2 }
 0x679   :  { %v420_v33 = vpop.f32.mrb[8].mxu1 }
 0x67a   :  { %v427_v35 = vadd.f32 %v420_v33, %v3681_v41  ;;  %v422_v36 = vpop.f32.mrb[9].mxu1 }
 0x67b   :  { %v423_v37 = vpop.f32.mrb[10].mxu1 }
 0x67c   :  { %3265 = vtanh.f32 %v427_v35  ;;  %v424_v40 = vpop.f32.mrb[11].mxu1  ;;  %v2900_v48 = vmul.f32 -1.442695, %v427_v35 }
 0x67d   :  { %v428_v42 = vadd.f32 %v424_v40, %v3696_v56 }
 0x67f   :  { %3267 = vtanh.f32 %v428_v42  ;;  %v2901_v49 = vmul.f32 -1.442695, %v428_v42 }
 0x680   :  { %3269 = vpow2.f32 %v2900_v48 }
 0x681   :  { %3271 = vpow2.f32 %v2901_v49 }
 0x686   :  { %v3266_v44 = vpop.eup %3265 }
 0x687   :  { %438 = vrot.lane.b32.xlu0 %v3266_v44, %s3523_s0 }
 0x689   :  { %v3268_v46 = vpop.eup %3267 }
 0x68a   :  { %462 = vrot.lane.b32.xlu1 %v3268_v46, %s3523_s0  ;;  %v3270_v51 = vpop.eup %3269 }
 0x68b   :  { %v3272_v53 = vpop.eup %3271  ;;  %v432_v41 = vadd.f32 1.0, %v3270_v51 }
 0x68c   :  { %v456_v55 = vadd.f32 1.0, %v3272_v53 }
 0x68d   :  { %3273 = vrcp.f32 %v432_v41 }
 0x68e   :  { %3275 = vrcp.f32 %v456_v55 }
 0x697   :  { %v3274_v57 = vpop.eup %3273 }
 0x698   :  { %v3276_v61 = vpop.eup %3275  ;;  %v436_v3 = vmul.f32 %v3274_v57, %v348_v15 }
 0x699   :  { %v460_v6 = vmul.f32 %v3276_v61, %v372_v18 }
 0x6f9   :  { %v439_v59 = vpop.permute.xlu0 %438 }
 0x6fa   :  { %v441_v56 = vmul.f32 %v3274_v57, %v439_v59 }
 0x6fc   :  { %443 = vrot.lane.b32.xlu0 %v441_v56, %s3524_s3  ;;  %v463_v63 = vpop.permute.xlu1 %462 }
 0x6fd   :  { %v465_v0 = vmul.f32 %v3276_v61, %v463_v63 }
 0x6ff   :  { %467 = vrot.lane.b32.xlu1 %v465_v0, %s3524_s3 }
 0x76e   :  { %v444_v32 = vpop.permute.xlu0 %443 }
 0x76f   :  { %v446_v5 = vadd.f32 %v444_v32, %v436_v3 }
 0x771   :  { %3277 = vtanh.f32 %v446_v5  ;;  %v468_v60 = vpop.permute.xlu1 %467 }
 0x772   :  { %v470_v7 = vadd.f32 %v468_v60, %v460_v6 }
 0x774   :  { %3279 = vtanh.f32 %v470_v7 }
 0x77b   :  { %v3278_v10 = vpop.eup %3277 }
 0x77c   :  { %449 = vrot.lane.b32.xlu0 %v3278_v10, %s3523_s0 }
 0x77e   :  { %v3280_v11 = vpop.eup %3279 }
 0x77f   :  { %473 = vrot.lane.b32.xlu1 %v3280_v11, %s3523_s0 }
 0x7ee   :  { %v450_v13 = vpop.permute.xlu0 %449 }
 0x7ef   :  { %v3748_v16 = vmul.f32 %v3274_v57, %v450_v13 }
 0x7f1   :  { %v474_v14 = vpop.permute.xlu1 %473 }
 0x7f2   :  { %v3750_v17 = vmul.f32 %v3276_v61, %v474_v14 }
 0x7f4   :  { %v477_v15 = vpack.c.bf16 %v3750_v17, %v3748_v16 }
 0x7f6   :  { %479 = vrot.lane.b32.xlu0 %v477_v15, %s3524_s3 }
 0x868   :  { %v480_v18 = vpop.permute.xlu0 %479 }
 0x869   :  { %2902 = vmatmul.mubr.msk.bf16.vlgmr.msra.gmra.mrb[12].mxu1 %vm186_vm1, %v480_v18 }
 0x86a   :  { %681 = vmatpush1.bf16.msra.mxu1 %v3603_v4  ;;  %712 = vmatprep.mubr.bf16.mxu1 %v3521_v1 }
 0x86b   :  { %682 = vmatprep.subr.bf16.mxu1 %v3616_v8 }
 0x86e   :  { %683 = vmatpush1.bf16.msra.mxu1 %v3621_v9 }
 0x86f   :  { %876 = vmatprep.subr.bf16.mxu1 %v3594_v2 }
 0x93c   :  { %v518_v19 = vpop.f32.mrb[12].mxu1 }
 0x93d   :  { %v525_v23 = vadd.f32 %v518_v19, %v3685_v45  ;;  %v520_v25 = vpop.f32.mrb[13].mxu1 }
 0x93e   :  { %v521_v26 = vpop.f32.mrb[14].mxu1 }
 0x93f   :  { %3281 = vtanh.f32 %v525_v23  ;;  %v522_v27 = vpop.f32.mrb[15].mxu1  ;;  %v2903_v36 = vmul.f32 -1.442695, %v525_v23 }
 0x940   :  { %v526_v31 = vadd.f32 %v522_v27, %v3691_v52 }
 0x942   :  { %3283 = vtanh.f32 %v526_v31  ;;  %v2904_v37 = vmul.f32 -1.442695, %v526_v31 }
 0x943   :  { %3285 = vpow2.f32 %v2903_v36 }
 0x944   :  { %3287 = vpow2.f32 %v2904_v37 }
 0x949   :  { %v3282_v33 = vpop.eup %3281 }
 0x94a   :  { %536 = vrot.lane.b32.xlu1 %v3282_v33, %s3523_s0 }
 0x94c   :  { %v3284_v35 = vpop.eup %3283 }
 0x94d   :  { %560 = vrot.lane.b32.xlu0 %v3284_v35, %s3523_s0  ;;  %v3286_v2 = vpop.eup %3285 }
 0x94e   :  { %v3288_v40 = vpop.eup %3287  ;;  %v530_v45 = vadd.f32 1.0, %v3286_v2 }
 0x94f   :  { %v554_v42 = vadd.f32 1.0, %v3288_v40 }
 0x950   :  { %3289 = vrcp.f32 %v530_v45 }
 0x951   :  { %3291 = vrcp.f32 %v554_v42 }
 0x95a   :  { %v3290_v44 = vpop.eup %3289 }
 0x95b   :  { %v3292_v48 = vpop.eup %3291  ;;  %v534_v53 = vmul.f32 %v3290_v44, %v446_v5 }
 0x95c   :  { %v558_v57 = vmul.f32 %v3292_v48, %v470_v7 }
 0x9bc   :  { %v537_v46 = vpop.permute.xlu1 %536 }
 0x9bd   :  { %v539_v52 = vmul.f32 %v3290_v44, %v537_v46 }
 0x9bf   :  { %541 = vrot.lane.b32.xlu1 %v539_v52, %s3524_s3  ;;  %v561_v49 = vpop.permute.xlu0 %560 }
 0x9c0   :  { %v563_v51 = vmul.f32 %v3292_v48, %v561_v49 }
 0x9c2   :  { %565 = vrot.lane.b32.xlu0 %v563_v51, %s3524_s3 }
 0xa31   :  { %v542_v41 = vpop.permute.xlu1 %541 }
 0xa32   :  { %v544_v55 = vadd.f32 %v542_v41, %v534_v53 }
 0xa34   :  { %3293 = vtanh.f32 %v544_v55  ;;  %v566_v59 = vpop.permute.xlu0 %565 }
 0xa35   :  { %v568_v56 = vadd.f32 %v566_v59, %v558_v57 }
 0xa37   :  { %3295 = vtanh.f32 %v568_v56 }
 0xa3e   :  { %v3294_v61 = vpop.eup %3293 }
 0xa3f   :  { %547 = vrot.lane.b32.xlu1 %v3294_v61, %s3523_s0 }
 0xa41   :  { %v3296_v63 = vpop.eup %3295 }
 0xa42   :  { %571 = vrot.lane.b32.xlu0 %v3296_v63, %s3523_s0 }
 0xab1   :  { %v548_v0 = vpop.permute.xlu1 %547 }
 0xab2   :  { %v3769_v32 = vmul.f32 %v3290_v44, %v548_v0 }
 0xab4   :  { %v572_v3 = vpop.permute.xlu0 %571 }
 0xab5   :  { %v3771_v6 = vmul.f32 %v3292_v48, %v572_v3 }
 0xab7   :  { %v575_v5 = vpack.c.bf16 %v3771_v6, %v3769_v32 }
 0xab9   :  { %577 = vrot.lane.b32.xlu1 %v575_v5, %s3524_s3 }
 0xb2b   :  { %v578_v60 = vpop.permute.xlu1 %577 }
 0xb2c   :  { %2905 = vmatmul.mubr.msk.bf16.vlgmr.msra.gmra.mrb[16].mxu0 %vm186_vm1, %v578_v60 }
 0xb2d   :  { %779 = vmatpush1.bf16.msra.mxu0 %v3603_v4  ;;  %810 = vmatprep.mubr.bf16.mxu0 %v3521_v1 }
 0xb2e   :  { %780 = vmatprep.subr.bf16.mxu0 %v3616_v8 }
 0xb31   :  { %781 = vmatpush1.bf16.msra.mxu0 %v3621_v9 }
 0xbff   :  { %v616_v7 = vpop.f32.mrb[16].mxu0 }
 0xc00   :  { %v623_v10 = vadd.f32 %v616_v7, %v3689_v50  ;;  %v618_v11 = vpop.f32.mrb[17].mxu0 }
 0xc01   :  { %v619_v13 = vpop.f32.mrb[18].mxu0 }
 0xc02   :  { %3297 = vtanh.f32 %v623_v10  ;;  %v620_v14 = vpop.f32.mrb[19].mxu0  ;;  %v2906_v23 = vmul.f32 -1.442695, %v623_v10 }
 0xc03   :  { %v624_v15 = vadd.f32 %v620_v14, %v3687_v47 }
 0xc05   :  { %3299 = vtanh.f32 %v624_v15  ;;  %v2907_v25 = vmul.f32 -1.442695, %v624_v15 }
 0xc06   :  { %3301 = vpow2.f32 %v2906_v23 }
 0xc07   :  { %3303 = vpow2.f32 %v2907_v25 }
 0xc0c   :  { %v3298_v18 = vpop.eup %3297 }
 0xc0d   :  { %634 = vrot.lane.b32.xlu0 %v3298_v18, %s3523_s0 }
 0xc0f   :  { %v3300_v19 = vpop.eup %3299 }
 0xc10   :  { %658 = vrot.lane.b32.xlu1 %v3300_v19, %s3523_s0  ;;  %v3302_v26 = vpop.eup %3301 }
 0xc11   :  { %v3304_v27 = vpop.eup %3303  ;;  %v628_v50 = vadd.f32 1.0, %v3302_v26 }
 0xc12   :  { %v652_v31 = vadd.f32 1.0, %v3304_v27 }
 0xc13   :  { %3305 = vrcp.f32 %v628_v50 }
 0xc14   :  { %3307 = vrcp.f32 %v652_v31 }
 0xc1d   :  { %v3306_v33 = vpop.eup %3305 }
 0xc1e   :  { %v3308_v36 = vpop.eup %3307  ;;  %v632_v40 = vmul.f32 %v3306_v33, %v544_v55 }
 0xc1f   :  { %v656_v44 = vmul.f32 %v3308_v36, %v568_v56 }
 0xc7f   :  { %v635_v35 = vpop.permute.xlu0 %634 }
 0xc80   :  { %v637_v47 = vmul.f32 %v3306_v33, %v635_v35 }
 0xc82   :  { %639 = vrot.lane.b32.xlu0 %v637_v47, %s3524_s3  ;;  %v659_v37 = vpop.permute.xlu1 %658 }
 0xc83   :  { %v661_v2 = vmul.f32 %v3308_v36, %v659_v37 }
 0xc85   :  { %663 = vrot.lane.b32.xlu1 %v661_v2, %s3524_s3 }
 0xcf4   :  { %v640_v45 = vpop.permute.xlu0 %639 }
 0xcf5   :  { %v642_v42 = vadd.f32 %v640_v45, %v632_v40 }
 0xcf7   :  { %3309 = vtanh.f32 %v642_v42  ;;  %v664_v46 = vpop.permute.xlu1 %663 }
 0xcf8   :  { %v666_v52 = vadd.f32 %v664_v46, %v656_v44 }
 0xcfa   :  { %3311 = vtanh.f32 %v666_v52 }
 0xd01   :  { %v3310_v48 = vpop.eup %3309 }
 0xd02   :  { %645 = vrot.lane.b32.xlu0 %v3310_v48, %s3523_s0 }
 0xd04   :  { %v3312_v49 = vpop.eup %3311 }
 0xd05   :  { %669 = vrot.lane.b32.xlu1 %v3312_v49, %s3523_s0 }
 0xd74   :  { %v646_v51 = vpop.permute.xlu0 %645 }
 0xd75   :  { %v3789_v41 = vmul.f32 %v3306_v33, %v646_v51 }
 0xd77   :  { %v670_v53 = vpop.permute.xlu1 %669 }
 0xd78   :  { %v3791_v57 = vmul.f32 %v3308_v36, %v670_v53 }
 0xd7a   :  { %v673_v55 = vpack.c.bf16 %v3791_v57, %v3789_v41 }
 0xd7c   :  { %675 = vrot.lane.b32.xlu0 %v673_v55, %s3524_s3 }
 0xdee   :  { %v676_v59 = vpop.permute.xlu0 %675 }
 0xdef   :  { %2908 = vmatmul.mubr.msk.bf16.vlgmr.msra.gmra.mrb[16].mxu1 %vm186_vm1, %v676_v59 }
 0xdf0   :  { %877 = vmatpush1.bf16.msra.mxu1 %v3603_v4  ;;  %908 = vmatprep.mubr.bf16.mxu1 %v3521_v1 }
 0xdf1   :  { %878 = vmatprep.subr.bf16.mxu1 %v3616_v8 }
 0xdf4   :  { %879 = vmatpush1.bf16.msra.mxu1 %v3621_v9 }
 0xec2   :  { %v714_v56 = vpop.f32.mrb[16].mxu1 }
 0xec3   :  { %v721_v61 = vadd.f32 %v714_v56, %v3694_v54  ;;  %v716_v63 = vpop.f32.mrb[17].mxu1 }
 0xec4   :  { %v717_v0 = vpop.f32.mrb[18].mxu1 }
 0xec5   :  { %3313 = vtanh.f32 %v721_v61  ;;  %v718_v3 = vpop.f32.mrb[19].mxu1  ;;  %v2909_v7 = vmul.f32 -1.442695, %v721_v61 }
 0xec6   :  { %v722_v5 = vadd.f32 %v718_v3, %v3683_v43 }
 0xec8   :  { %3315 = vtanh.f32 %v722_v5  ;;  %v2910_v8 = vmul.f32 -1.442695, %v722_v5 }
 0xec9   :  { %3317 = vpow2.f32 %v2909_v7 }
 0xeca   :  { %3319 = vpow2.f32 %v2910_v8 }
 0xecf   :  { %v3314_v60 = vpop.eup %3313 }
 0xed0   :  { %732 = vrot.lane.b32.xlu1 %v3314_v60, %s3523_s0 }
 0xed2   :  { %v3316_v4 = vpop.eup %3315 }
 0xed3   :  { %756 = vrot.lane.b32.xlu0 %v3316_v4, %s3523_s0  ;;  %v3318_v9 = vpop.eup %3317 }
 0xed4   :  { %v3320_v10 = vpop.eup %3319  ;;  %v726_v54 = vadd.f32 1.0, %v3318_v9 }
 0xed5   :  { %v750_v11 = vadd.f32 1.0, %v3320_v10 }
 0xed6   :  { %3321 = vrcp.f32 %v726_v54 }
 0xed7   :  { %3323 = vrcp.f32 %v750_v11 }
 0xee0   :  { %v3322_v13 = vpop.eup %3321 }
 0xee1   :  { %v3324_v15 = vpop.eup %3323  ;;  %v730_v23 = vmul.f32 %v3322_v13, %v642_v42 }
 0xee2   :  { %v754_v27 = vmul.f32 %v3324_v15, %v666_v52 }
 0xf42   :  { %v733_v14 = vpop.permute.xlu1 %732 }
 0xf43   :  { %v735_v43 = vmul.f32 %v3322_v13, %v733_v14 }
 0xf45   :  { %737 = vrot.lane.b32.xlu1 %v735_v43, %s3524_s3  ;;  %v757_v18 = vpop.permute.xlu0 %756 }
 0xf46   :  { %v759_v19 = vmul.f32 %v3324_v15, %v757_v18 }
 0xf48   :  { %761 = vrot.lane.b32.xlu0 %v759_v19, %s3524_s3 }
 0xfb7   :  { %v738_v25 = vpop.permute.xlu1 %737 }
 0xfb8   :  { %v740_v26 = vadd.f32 %v738_v25, %v730_v23 }
 0xfba   :  { %3325 = vtanh.f32 %v740_v26  ;;  %v762_v50 = vpop.permute.xlu0 %761 }
 0xfbb   :  { %v764_v31 = vadd.f32 %v762_v50, %v754_v27 }
 0xfbd   :  { %3327 = vtanh.f32 %v764_v31 }
 0xfc4   :  { %v3326_v33 = vpop.eup %3325 }
 0xfc5   :  { %743 = vrot.lane.b32.xlu1 %v3326_v33, %s3523_s0 }
 0xfc7   :  { %v3328_v35 = vpop.eup %3327 }
 0xfc8   :  { %767 = vrot.lane.b32.xlu0 %v3328_v35, %s3523_s0 }
0x1037   :  { %v744_v47 = vpop.permute.xlu1 %743 }
0x1038   :  { %v3809_v37 = vmul.f32 %v3322_v13, %v744_v47 }
0x103a   :  { %v768_v36 = vpop.permute.xlu0 %767 }
0x103b   :  { %v3811_v2 = vmul.f32 %v3324_v15, %v768_v36 }
0x103d   :  { %v771_v40 = vpack.c.bf16 %v3811_v2, %v3809_v37 }
0x103f   :  { %773 = vrot.lane.b32.xlu1 %v771_v40, %s3524_s3 }
0x10b1   :  { %v774_v45 = vpop.permute.xlu1 %773 }
0x10b2   :  { %2911 = vmatmul.mubr.msk.bf16.vlgmr.msra.gmra.mrb[20].mxu0 %vm186_vm1, %v774_v45 }
0x10b3   :  { %1059 = vmatprep.mubr.bf16.mxu0 %v3521_v1 }
0x1185   :  { %v812_v42 = vpop.f32.mrb[20].mxu0 }
0x1186   :  { %v819_v44 = vadd.f32 %v812_v42, %v3698_v58  ;;  %v814_v46 = vpop.f32.mrb[21].mxu0 }
0x1187   :  { %v815_v52 = vpop.f32.mrb[22].mxu0 }
0x1188   :  { %3329 = vtanh.f32 %v819_v44  ;;  %v816_v48 = vpop.f32.mrb[23].mxu0  ;;  %v2912_v55 = vmul.f32 -1.442695, %v819_v44 }
0x1189   :  { %v820_v49 = vadd.f32 %v816_v48, %v3679_v34 }
0x118b   :  { %3331 = vtanh.f32 %v820_v49  ;;  %v2913_v59 = vmul.f32 -1.442695, %v820_v49 }
0x118c   :  { %3333 = vpow2.f32 %v2912_v55 }
0x118d   :  { %3335 = vpow2.f32 %v2913_v59 }
0x1192   :  { %v3330_v51 = vpop.eup %3329 }
0x1193   :  { %830 = vrot.lane.b32.xlu0 %v3330_v51, %s3523_s0 }
0x1195   :  { %v3332_v53 = vpop.eup %3331 }
0x1196   :  { %854 = vrot.lane.b32.xlu1 %v3332_v53, %s3523_s0  ;;  %v3334_v56 = vpop.eup %3333 }
0x1197   :  { %v3336_v61 = vpop.eup %3335  ;;  %v824_v58 = vadd.f32 1.0, %v3334_v56 }
0x1198   :  { %v848_v63 = vadd.f32 1.0, %v3336_v61 }
0x1199   :  { %3337 = vrcp.f32 %v824_v58 }
0x119a   :  { %3339 = vrcp.f32 %v848_v63 }
0x11a3   :  { %v3338_v0 = vpop.eup %3337 }
0x11a4   :  { %v3340_v5 = vpop.eup %3339  ;;  %v828_v7 = vmul.f32 %v3338_v0, %v740_v26 }
0x11a5   :  { %v852_v10 = vmul.f32 %v3340_v5, %v764_v31 }
0x1205   :  { %v831_v3 = vpop.permute.xlu0 %830 }
0x1206   :  { %v833_v34 = vmul.f32 %v3338_v0, %v831_v3 }
0x1208   :  { %835 = vrot.lane.b32.xlu0 %v833_v34, %s3524_s3  ;;  %v855_v60 = vpop.permute.xlu1 %854  ;;  %v976_v34 = vpack.c.bf16 %v3791_v57, %v3811_v2  ;;  %v3220_v57 = vld [vmem:[%s4343_s4 + $0x34] ss:$8 sps:$4 sm:$0xff]   ;;  %v968_v2 = vpack.c.bf16 %v3769_v32, %v3748_v16 }
0x1209   :  { %v857_v4 = vmul.f32 %v3340_v5, %v855_v60  ;;  %v3215_v60 = vld [vmem:[%s4343_s4 + $0x20] ss:$8 sps:$4 sm:$0xff]  }
0x120b   :  { %859 = vrot.lane.b32.xlu1 %v857_v4, %s3524_s3  ;;  %v3217_v4 = vld [vmem:[%s4343_s4 + $0x24] ss:$8 sps:$4 sm:$0xff]  }
0x120c   :  { %1027 = vmatprep.subr.bf16.mxu0 %v3217_v4 }
0x120d   :  { %1028 = vmatpush1.bf16.msra.mxu0 %v3215_v60 }
0x120e   :  { %1029 = vmatprep.subr.bf16.mxu0 %v3220_v57 }
0x127a   :  { %v836_v8 = vpop.permute.xlu0 %835 }
0x127b   :  { %v838_v9 = vadd.f32 %v836_v8, %v828_v7 }
0x127d   :  { %3341 = vtanh.f32 %v838_v9  ;;  %v860_v54 = vpop.permute.xlu1 %859 }
0x127e   :  { %v862_v11 = vadd.f32 %v860_v54, %v852_v10  ;;  %v977_v54 = vpack.c.bf16 %v3750_v17, %v3771_v6  ;;  %v3888_v17 = vld [vmem:[%s4344_s5] ss:$8 sps:$4 sm:$0xff]  }
0x127f   :  { %v3221_v6 = vld [vmem:[%s4343_s4] ss:$8 sps:$4 sm:$0xff]  }
0x1280   :  { %3343 = vtanh.f32 %v862_v11 }
0x1287   :  { %v3342_v13 = vpop.eup %3341 }
0x1288   :  { %841 = vrot.lane.b32.xlu0 %v3342_v13, %s3523_s0  ;;  %v969_v13 = vpack.c.bf16 %v3809_v37, %v3789_v41  ;;  %v3226_v41 = vld [vmem:[%s4343_s4 + $0x14] ss:$8 sps:$4 sm:$0xff]  }
0x128a   :  { %v3344_v14 = vpop.eup %3343 }
0x128b   :  { %865 = vrot.lane.b32.xlu1 %v3344_v14, %s3523_s0  ;;  %v3882_v14 = vld [vmem:[%s4344_s5 + $0x4] ss:$8 sps:$4 sm:$0xff]  }
0x128c   :  { %1269 = vmatprep.subr.bf16.mxu1 %v3882_v14 }
0x12fa   :  { %v842_v43 = vpop.permute.xlu0 %841 }
0x12fb   :  { %v3826_v18 = vmul.f32 %v3338_v0, %v842_v43 }
0x12fd   :  { %v866_v15 = vpop.permute.xlu1 %865 }
0x12fe   :  { %v3828_v19 = vmul.f32 %v3340_v5, %v866_v15  ;;  %v978_v5 = vpack.c.bf16 %v3709_v39, %v3729_v30  ;;  %v3218_v39 = vld [vmem:[%s4343_s4 + $0x30] ss:$8 sps:$4 sm:$0xff]   ;;  %v3223_v30 = vld [vmem:[%s4343_s4 + $0x4] ss:$8 sps:$4 sm:$0xff]  }
0x12ff   :  { %1030 = vmatpush1.bf16.msra.mxu0 %v3218_v39 }
0x1300   :  { %v869_v23 = vpack.c.bf16 %v3828_v19, %v3826_v18  ;;  %1144 = vmatprep.subr.bf16.mxu0 %v3223_v30 }
0x1302   :  { %871 = vrot.lane.b32.xlu0 %v869_v23, %s3524_s3 }
0x1374   :  { %v872_v25 = vpop.permute.xlu0 %871 }
0x1375   :  { %2914 = vmatmul.mubr.msk.bf16.vlgmr.msra.gmra.mrb[20].mxu1 %vm186_vm1, %v872_v25 }
0x1376   :  { %1301 = vmatprep.mubr.bf16.mxu1 %v3521_v1  ;;  %1270 = vmatpush1.bf16.msra.mxu1 %v3888_v17 }
0x1448   :  { %v910_v26 = vpop.f32.mrb[20].mxu1 }
0x1449   :  { %v917_v27 = vadd.f32 %v910_v26, %v3700_v62  ;;  %v912_v50 = vpop.f32.mrb[21].mxu1 }
0x144a   :  { %v913_v31 = vpop.f32.mrb[22].mxu1 }
0x144b   :  { %3345 = vtanh.f32 %v917_v27  ;;  %v914_v33 = vpop.f32.mrb[23].mxu1  ;;  %v2915_v40 = vmul.f32 -1.442695, %v917_v27 }
0x144c   :  { %v918_v35 = vadd.f32 %v914_v33, %v3675_v29 }
0x144e   :  { %3347 = vtanh.f32 %v918_v35  ;;  %v2916_v45 = vmul.f32 -1.442695, %v918_v35  ;;  %v1217_v35 = vld [vmem:[%s4345_s6] sm:$0x3] }
0x144f   :  { %3349 = vpow2.f32 %v2915_v40 }
0x1450   :  { %3351 = vpow2.f32 %v2916_v45 }
0x1455   :  { %v3346_v47 = vpop.eup %3345 }
0x1456   :  { %928 = vrot.lane.b32.xlu0 %v3346_v47, %s3523_s0  ;;  %v1222_v47 = vrot.slane %v1217_v35, %v57_v24 }
0x1458   :  { %v3348_v36 = vpop.eup %3347 }
0x1459   :  { %952 = vrot.lane.b32.xlu1 %v3348_v36, %s3523_s0  ;;  %v3350_v42 = vpop.eup %3349  ;;  %v1226_v36 = vrot.slane %v1217_v35, %v61_v22 }
0x145a   :  { %v3352_v44 = vpop.eup %3351  ;;  %v922_v62 = vadd.f32 1.0, %v3350_v42 }
0x145b   :  { %v946_v46 = vadd.f32 1.0, %v3352_v44 }
0x145c   :  { %3353 = vrcp.f32 %v922_v62 }
0x145d   :  { %3355 = vrcp.f32 %v946_v46 }
0x1466   :  { %v3354_v52 = vpop.eup %3353 }
0x1467   :  { %v3356_v49 = vpop.eup %3355  ;;  %v926_v55 = vmul.f32 %v3354_v52, %v838_v9 }
0x1468   :  { %v950_v61 = vmul.f32 %v3356_v49, %v862_v11  ;;  %v967_v11 = vpack.c.bf16 %v3727_v28, %v3707_v38  ;;  %v3894_v38 = vld [vmem:[%s4344_s5 + $0x14] ss:$8 sps:$4 sm:$0xff]   ;;  %v3900_v28 = vld [vmem:[%s4344_s5 + $0x10] ss:$8 sps:$4 sm:$0xff]  }
0x1469   :  { %1271 = vmatprep.subr.bf16.mxu1 %v3894_v38 }
0x146a   :  { %1272 = vmatpush1.bf16.msra.mxu1 %v3900_v28 }
0x146b   :  { %1367 = vmatprep.subr.bf16.mxu1 %v3882_v14 }
0x146d   :  { %1302 = vmatmul.mubr.bf16.vlgmr.msra.gmra.mrb[24].mxu1 %v3522_v12  ;;  %v3224_v12 = vld [vmem:[%s4343_s4 + $0x10] ss:$8 sps:$4 sm:$0xff]  }
0x146e   :  { %1368 = vmatpush1.bf16.msra.mxu1 %v3888_v17  ;;  %1399 = vmatprep.mubr.bf16.mxu1 %v3521_v1 }
0x146f   :  { %1369 = vmatprep.subr.bf16.mxu1 %v3894_v38 }
0x1472   :  { %1370 = vmatpush1.bf16.msra.mxu1 %v3900_v28 }
0x1473   :  { %1465 = vmatprep.subr.bf16.mxu1 %v3882_v14 }
0x14c8   :  { %v929_v48 = vpop.permute.xlu0 %928 }
0x14c9   :  { %v931_v29 = vmul.f32 %v3354_v52, %v929_v48 }
0x14cb   :  { %933 = vrot.lane.b32.xlu0 %v931_v29, %s3524_s3  ;;  %v953_v51 = vpop.permute.xlu1 %952 }
0x14cc   :  { %v955_v53 = vmul.f32 %v3356_v49, %v953_v51 }
0x14ce   :  { %957 = vrot.lane.b32.xlu1 %v955_v53, %s3524_s3 }
0x153d   :  { %v934_v59 = vpop.permute.xlu0 %933 }
0x153e   :  { %v936_v56 = vadd.f32 %v934_v59, %v926_v55 }
0x1540   :  { %3357 = vtanh.f32 %v936_v56  ;;  %v958_v58 = vpop.permute.xlu1 %957  ;;  %v1303_v27 = vpop.f32.mrb[24].mxu1 }
0x1541   :  { %v960_v63 = vadd.f32 %v958_v58, %v950_v61  ;;  %v1305_v50 = vpop.f32.mrb[25].mxu1 }
0x1542   :  { %v1306_v31 = vpop.f32.mrb[26].mxu1 }
0x1543   :  { %3359 = vtanh.f32 %v960_v63  ;;  %v1307_v33 = vpop.f32.mrb[27].mxu1 }
0x154a   :  { %v3358_v0 = vpop.eup %3357 }
0x154b   :  { %939 = vrot.lane.b32.xlu0 %v3358_v0, %s3523_s0 }
0x154d   :  { %v3360_v3 = vpop.eup %3359 }
0x154e   :  { %963 = vrot.lane.b32.xlu1 %v3360_v3, %s3523_s0 }
0x154f   :  { %989 = vrot.lane.b32.xlu0 %v976_v34, %s3524_s3 }
0x1553   :  { %993 = vrot.lane.b32.xlu0 %v978_v5, %s3524_s3 }
0x1557   :  { %1106 = vrot.lane.b32.xlu0 %v968_v2, %s3524_s3 }
0x15bd   :  { %v940_v7 = vpop.permute.xlu0 %939 }
0x15be   :  { %v942_v8 = vmul.f32 %v3354_v52, %v940_v7 }
0x15c0   :  { %v970_v9 = vpack.c.bf16 %v942_v8, %v3826_v18  ;;  %v964_v16 = vpop.permute.xlu1 %963 }
0x15c1   :  { %v966_v32 = vmul.f32 %v3356_v49, %v964_v16  ;;  %v990_v43 = vpop.permute.xlu0 %989 }
0x15c2   :  { %1110 = vrot.lane.b32.xlu0 %v970_v9, %s3524_s3 }
0x15c3   :  { %v975_v10 = vpack.c.bf16 %v3828_v19, %v966_v32 }
0x15c5   :  { %987 = vrot.lane.b32.xlu1 %v975_v10, %s3524_s3  ;;  %v994_v18 = vpop.permute.xlu0 %993 }
0x15c9   :  { %991 = vrot.lane.b32.xlu1 %v977_v54, %s3524_s3  ;;  %v1107_v23 = vpop.permute.xlu0 %1106 }
0x15cd   :  { %1104 = vrot.lane.b32.xlu1 %v967_v11, %s3524_s3 }
0x15d1   :  { %1108 = vrot.lane.b32.xlu1 %v969_v13, %s3524_s3 }
0x1634   :  { %v1111_v26 = vpop.permute.xlu0 %1110 }
0x1637   :  { %v988_v37 = vpop.permute.xlu1 %987 }
0x1638   :  { %2921 = vmatmul.mubr.msk.bf16.vlgmr.msra.gmra.mrb[24].mxu0 %vm186_vm1, %v988_v37 }
0x1639   :  { %1145 = vmatpush1.bf16.msra.mxu0 %v3221_v6  ;;  %1069 = vmatprep.mubr.bf16.mxu0 %v3521_v1 }
0x163a   :  { %1146 = vmatprep.subr.bf16.mxu0 %v3226_v41 }
0x163b   :  { %v992_v15 = vpop.permute.xlu1 %991 }
0x163d   :  { %1147 = vmatpush1.bf16.msra.mxu0 %v3224_v12 }
0x163f   :  { %v1105_v19 = vpop.permute.xlu1 %1104 }
0x1640   :  { %2922 = vmatmul.mubr.msk.bf16.gmra.mrb[28].mxu0 %vm186_vm1, %v990_v43 }
0x1641   :  { %1079 = vmatprep.mubr.bf16.mxu0 %v3521_v1 }
0x1643   :  { %v1109_v25 = vpop.permute.xlu1 %1108 }
0x1648   :  { %2923 = vmatmul.mubr.msk.bf16.gmra.mrb[32].mxu0 %vm186_vm1, %v992_v15 }
0x1649   :  { %1089 = vmatprep.mubr.bf16.mxu0 %v3521_v1 }
0x1650   :  { %2924 = vmatmul.mubr.msk.bf16.gmra.mrb[36].mxu0 %vm186_vm1, %v994_v18 }
0x1651   :  { %1176 = vmatprep.mubr.bf16.mxu0 %v3521_v1 }
0x1658   :  { %2929 = vmatmul.mubr.msk.bf16.vlgmr.msra.gmra.mrb[24].mxu0 %vm186_vm1, %v1105_v19 }
0x1659   :  { %1186 = vmatprep.mubr.bf16.mxu0 %v3521_v1 }
0x1660   :  { %2930 = vmatmul.mubr.msk.bf16.gmra.mrb[28].mxu0 %vm186_vm1, %v1107_v23 }
0x1661   :  { %1196 = vmatprep.mubr.bf16.mxu0 %v3521_v1 }
0x1668   :  { %2931 = vmatmul.mubr.msk.bf16.gmra.mrb[32].mxu0 %vm186_vm1, %v1109_v25 }
0x1669   :  { %1206 = vmatprep.mubr.bf16.mxu0 %v3521_v1 }
0x1670   :  { %2932 = vmatmul.mubr.msk.bf16.gmra.mrb[36].mxu0 %vm186_vm1, %v1111_v26 }
0x172b   :  { %v1178_v40 = vpop.f32.mrb[24].mxu0 }
0x172c   :  { %v1229_v45 = vadd.f32 %v1222_v47, %v1178_v40  ;;  %v1180_v42 = vpop.f32.mrb[25].mxu0 }
0x172d   :  { %v3942_v44 = vadd.f32 %v1226_v36, %v1180_v42  ;;  %v1182_v62 = vpop.f32.mrb[26].mxu0 }
0x172e   :  { %v3944_v46 = vadd.f32 %v1222_v47, %v1182_v62  ;;  %v1310_v52 = vadd.f32 %v1303_v27, %v1229_v45  ;;  %v1184_v48 = vpop.f32.mrb[27].mxu0 }
0x172f   :  { %v3946_v29 = vadd.f32 %v1226_v36, %v1184_v48 }
0x1730   :  { %3361 = vtanh.f32 %v1310_v52  ;;  %v2937_v54 = vmul.f32 -1.442695, %v1310_v52 }
0x1733   :  { %v1188_v49 = vpop.f32.mrb[28].mxu0 }
0x1734   :  { %v3948_v51 = vadd.f32 %v1222_v47, %v1188_v49  ;;  %v1190_v24 = vpop.f32.mrb[29].mxu0 }
0x1735   :  { %v3950_v53 = vadd.f32 %v1226_v36, %v1190_v24  ;;  %v1192_v22 = vpop.f32.mrb[30].mxu0 }
0x1736   :  { %v3952_v55 = vadd.f32 %v1222_v47, %v1192_v22  ;;  %v1194_v59 = vpop.f32.mrb[31].mxu0 }
0x1737   :  { %v3954_v56 = vadd.f32 %v1226_v36, %v1194_v59 }
0x173a   :  { %v3362_v61 = vpop.eup %3361 }
0x173b   :  { %1321 = vrot.lane.b32.xlu1 %v3362_v61, %s3523_s0  ;;  %v1198_v58 = vpop.f32.mrb[32].mxu0 }
0x173c   :  { %v3957_v63 = vadd.f32 %v1222_v47, %v1198_v58  ;;  %v1200_v0 = vpop.f32.mrb[33].mxu0 }
0x173d   :  { %v3959_v3 = vadd.f32 %v1226_v36, %v1200_v0  ;;  %v1202_v34 = vpop.f32.mrb[34].mxu0 }
0x173e   :  { %v3961_v5 = vadd.f32 %v1222_v47, %v1202_v34  ;;  %v1204_v60 = vpop.f32.mrb[35].mxu0 }
0x173f   :  { %v3963_v4 = vadd.f32 %v1226_v36, %v1204_v60 }
0x1743   :  { %v1208_v57 = vpop.f32.mrb[36].mxu0 }
0x1744   :  { %v3965_v2 = vadd.f32 %v1222_v47, %v1208_v57  ;;  %v1210_v39 = vpop.f32.mrb[37].mxu0 }
0x1745   :  { %v1242_v30 = vadd.f32 %v1226_v36, %v1210_v39  ;;  %v1212_v7 = vpop.f32.mrb[38].mxu0 }
0x1746   :  { %v3967_v8 = vadd.f32 %v1222_v47, %v1212_v7  ;;  %v1214_v9 = vpop.f32.mrb[39].mxu0 }
0x1747   :  { %v1244_v16 = vadd.f32 %v1226_v36, %v1214_v9 }
0x1749   :  { %v1311_v32 = vadd.f32 %v1307_v33, %v1244_v16 }
0x174b   :  { %3363 = vtanh.f32 %v1311_v32  ;;  %v2938_v6 = vmul.f32 -1.442695, %v1311_v32 }
0x174c   :  { %3365 = vpow2.f32 %v2937_v54 }
0x1755   :  { %v3364_v10 = vpop.eup %3363 }
0x1756   :  { %1345 = vrot.lane.b32.xlu0 %v3364_v10, %s3523_s0  ;;  %v3366_v11 = vpop.eup %3365 }
0x1757   :  { %v1315_v13 = vadd.f32 1.0, %v3366_v11 }
0x1759   :  { %3367 = vrcp.f32 %v1315_v13 }
0x175a   :  { %3369 = vpow2.f32 %v2938_v6 }
0x1763   :  { %v3368_v41 = vpop.eup %3367 }
0x1764   :  { %v3370_v43 = vpop.eup %3369  ;;  %v1319_v25 = vmul.f32 0.0, %v3368_v41 }
0x1765   :  { %v1339_v15 = vadd.f32 1.0, %v3370_v43 }
0x1767   :  { %3371 = vrcp.f32 %v1339_v15 }
0x1771   :  { %v3372_v18 = vpop.eup %3371 }
0x1772   :  { %v1343_v31 = vmul.f32 0.0, %v3372_v18 }
0x17ad   :  { %v1322_v37 = vpop.permute.xlu1 %1321 }
0x17ae   :  { %v1324_v12 = vmul.f32 %v3368_v41, %v1322_v37 }
0x17b0   :  { %1326 = vrot.lane.b32.xlu1 %v1324_v12, %s3524_s3 }
0x17c8   :  { %v1346_v19 = vpop.permute.xlu0 %1345 }
0x17c9   :  { %v1348_v23 = vmul.f32 %v3372_v18, %v1346_v19 }
0x17cb   :  { %1350 = vrot.lane.b32.xlu0 %v1348_v23, %s3524_s3 }
0x1822   :  { %v1327_v26 = vpop.permute.xlu1 %1326 }
0x1823   :  { %v1329_v27 = vadd.f32 %v1327_v26, %v1319_v25 }
0x1825   :  { %3373 = vtanh.f32 %v1329_v27 }
0x182f   :  { %v3374_v50 = vpop.eup %3373 }
0x1830   :  { %1332 = vrot.lane.b32.xlu1 %v3374_v50, %s3523_s0 }
0x183d   :  { %v1351_v33 = vpop.permute.xlu0 %1350 }
0x183e   :  { %v1353_v35 = vadd.f32 %v1351_v33, %v1343_v31 }
0x1840   :  { %3375 = vtanh.f32 %v1353_v35 }
0x184a   :  { %v3376_v47 = vpop.eup %3375 }
0x184b   :  { %1356 = vrot.lane.b32.xlu0 %v3376_v47, %s3523_s0 }
0x18a2   :  { %v1333_v36 = vpop.permute.xlu1 %1332 }
0x18a3   :  { %v3974_v45 = vmul.f32 %v3368_v41, %v1333_v36 }
0x18bd   :  { %v1357_v40 = vpop.permute.xlu0 %1356 }
0x18be   :  { %v3976_v42 = vmul.f32 %v3372_v18, %v1357_v40 }
0x18c0   :  { %v1360_v62 = vpack.c.bf16 %v3976_v42, %v3974_v45 }
0x18c2   :  { %1362 = vrot.lane.b32.xlu1 %v1360_v62, %s3524_s3 }
0x1934   :  { %v1363_v52 = vpop.permute.xlu1 %1362 }
0x1935   :  { %2939 = vmatmul.mubr.msk.bf16.vlgmr.msra.gmra.mrb[28].mxu1 %vm186_vm1, %v1363_v52 }
0x1936   :  { %1466 = vmatpush1.bf16.msra.mxu1 %v3888_v17  ;;  %1497 = vmatprep.mubr.bf16.mxu1 %v3521_v1 }
0x1937   :  { %1467 = vmatprep.subr.bf16.mxu1 %v3894_v38 }
0x193a   :  { %1468 = vmatpush1.bf16.msra.mxu1 %v3900_v28 }
0x193b   :  { %1563 = vmatprep.subr.bf16.mxu1 %v3882_v14 }
0x1a08   :  { %v1401_v48 = vpop.f32.mrb[28].mxu1 }
0x1a09   :  { %v1408_v49 = vadd.f32 %v1401_v48, %v3944_v46  ;;  %v1403_v24 = vpop.f32.mrb[29].mxu1 }
0x1a0a   :  { %v1404_v22 = vpop.f32.mrb[30].mxu1 }
0x1a0b   :  { %3377 = vtanh.f32 %v1408_v49  ;;  %v1405_v59 = vpop.f32.mrb[31].mxu1  ;;  %v2940_v34 = vmul.f32 -1.442695, %v1408_v49 }
0x1a0c   :  { %v1409_v61 = vadd.f32 %v1405_v59, %v1242_v30 }
0x1a0e   :  { %3379 = vtanh.f32 %v1409_v61  ;;  %v2941_v60 = vmul.f32 -1.442695, %v1409_v61 }
0x1a0f   :  { %3381 = vpow2.f32 %v2940_v34 }
0x1a10   :  { %3383 = vpow2.f32 %v2941_v60 }
0x1a15   :  { %v3378_v58 = vpop.eup %3377 }
0x1a16   :  { %1419 = vrot.lane.b32.xlu0 %v3378_v58, %s3523_s0 }
0x1a18   :  { %v3380_v0 = vpop.eup %3379 }
0x1a19   :  { %1443 = vrot.lane.b32.xlu1 %v3380_v0, %s3523_s0  ;;  %v3382_v57 = vpop.eup %3381 }
0x1a1a   :  { %v3384_v39 = vpop.eup %3383  ;;  %v1413_v7 = vadd.f32 1.0, %v3382_v57 }
0x1a1b   :  { %v1437_v46 = vadd.f32 1.0, %v3384_v39 }
0x1a1c   :  { %3385 = vrcp.f32 %v1413_v7 }
0x1a1d   :  { %3387 = vrcp.f32 %v1437_v46 }
0x1a26   :  { %v3386_v9 = vpop.eup %3385 }
0x1a27   :  { %v3388_v32 = vpop.eup %3387  ;;  %v1417_v11 = vmul.f32 %v3386_v9, %v1329_v27 }
0x1a28   :  { %v1441_v41 = vmul.f32 %v3388_v32, %v1353_v35 }
0x1a88   :  { %v1420_v16 = vpop.permute.xlu0 %1419 }
0x1a89   :  { %v1422_v30 = vmul.f32 %v3386_v9, %v1420_v16 }
0x1a8b   :  { %1424 = vrot.lane.b32.xlu0 %v1422_v30, %s3524_s3  ;;  %v1444_v10 = vpop.permute.xlu1 %1443 }
0x1a8c   :  { %v1446_v54 = vmul.f32 %v3388_v32, %v1444_v10 }
0x1a8e   :  { %1448 = vrot.lane.b32.xlu1 %v1446_v54, %s3524_s3 }
0x1afd   :  { %v1425_v13 = vpop.permute.xlu0 %1424 }
0x1afe   :  { %v1427_v6 = vadd.f32 %v1425_v13, %v1417_v11 }
0x1b00   :  { %3389 = vtanh.f32 %v1427_v6  ;;  %v1449_v37 = vpop.permute.xlu1 %1448 }
0x1b01   :  { %v1451_v12 = vadd.f32 %v1449_v37, %v1441_v41 }
0x1b03   :  { %3391 = vtanh.f32 %v1451_v12 }
0x1b0a   :  { %v3390_v43 = vpop.eup %3389 }
0x1b0b   :  { %1430 = vrot.lane.b32.xlu0 %v3390_v43, %s3523_s0 }
0x1b0d   :  { %v3392_v15 = vpop.eup %3391 }
0x1b0e   :  { %1454 = vrot.lane.b32.xlu1 %v3392_v15, %s3523_s0 }
0x1b7d   :  { %v1431_v18 = vpop.permute.xlu0 %1430 }
0x1b7e   :  { %v3994_v23 = vmul.f32 %v3386_v9, %v1431_v18 }
0x1b80   :  { %v1455_v19 = vpop.permute.xlu1 %1454 }
0x1b81   :  { %v3996_v25 = vmul.f32 %v3388_v32, %v1455_v19 }
0x1b83   :  { %v1458_v26 = vpack.c.bf16 %v3996_v25, %v3994_v23 }
0x1b85   :  { %1460 = vrot.lane.b32.xlu0 %v1458_v26, %s3524_s3 }
0x1bf7   :  { %v1461_v27 = vpop.permute.xlu0 %1460 }
0x1bf8   :  { %2942 = vmatmul.mubr.msk.bf16.vlgmr.msra.gmra.mrb[32].mxu1 %vm186_vm1, %v1461_v27 }
0x1bf9   :  { %1564 = vmatpush1.bf16.msra.mxu1 %v3888_v17  ;;  %1595 = vmatprep.mubr.bf16.mxu1 %v3521_v1 }
0x1bfa   :  { %1565 = vmatprep.subr.bf16.mxu1 %v3894_v38 }
0x1bfd   :  { %1566 = vmatpush1.bf16.msra.mxu1 %v3900_v28 }
0x1bfe   :  { %1661 = vmatprep.subr.bf16.mxu1 %v3882_v14 }
0x1ccb   :  { %v1499_v50 = vpop.f32.mrb[32].mxu1 }
0x1ccc   :  { %v1506_v31 = vadd.f32 %v1499_v50, %v3948_v51  ;;  %v1501_v33 = vpop.f32.mrb[33].mxu1 }
0x1ccd   :  { %v1502_v35 = vpop.f32.mrb[34].mxu1 }
0x1cce   :  { %3393 = vtanh.f32 %v1506_v31  ;;  %v1503_v47 = vpop.f32.mrb[35].mxu1  ;;  %v2943_v52 = vmul.f32 -1.442695, %v1506_v31 }
0x1ccf   :  { %v1507_v36 = vadd.f32 %v1503_v47, %v3963_v4 }
0x1cd1   :  { %3395 = vtanh.f32 %v1507_v36  ;;  %v2944_v48 = vmul.f32 -1.442695, %v1507_v36 }
0x1cd2   :  { %3397 = vpow2.f32 %v2943_v52 }
0x1cd3   :  { %3399 = vpow2.f32 %v2944_v48 }
0x1cd8   :  { %v3394_v40 = vpop.eup %3393 }
0x1cd9   :  { %1517 = vrot.lane.b32.xlu1 %v3394_v40, %s3523_s0 }
0x1cdb   :  { %v3396_v62 = vpop.eup %3395 }
0x1cdc   :  { %1541 = vrot.lane.b32.xlu0 %v3396_v62, %s3523_s0  ;;  %v3398_v49 = vpop.eup %3397 }
0x1cdd   :  { %v3400_v24 = vpop.eup %3399  ;;  %v1511_v51 = vadd.f32 1.0, %v3398_v49 }
0x1cde   :  { %v1535_v22 = vadd.f32 1.0, %v3400_v24 }
0x1cdf   :  { %3401 = vrcp.f32 %v1511_v51 }
0x1ce0   :  { %3403 = vrcp.f32 %v1535_v22 }
0x1ce9   :  { %v3402_v59 = vpop.eup %3401 }
0x1cea   :  { %v3404_v58 = vpop.eup %3403  ;;  %v1515_v60 = vmul.f32 %v3402_v59, %v1427_v6 }
0x1ceb   :  { %v1539_v7 = vmul.f32 %v3404_v58, %v1451_v12 }
0x1d4b   :  { %v1518_v61 = vpop.permute.xlu1 %1517 }
0x1d4c   :  { %v1520_v4 = vmul.f32 %v3402_v59, %v1518_v61 }
0x1d4e   :  { %1522 = vrot.lane.b32.xlu1 %v1520_v4, %s3524_s3  ;;  %v1542_v0 = vpop.permute.xlu0 %1541 }
0x1d4f   :  { %v1544_v34 = vmul.f32 %v3404_v58, %v1542_v0 }
0x1d51   :  { %1546 = vrot.lane.b32.xlu0 %v1544_v34, %s3524_s3 }
0x1dc0   :  { %v1523_v57 = vpop.permute.xlu1 %1522 }
0x1dc1   :  { %v1525_v39 = vadd.f32 %v1523_v57, %v1515_v60 }
0x1dc3   :  { %3405 = vtanh.f32 %v1525_v39  ;;  %v1547_v46 = vpop.permute.xlu0 %1546 }
0x1dc4   :  { %v1549_v9 = vadd.f32 %v1547_v46, %v1539_v7 }
0x1dc6   :  { %3407 = vtanh.f32 %v1549_v9 }
0x1dcd   :  { %v3406_v16 = vpop.eup %3405 }
0x1dce   :  { %1528 = vrot.lane.b32.xlu1 %v3406_v16, %s3523_s0 }
0x1dd0   :  { %v3408_v30 = vpop.eup %3407 }
0x1dd1   :  { %1552 = vrot.lane.b32.xlu0 %v3408_v30, %s3523_s0 }
0x1e40   :  { %v1529_v32 = vpop.permute.xlu1 %1528 }
0x1e41   :  { %v4015_v54 = vmul.f32 %v3402_v59, %v1529_v32 }
0x1e43   :  { %v1553_v10 = vpop.permute.xlu0 %1552 }
0x1e44   :  { %v4017_v11 = vmul.f32 %v3404_v58, %v1553_v10 }
0x1e46   :  { %v1556_v13 = vpack.c.bf16 %v4017_v11, %v4015_v54 }
0x1e48   :  { %1558 = vrot.lane.b32.xlu1 %v1556_v13, %s3524_s3 }
0x1eba   :  { %v1559_v6 = vpop.permute.xlu1 %1558 }
0x1ebb   :  { %2945 = vmatmul.mubr.msk.bf16.vlgmr.msra.gmra.mrb[36].mxu1 %vm186_vm1, %v1559_v6 }
0x1ebc   :  { %1662 = vmatpush1.bf16.msra.mxu1 %v3888_v17  ;;  %1693 = vmatprep.mubr.bf16.mxu1 %v3521_v1 }
0x1ebd   :  { %1663 = vmatprep.subr.bf16.mxu1 %v3894_v38 }
0x1ec0   :  { %1664 = vmatpush1.bf16.msra.mxu1 %v3900_v28 }
0x1ec1   :  { %1759 = vmatprep.subr.bf16.mxu1 %v3882_v14 }
0x1f8e   :  { %v1597_v41 = vpop.f32.mrb[36].mxu1 }
0x1f8f   :  { %v1604_v37 = vadd.f32 %v1597_v41, %v3952_v55  ;;  %v1599_v12 = vpop.f32.mrb[37].mxu1 }
0x1f90   :  { %v1600_v43 = vpop.f32.mrb[38].mxu1 }
0x1f91   :  { %3409 = vtanh.f32 %v1604_v37  ;;  %v1601_v15 = vpop.f32.mrb[39].mxu1  ;;  %v2946_v27 = vmul.f32 -1.442695, %v1604_v37 }
0x1f92   :  { %v1605_v18 = vadd.f32 %v1601_v15, %v3959_v3 }
0x1f94   :  { %3411 = vtanh.f32 %v1605_v18  ;;  %v2947_v50 = vmul.f32 -1.442695, %v1605_v18 }
0x1f95   :  { %3413 = vpow2.f32 %v2946_v27 }
0x1f96   :  { %3415 = vpow2.f32 %v2947_v50 }
0x1f9b   :  { %v3410_v19 = vpop.eup %3409 }
0x1f9c   :  { %1615 = vrot.lane.b32.xlu0 %v3410_v19, %s3523_s0 }
0x1f9e   :  { %v3412_v26 = vpop.eup %3411 }
0x1f9f   :  { %1639 = vrot.lane.b32.xlu1 %v3412_v26, %s3523_s0  ;;  %v3414_v31 = vpop.eup %3413 }
0x1fa0   :  { %v3416_v33 = vpop.eup %3415  ;;  %v1609_v55 = vadd.f32 1.0, %v3414_v31 }
0x1fa1   :  { %v1633_v35 = vadd.f32 1.0, %v3416_v33 }
0x1fa2   :  { %3417 = vrcp.f32 %v1609_v55 }
0x1fa3   :  { %3419 = vrcp.f32 %v1633_v35 }
0x1fac   :  { %v3418_v47 = vpop.eup %3417 }
0x1fad   :  { %v3420_v40 = vpop.eup %3419  ;;  %v1613_v48 = vmul.f32 %v3418_v47, %v1525_v39 }
0x1fae   :  { %v1637_v51 = vmul.f32 %v3420_v40, %v1549_v9 }
0x200e   :  { %v1616_v36 = vpop.permute.xlu0 %1615 }
0x200f   :  { %v1618_v3 = vmul.f32 %v3418_v47, %v1616_v36 }
0x2011   :  { %1620 = vrot.lane.b32.xlu0 %v1618_v3, %s3524_s3  ;;  %v1640_v62 = vpop.permute.xlu1 %1639 }
0x2012   :  { %v1642_v52 = vmul.f32 %v3420_v40, %v1640_v62 }
0x2014   :  { %1644 = vrot.lane.b32.xlu1 %v1642_v52, %s3524_s3 }
0x2083   :  { %v1621_v49 = vpop.permute.xlu0 %1620 }
0x2084   :  { %v1623_v24 = vadd.f32 %v1621_v49, %v1613_v48 }
0x2086   :  { %3421 = vtanh.f32 %v1623_v24  ;;  %v1645_v22 = vpop.permute.xlu1 %1644 }
0x2087   :  { %v1647_v59 = vadd.f32 %v1645_v22, %v1637_v51 }
0x2089   :  { %3423 = vtanh.f32 %v1647_v59 }
0x2090   :  { %v3422_v61 = vpop.eup %3421 }
0x2091   :  { %1626 = vrot.lane.b32.xlu0 %v3422_v61, %s3523_s0 }
0x2093   :  { %v3424_v4 = vpop.eup %3423 }
0x2094   :  { %1650 = vrot.lane.b32.xlu1 %v3424_v4, %s3523_s0 }
0x2103   :  { %v1627_v58 = vpop.permute.xlu0 %1626 }
0x2104   :  { %v4036_v34 = vmul.f32 %v3418_v47, %v1627_v58 }
0x2106   :  { %v1651_v0 = vpop.permute.xlu1 %1650 }
0x2107   :  { %v4038_v60 = vmul.f32 %v3420_v40, %v1651_v0 }
0x2109   :  { %v1654_v57 = vpack.c.bf16 %v4038_v60, %v4036_v34 }
0x210b   :  { %1656 = vrot.lane.b32.xlu0 %v1654_v57, %s3524_s3 }
0x217d   :  { %v1657_v39 = vpop.permute.xlu0 %1656 }
0x217e   :  { %2948 = vmatmul.mubr.msk.bf16.vlgmr.msra.gmra.mrb[40].mxu1 %vm186_vm1, %v1657_v39 }
0x217f   :  { %1760 = vmatpush1.bf16.msra.mxu1 %v3888_v17  ;;  %1791 = vmatprep.mubr.bf16.mxu1 %v3521_v1 }
0x2180   :  { %1761 = vmatprep.subr.bf16.mxu1 %v3894_v38 }
0x2183   :  { %1762 = vmatpush1.bf16.msra.mxu1 %v3900_v28 }
0x2184   :  { %1857 = vmatprep.subr.bf16.mxu1 %v3882_v14 }
0x2251   :  { %v1695_v7 = vpop.f32.mrb[40].mxu1 }
0x2252   :  { %v1702_v46 = vadd.f32 %v1695_v7, %v3957_v63  ;;  %v1697_v9 = vpop.f32.mrb[41].mxu1 }
0x2253   :  { %v1698_v16 = vpop.f32.mrb[42].mxu1 }
0x2254   :  { %3425 = vtanh.f32 %v1702_v46  ;;  %v1699_v30 = vpop.f32.mrb[43].mxu1  ;;  %v2949_v6 = vmul.f32 -1.442695, %v1702_v46 }
0x2255   :  { %v1703_v32 = vadd.f32 %v1699_v30, %v3954_v56 }
0x2257   :  { %3427 = vtanh.f32 %v1703_v32  ;;  %v2950_v41 = vmul.f32 -1.442695, %v1703_v32 }
0x2258   :  { %3429 = vpow2.f32 %v2949_v6 }
0x2259   :  { %3431 = vpow2.f32 %v2950_v41 }
0x225e   :  { %v3426_v10 = vpop.eup %3425 }
0x225f   :  { %1713 = vrot.lane.b32.xlu1 %v3426_v10, %s3523_s0 }
0x2261   :  { %v3428_v13 = vpop.eup %3427 }
0x2262   :  { %1737 = vrot.lane.b32.xlu0 %v3428_v13, %s3523_s0  ;;  %v3430_v37 = vpop.eup %3429 }
0x2263   :  { %v3432_v12 = vpop.eup %3431  ;;  %v1707_v63 = vadd.f32 1.0, %v3430_v37 }
0x2264   :  { %v1731_v43 = vadd.f32 1.0, %v3432_v12 }
0x2265   :  { %3433 = vrcp.f32 %v1707_v63 }
0x2266   :  { %3435 = vrcp.f32 %v1731_v43 }
0x226f   :  { %v3434_v15 = vpop.eup %3433 }
0x2270   :  { %v3436_v19 = vpop.eup %3435  ;;  %v1711_v50 = vmul.f32 %v3434_v15, %v1623_v24 }
0x2271   :  { %v1735_v55 = vmul.f32 %v3436_v19, %v1647_v59 }
0x22d1   :  { %v1714_v18 = vpop.permute.xlu1 %1713 }
0x22d2   :  { %v1716_v56 = vmul.f32 %v3434_v15, %v1714_v18 }
0x22d4   :  { %1718 = vrot.lane.b32.xlu1 %v1716_v56, %s3524_s3  ;;  %v1738_v26 = vpop.permute.xlu0 %1737 }
0x22d5   :  { %v1740_v27 = vmul.f32 %v3436_v19, %v1738_v26 }
0x22d7   :  { %1742 = vrot.lane.b32.xlu0 %v1740_v27, %s3524_s3 }
0x2346   :  { %v1719_v31 = vpop.permute.xlu1 %1718 }
0x2347   :  { %v1721_v33 = vadd.f32 %v1719_v31, %v1711_v50 }
0x2349   :  { %3437 = vtanh.f32 %v1721_v33  ;;  %v1743_v35 = vpop.permute.xlu0 %1742 }
0x234a   :  { %v1745_v47 = vadd.f32 %v1743_v35, %v1735_v55 }
0x234c   :  { %3439 = vtanh.f32 %v1745_v47 }
0x2353   :  { %v3438_v36 = vpop.eup %3437 }
0x2354   :  { %1724 = vrot.lane.b32.xlu1 %v3438_v36, %s3523_s0 }
0x2356   :  { %v3440_v3 = vpop.eup %3439 }
0x2357   :  { %1748 = vrot.lane.b32.xlu0 %v3440_v3, %s3523_s0 }
0x23c6   :  { %v1725_v40 = vpop.permute.xlu1 %1724 }
0x23c7   :  { %v4057_v52 = vmul.f32 %v3434_v15, %v1725_v40 }
0x23c9   :  { %v1749_v62 = vpop.permute.xlu0 %1748 }
0x23ca   :  { %v4059_v48 = vmul.f32 %v3436_v19, %v1749_v62 }
0x23cc   :  { %v1752_v49 = vpack.c.bf16 %v4059_v48, %v4057_v52 }
0x23ce   :  { %1754 = vrot.lane.b32.xlu1 %v1752_v49, %s3524_s3 }
0x2440   :  { %v1755_v24 = vpop.permute.xlu1 %1754 }
0x2441   :  { %2951 = vmatmul.mubr.msk.bf16.vlgmr.msra.gmra.mrb[44].mxu1 %vm186_vm1, %v1755_v24 }
0x2442   :  { %1858 = vmatpush1.bf16.msra.mxu1 %v3888_v17  ;;  %1889 = vmatprep.mubr.bf16.mxu1 %v3521_v1 }
0x2443   :  { %1859 = vmatprep.subr.bf16.mxu1 %v3894_v38 }
0x2446   :  { %1860 = vmatpush1.bf16.msra.mxu1 %v3900_v28 }
0x2447   :  { %1955 = vmatprep.subr.bf16.mxu1 %v3882_v14 }
0x2514   :  { %v1793_v51 = vpop.f32.mrb[44].mxu1 }
0x2515   :  { %v1800_v22 = vadd.f32 %v1793_v51, %v3961_v5  ;;  %v1795_v59 = vpop.f32.mrb[45].mxu1 }
0x2516   :  { %v1796_v61 = vpop.f32.mrb[46].mxu1 }
0x2517   :  { %3441 = vtanh.f32 %v1800_v22  ;;  %v1797_v4 = vpop.f32.mrb[47].mxu1  ;;  %v2952_v39 = vmul.f32 -1.442695, %v1800_v22 }
0x2518   :  { %v1801_v58 = vadd.f32 %v1797_v4, %v3950_v53 }
0x251a   :  { %3443 = vtanh.f32 %v1801_v58  ;;  %v2953_v7 = vmul.f32 -1.442695, %v1801_v58 }
0x251b   :  { %3445 = vpow2.f32 %v2952_v39 }
0x251c   :  { %3447 = vpow2.f32 %v2953_v7 }
0x2521   :  { %v3442_v0 = vpop.eup %3441 }
0x2522   :  { %1811 = vrot.lane.b32.xlu0 %v3442_v0, %s3523_s0 }
0x2524   :  { %v3444_v57 = vpop.eup %3443 }
0x2525   :  { %1835 = vrot.lane.b32.xlu1 %v3444_v57, %s3523_s0  ;;  %v3446_v14 = vpop.eup %3445 }
0x2526   :  { %v3448_v46 = vpop.eup %3447  ;;  %v1805_v5 = vadd.f32 1.0, %v3446_v14 }
0x2527   :  { %v1829_v9 = vadd.f32 1.0, %v3448_v46 }
0x2528   :  { %3449 = vrcp.f32 %v1805_v5 }
0x2529   :  { %3451 = vrcp.f32 %v1829_v9 }
0x2532   :  { %v3450_v16 = vpop.eup %3449 }
0x2533   :  { %v3452_v32 = vpop.eup %3451  ;;  %v1809_v6 = vmul.f32 %v3450_v16, %v1721_v33 }
0x2534   :  { %v1833_v12 = vmul.f32 %v3452_v32, %v1745_v47 }
0x2594   :  { %v1812_v30 = vpop.permute.xlu0 %1811 }
0x2595   :  { %v1814_v53 = vmul.f32 %v3450_v16, %v1812_v30 }
0x2597   :  { %1816 = vrot.lane.b32.xlu0 %v1814_v53, %s3524_s3  ;;  %v1836_v10 = vpop.permute.xlu1 %1835 }
0x2598   :  { %v1838_v13 = vmul.f32 %v3452_v32, %v1836_v10 }
0x259a   :  { %1840 = vrot.lane.b32.xlu1 %v1838_v13, %s3524_s3 }
0x2609   :  { %v1817_v41 = vpop.permute.xlu0 %1816 }
0x260a   :  { %v1819_v37 = vadd.f32 %v1817_v41, %v1809_v6 }
0x260c   :  { %3453 = vtanh.f32 %v1819_v37  ;;  %v1841_v63 = vpop.permute.xlu1 %1840 }
0x260d   :  { %v1843_v43 = vadd.f32 %v1841_v63, %v1833_v12 }
0x260f   :  { %3455 = vtanh.f32 %v1843_v43 }
0x2616   :  { %v3454_v15 = vpop.eup %3453 }
0x2617   :  { %1822 = vrot.lane.b32.xlu0 %v3454_v15, %s3523_s0 }
0x2619   :  { %v3456_v18 = vpop.eup %3455 }
0x261a   :  { %1846 = vrot.lane.b32.xlu1 %v3456_v18, %s3523_s0 }
0x2689   :  { %v1823_v56 = vpop.permute.xlu0 %1822 }
0x268a   :  { %v4078_v26 = vmul.f32 %v3450_v16, %v1823_v56 }
0x268c   :  { %v1847_v19 = vpop.permute.xlu1 %1846 }
0x268d   :  { %v4080_v27 = vmul.f32 %v3452_v32, %v1847_v19 }
0x268f   :  { %v1850_v50 = vpack.c.bf16 %v4080_v27, %v4078_v26 }
0x2691   :  { %1852 = vrot.lane.b32.xlu0 %v1850_v50, %s3524_s3 }
0x2703   :  { %v1853_v31 = vpop.permute.xlu0 %1852 }
0x2704   :  { %2954 = vmatmul.mubr.msk.bf16.vlgmr.msra.gmra.mrb[48].mxu1 %vm186_vm1, %v1853_v31 }
0x2705   :  { %1956 = vmatpush1.bf16.msra.mxu1 %v3888_v17  ;;  %1987 = vmatprep.mubr.bf16.mxu1 %v3521_v1 }
0x2706   :  { %1957 = vmatprep.subr.bf16.mxu1 %v3894_v38 }
0x2709   :  { %1958 = vmatpush1.bf16.msra.mxu1 %v3900_v28 }
0x27d7   :  { %v1891_v33 = vpop.f32.mrb[48].mxu1 }
0x27d8   :  { %v1898_v55 = vadd.f32 %v1891_v33, %v3965_v2  ;;  %v1893_v35 = vpop.f32.mrb[49].mxu1 }
0x27d9   :  { %v1894_v47 = vpop.f32.mrb[50].mxu1 }
0x27da   :  { %3457 = vtanh.f32 %v1898_v55  ;;  %v1895_v36 = vpop.f32.mrb[51].mxu1  ;;  %v2955_v62 = vmul.f32 -1.442695, %v1898_v55 }
0x27db   :  { %v1899_v3 = vadd.f32 %v1895_v36, %v3946_v29 }
0x27dd   :  { %3459 = vtanh.f32 %v1899_v3  ;;  %v2956_v38 = vmul.f32 -1.442695, %v1899_v3 }
0x27de   :  { %3461 = vpow2.f32 %v2955_v62 }
0x27df   :  { %3463 = vpow2.f32 %v2956_v38 }
0x27e4   :  { %v3458_v40 = vpop.eup %3457 }
0x27e5   :  { %1909 = vrot.lane.b32.xlu1 %v3458_v40, %s3523_s0 }
0x27e7   :  { %v3460_v17 = vpop.eup %3459 }
0x27e8   :  { %1933 = vrot.lane.b32.xlu0 %v3460_v17, %s3523_s0  ;;  %v3462_v28 = vpop.eup %3461 }
0x27e9   :  { %v3464_v49 = vpop.eup %3463  ;;  %v1903_v2 = vadd.f32 1.0, %v3462_v28 }
0x27ea   :  { %v1927_v24 = vadd.f32 1.0, %v3464_v49 }
0x27eb   :  { %3465 = vrcp.f32 %v1903_v2 }
0x27ec   :  { %3467 = vrcp.f32 %v1927_v24  ;;  %v2363_v24 = vld [vmem:[%s4346_s9 + $0x20] sm:$0xff] }
0x27f5   :  { %v3466_v51 = vpop.eup %3465 }
0x27f6   :  { %v3468_v59 = vpop.eup %3467  ;;  %v1907_v58 = vmul.f32 %v3466_v51, %v1819_v37 }
0x27f7   :  { %v1931_v39 = vmul.f32 %v3468_v59, %v1843_v43 }
0x2857   :  { %v1910_v22 = vpop.permute.xlu1 %1909 }
0x2858   :  { %v1912_v29 = vmul.f32 %v3466_v51, %v1910_v22 }
0x285a   :  { %1914 = vrot.lane.b32.xlu1 %v1912_v29, %s3524_s3  ;;  %v1934_v61 = vpop.permute.xlu0 %1933 }
0x285b   :  { %v1936_v4 = vmul.f32 %v3468_v59, %v1934_v61  ;;  %v2052_v61 = vld [vmem:[%s4347_s7 + $0x30] sm:$0xff] }
0x285d   :  { %1938 = vrot.lane.b32.xlu0 %v1936_v4, %s3524_s3  ;;  %v2053_v4 = vld [vmem:[%s4347_s7 + $0x38] sm:$0xff] }
0x28cc   :  { %v1915_v0 = vpop.permute.xlu1 %1914 }
0x28cd   :  { %v1917_v57 = vadd.f32 %v1915_v0, %v1907_v58  ;;  %v3126_v58 = vpack.c.bf16 %v2053_v4, %v2052_v61  ;;  %v2993_v4 = vld [vmem:[%s4349_s10] ss:$0 sm:$0xff] }
0x28cf   :  { %3469 = vtanh.f32 %v1917_v57  ;;  %v1939_v7 = vpop.permute.xlu0 %1938 }
0x28d0   :  { %v1941_v14 = vadd.f32 %v1939_v7, %v1931_v39  ;;  %v2047_v39 = vld [vmem:[%s4347_s7 + $0x8] sm:$0xff] }
0x28d2   :  { %3471 = vtanh.f32 %v1941_v14 }
0x28d9   :  { %v3470_v46 = vpop.eup %3469 }
0x28da   :  { %1920 = vrot.lane.b32.xlu1 %v3470_v46, %s3523_s0 }
0x28dc   :  { %v3472_v5 = vpop.eup %3471 }
0x28dd   :  { %1944 = vrot.lane.b32.xlu0 %v3472_v5, %s3523_s0 }
0x294c   :  { %v1921_v9 = vpop.permute.xlu1 %1920 }
0x294d   :  { %v4098_v30 = vmul.f32 %v3466_v51, %v1921_v9  ;;  %v2364_v51 = vld [vmem:[%s4346_s9 + $0x28] sm:$0xff] }
0x294e   :  { %v3138_v22 = vpack.c.bf16 %v2364_v51, %v2363_v24  ;;  %v2976_v24 = vld [vmem:[%s4348_s8] ss:$0 sm:$0xff] }
0x294f   :  { %v1945_v16 = vpop.permute.xlu0 %1944 }
0x2950   :  { %v1947_v53 = vmul.f32 %v3468_v59, %v1945_v16  ;;  %3139 = vmatprep.subr.bf16.mxu1 %v3138_v22  ;;  %v3525_v16 = vmov 1  }
0x2951   :  { %3192 = vset.pattern.permute.xlu0 %v3525_v16 }
0x2952   :  { %v1948_v32 = vpack.c.bf16 %v1947_v53, %v4098_v30 }
0x2954   :  { %1950 = vrot.lane.b32.xlu1 %v1948_v32, %s3524_s3 }
0x29c6   :  { %v1951_v10 = vpop.permute.xlu1 %1950 }
0x29c7   :  { %2957 = vmatmul.mubr.msk.bf16.vlgmr.msra.gmra.mrb[52].mxu1 %vm186_vm1, %v1951_v10 }
0x29c8   :  { %3141 = vmatpush3.bf16.msra.mxu1 %v3138_v22 }
0x2a9a   :  { %v1989_v13 = vpop.f32.mrb[52].mxu1 }
0x2a9b   :  { %v1996_v6 = vadd.f32 %v1989_v13, %v3967_v8  ;;  %v1991_v41 = vpop.f32.mrb[53].mxu1 }
0x2a9c   :  { %v1992_v37 = vpop.f32.mrb[54].mxu1 }
0x2a9d   :  { %3473 = vtanh.f32 %v1996_v6  ;;  %v1993_v12 = vpop.f32.mrb[55].mxu1  ;;  %v2958_v18 = vmul.f32 -1.442695, %v1996_v6 }
0x2a9e   :  { %v1997_v63 = vadd.f32 %v1993_v12, %v3942_v44 }
0x2aa0   :  { %3475 = vtanh.f32 %v1997_v63  ;;  %v2959_v56 = vmul.f32 -1.442695, %v1997_v63 }
0x2aa1   :  { %3477 = vpow2.f32 %v2958_v18 }
0x2aa2   :  { %3479 = vpow2.f32 %v2959_v56 }
0x2aa7   :  { %v3474_v43 = vpop.eup %3473 }
0x2aa8   :  { %2007 = vrot.lane.b32.xlu1 %v3474_v43, %s3523_s0 }
0x2aaa   :  { %v3476_v15 = vpop.eup %3475 }
0x2aab   :  { %2031 = vrot.lane.b32.xlu0 %v3476_v15, %s3523_s0  ;;  %v3478_v19 = vpop.eup %3477 }
0x2aac   :  { %v3480_v50 = vpop.eup %3479  ;;  %v2001_v8 = vadd.f32 1.0, %v3478_v19 }
0x2aad   :  { %v2025_v31 = vadd.f32 1.0, %v3480_v50 }
0x2aae   :  { %3481 = vrcp.f32 %v2001_v8 }
0x2aaf   :  { %3483 = vrcp.f32 %v2025_v31 }
0x2ab8   :  { %v3482_v33 = vpop.eup %3481 }
0x2ab9   :  { %v3484_v35 = vpop.eup %3483  ;;  %v2005_v3 = vmul.f32 %v3482_v33, %v1917_v57  ;;  %v2046_v57 = vld [vmem:[%s4347_s7] sm:$0xff] }
0x2aba   :  { %v2029_v62 = vmul.f32 %v3484_v35, %v1941_v14  ;;  %v3130_v14 = vpack.c.bf16 %v2047_v39, %v2046_v57 }
0x2b1a   :  { %v2008_v55 = vpop.permute.xlu1 %2007 }
0x2b1b   :  { %v2010_v44 = vmul.f32 %v3482_v33, %v2008_v55 }
0x2b1d   :  { %2012 = vrot.lane.b32.xlu1 %v2010_v44, %s3524_s3  ;;  %v2032_v47 = vpop.permute.xlu0 %2031 }
0x2b1e   :  { %v2034_v36 = vmul.f32 %v3484_v35, %v2032_v47 }
0x2b20   :  { %2036 = vrot.lane.b32.xlu0 %v2034_v36, %s3524_s3 }
0x2b8f   :  { %v2013_v40 = vpop.permute.xlu1 %2012 }
0x2b90   :  { %v2015_v17 = vadd.f32 %v2013_v40, %v2005_v3 }
0x2b92   :  { %3485 = vtanh.f32 %v2015_v17  ;;  %v2037_v38 = vpop.permute.xlu0 %2036 }
0x2b93   :  { %v2039_v28 = vadd.f32 %v2037_v38, %v2029_v62 }
0x2b95   :  { %3487 = vtanh.f32 %v2039_v28 }
0x2b9c   :  { %v3486_v49 = vpop.eup %3485 }
0x2b9d   :  { %2018 = vrot.lane.b32.xlu1 %v3486_v49, %s3523_s0 }
0x2b9f   :  { %v3488_v2 = vpop.eup %3487 }
0x2ba0   :  { %2042 = vrot.lane.b32.xlu0 %v3488_v2, %s3523_s0 }
0x2ba1   :  { %2064 = vrot.lane.b32.xlu1 %v1947_v53, %s3524_s3 }
0x2ba5   :  { %2068 = vrot.lane.b32.xlu1 %v4059_v48, %s3524_s3  ;;  %v2050_v48 = vld [vmem:[%s4347_s7 + $0x20] sm:$0xff] }
0x2ba9   :  { %2072 = vrot.lane.b32.xlu1 %v4017_v11, %s3524_s3  ;;  %v2366_v11 = vld [vmem:[%s4346_s9 + $0x38] sm:$0xff] }
0x2bad   :  { %2076 = vrot.lane.b32.xlu1 %v3976_v42, %s3524_s3  ;;  %v2051_v42 = vld [vmem:[%s4347_s7 + $0x28] sm:$0xff] }
0x2bae   :  { %v3122_v29 = vpack.c.bf16 %v2051_v42, %v2050_v48 }
0x2bb0   :  { %3123 = vmatprep.subr.bf16.mxu0 %v3122_v29 }
0x2bb1   :  { %2209 = vrot.lane.b32.xlu1 %v3994_v23, %s3524_s3  ;;  %v2365_v23 = vld [vmem:[%s4346_s9 + $0x30] sm:$0xff]  ;;  %3125 = vmatpush3.bf16.msra.mxu0 %v3122_v29 }
0x2bb2   :  { %v3142_v59 = vpack.c.bf16 %v2366_v11, %v2365_v23  ;;  %3127 = vmatprep.subr.bf16.mxu0 %v3126_v58 }
0x2bb4   :  { %3143 = vmatprep.subr.bf16.mxu1 %v3142_v59 }
0x2bb5   :  { %2213 = vrot.lane.b32.xlu1 %v4036_v34, %s3524_s3  ;;  %3145 = vmatpush3.bf16.msra.mxu1 %v3142_v59  ;;  %v2359_v34 = vld [vmem:[%s4346_s9] sm:$0xff] }
0x2bb6   :  { %3129 = vmatpush3.bf16.msra.mxu0 %v3126_v58 }
0x2bb7   :  { %3131 = vmatprep.subr.bf16.mxu0 %v3130_v14 }
0x2bb9   :  { %2217 = vrot.lane.b32.xlu1 %v4078_v26, %s3524_s3  ;;  %v2360_v26 = vld [vmem:[%s4346_s9 + $0x8] sm:$0xff] }
0x2bba   :  { %v3146_v0 = vpack.c.bf16 %v2360_v26, %v2359_v34 }
0x2bbc   :  { %3147 = vmatprep.subr.bf16.mxu1 %v3146_v0 }
0x2c0f   :  { %v2019_v7 = vpop.permute.xlu1 %2018 }
0x2c10   :  { %v2021_v46 = vmul.f32 %v3482_v33, %v2019_v7 }
0x2c12   :  { %2221 = vrot.lane.b32.xlu1 %v2021_v46, %s3524_s3  ;;  %v2043_v5 = vpop.permute.xlu0 %2042 }
0x2c13   :  { %v2045_v9 = vmul.f32 %v3484_v35, %v2043_v5 }
0x2c15   :  { %2062 = vrot.lane.b32.xlu0 %v2045_v9, %s3524_s3 }
0x2c19   :  { %2066 = vrot.lane.b32.xlu0 %v4080_v27, %s3524_s3  ;;  %v2065_v27 = vpop.permute.xlu1 %2064 }
0x2c1d   :  { %2070 = vrot.lane.b32.xlu0 %v4038_v60, %s3524_s3  ;;  %v2069_v60 = vpop.permute.xlu1 %2068 }
0x2c21   :  { %2074 = vrot.lane.b32.xlu0 %v3996_v25, %s3524_s3  ;;  %v2361_v25 = vld [vmem:[%s4346_s9 + $0x10] sm:$0xff]  ;;  %v2073_v10 = vpop.permute.xlu1 %2072 }
0x2c25   :  { %2207 = vrot.lane.b32.xlu0 %v3974_v45, %s3524_s3  ;;  %v2362_v45 = vld [vmem:[%s4346_s9 + $0x18] sm:$0xff]  ;;  %v2077_v6 = vpop.permute.xlu1 %2076 }
0x2c29   :  { %2211 = vrot.lane.b32.xlu0 %v4015_v54, %s3524_s3  ;;  %v2048_v54 = vld [vmem:[%s4347_s7 + $0x10] sm:$0xff]  ;;  %v2210_v12 = vpop.permute.xlu1 %2209 }
0x2c2d   :  { %2215 = vrot.lane.b32.xlu0 %v4057_v52, %s3524_s3  ;;  %v2049_v52 = vld [vmem:[%s4347_s7 + $0x18] sm:$0xff]  ;;  %v2214_v43 = vpop.permute.xlu1 %2213 }
0x2c2e   :  { %v3134_v32 = vpack.c.bf16 %v2049_v52, %v2048_v54 }
0x2c31   :  { %2219 = vrot.lane.b32.xlu0 %v4098_v30, %s3524_s3  ;;  %v3150_v30 = vpack.c.bf16 %v2362_v45, %v2361_v25  ;;  %v2218_v56 = vpop.permute.xlu1 %2217 }
0x2c84   :  { %v2222_v50 = vpop.permute.xlu1 %2221 }
0x2c87   :  { %v2063_v53 = vpop.permute.xlu0 %2062 }
0x2c88   :  { %3050 = vmatprep.mubr.msk.f32.mxu0 %vm186_vm1, %v2063_v53  ;;  %3090 = vmatprep.mubr.msk.f32.mxu1 %vm186_vm1, %v2063_v53 }
0x2c89   :  { %3051 = vmatmul.mubr.msk.f32.vlgmr.msra.gmra.mrb[40].mxu0 %vm186_vm1, %v2065_v27  ;;  %3091 = vmatmul.mubr.msk.f32.vlgmr.msra.gmra.mrb[56].mxu1 %vm186_vm1, %v2065_v27 }
0x2c8a   :  { %3149 = vmatpush3.bf16.msra.mxu1 %v3146_v0  ;;  %3133 = vmatpush3.bf16.msra.mxu0 %v3130_v14 }
0x2c8b   :  { %v2067_v13 = vpop.permute.xlu0 %2066  ;;  %3151 = vmatprep.subr.bf16.mxu1 %v3150_v30  ;;  %3135 = vmatprep.subr.bf16.mxu0 %v3134_v32 }
0x2c8c   :  { %3053 = vmatprep.mubr.msk.f32.mxu0 %vm186_vm1, %v2067_v13  ;;  %3093 = vmatprep.mubr.msk.f32.mxu1 %vm186_vm1, %v2067_v13 }
0x2c8d   :  { %3054 = vmatmul.mubr.msk.f32.gmra.mrb[42].mxu0 %vm186_vm1, %v2069_v60  ;;  %3094 = vmatmul.mubr.msk.f32.gmra.mrb[58].mxu1 %vm186_vm1, %v2069_v60 }
0x2c8e   :  { %3153 = vmatpush3.bf16.msra.mxu1 %v3150_v30  ;;  %3137 = vmatpush3.bf16.msra.mxu0 %v3134_v32 }
0x2c8f   :  { %v2071_v41 = vpop.permute.xlu0 %2070 }
0x2c90   :  { %3056 = vmatprep.mubr.msk.f32.mxu0 %vm186_vm1, %v2071_v41  ;;  %3096 = vmatprep.mubr.msk.f32.mxu1 %vm186_vm1, %v2071_v41 }
0x2c91   :  { %3057 = vmatmul.mubr.msk.f32.gmra.mrb[44].mxu0 %vm186_vm1, %v2073_v10  ;;  %3097 = vmatmul.mubr.msk.f32.gmra.mrb[60].mxu1 %vm186_vm1, %v2073_v10 }
0x2c93   :  { %v2075_v37 = vpop.permute.xlu0 %2074 }
0x2c94   :  { %3059 = vmatprep.mubr.msk.f32.mxu0 %vm186_vm1, %v2075_v37  ;;  %3099 = vmatprep.mubr.msk.f32.mxu1 %vm186_vm1, %v2075_v37 }
0x2c95   :  { %3060 = vmatmul.mubr.msk.f32.gmra.mrb[46].mxu0 %vm186_vm1, %v2077_v6  ;;  %3100 = vmatmul.mubr.msk.f32.gmra.mrb[62].mxu1 %vm186_vm1, %v2077_v6 }
0x2c97   :  { %v2208_v63 = vpop.permute.xlu0 %2207 }
0x2c98   :  { %3070 = vmatprep.mubr.msk.f32.mxu0 %vm186_vm1, %v2208_v63  ;;  %3110 = vmatprep.mubr.msk.f32.mxu1 %vm186_vm1, %v2208_v63 }
0x2c99   :  { %3071 = vmatmul.mubr.msk.f32.vlgmr.msra.gmra.mrb[40].mxu0 %vm186_vm1, %v2210_v12  ;;  %3111 = vmatmul.mubr.msk.f32.vlgmr.msra.gmra.mrb[56].mxu1 %vm186_vm1, %v2210_v12 }
0x2c9b   :  { %v2212_v15 = vpop.permute.xlu0 %2211 }
0x2c9c   :  { %3073 = vmatprep.mubr.msk.f32.mxu0 %vm186_vm1, %v2212_v15  ;;  %3113 = vmatprep.mubr.msk.f32.mxu1 %vm186_vm1, %v2212_v15 }
0x2c9d   :  { %3074 = vmatmul.mubr.msk.f32.gmra.mrb[42].mxu0 %vm186_vm1, %v2214_v43  ;;  %3114 = vmatmul.mubr.msk.f32.gmra.mrb[58].mxu1 %vm186_vm1, %v2214_v43 }
0x2c9f   :  { %v2216_v18 = vpop.permute.xlu0 %2215 }
0x2ca0   :  { %3076 = vmatprep.mubr.msk.f32.mxu0 %vm186_vm1, %v2216_v18  ;;  %3116 = vmatprep.mubr.msk.f32.mxu1 %vm186_vm1, %v2216_v18 }
0x2ca1   :  { %3077 = vmatmul.mubr.msk.f32.gmra.mrb[44].mxu0 %vm186_vm1, %v2218_v56  ;;  %3117 = vmatmul.mubr.msk.f32.gmra.mrb[60].mxu1 %vm186_vm1, %v2218_v56 }
0x2ca3   :  { %v2220_v19 = vpop.permute.xlu0 %2219 }
0x2ca4   :  { %3079 = vmatprep.mubr.msk.f32.mxu0 %vm186_vm1, %v2220_v19  ;;  %3119 = vmatprep.mubr.msk.f32.mxu1 %vm186_vm1, %v2220_v19 }
0x2ca5   :  { %3080 = vmatmul.mubr.msk.f32.gmra.mrb[46].mxu0 %vm186_vm1, %v2222_v50  ;;  %3120 = vmatmul.mubr.msk.f32.gmra.mrb[62].mxu1 %vm186_vm1, %v2222_v50 }
0x2d6c   :  { %v3072_v8 = vpop.f32.mrb[40].mxu0  ;;  %v3112_v31 = vpop.f32.mrb[56].mxu1 }
0x2d6d   :  { %2820 = vperm.xlu0 %3192, %v3112_v31   ;;  %2749 = vperm.xlu1 %3191, %v3112_v31   ;;  %v2305_v33 = vpop.f32.mrb[41].mxu0  ;;  %v2538_v55 = vpop.f32.mrb[57].mxu1  ;;  %v2352_v51 = vadd.f32 %v3072_v8, %v2976_v24 }
0x2d6e   :  { %v2351_v48 = vadd.f32 %v2976_v24, %v2305_v33 }
0x2d6f   :  { %v2581_v22 = vsel %vm2579_vm2, %v2352_v51, -1e+30 }
0x2d70   :  { %v3075_v44 = vpop.f32.mrb[42].mxu0  ;;  %v3115_v35 = vpop.f32.mrb[58].mxu1  ;;  %v2580_v42 = vsel %vm2579_vm2, %v2351_v48, -1e+30  ;;  %v2596_v23 = vsel %vm2588_vm3, %v2581_v22, -inf }
0x2d71   :  { %3193 = vset.pattern.permute.xlu0 %v3521_v1  ;;  %3194 = vset.pattern.permute.xlu1 %v3525_v16  ;;  %v2315_v47 = vpop.f32.mrb[43].mxu0  ;;  %v2548_v36 = vpop.f32.mrb[59].mxu1  ;;  %v2589_v11 = vsel %vm2588_vm3, %v2580_v42, -inf  ;;  %v2597_v29 = vrot.slane %v2596_v23, 4  ;;  %v2354_v59 = vadd.f32 %v3075_v44, %v2976_v24 }
0x2d72   :  { %2816 = vperm.xlu1 %3194, %v2538_v55   ;;  %2744 = vperm.xlu0 %3193, %v2538_v55   ;;  %v2353_v61 = vadd.f32 %v2976_v24, %v2315_v47  ;;  %v2590_v58 = vrot.slane %v2589_v11, 4 }
0x2d73   :  { %v2598_v34 = vmax.f32 %v2596_v23, %v2597_v29  ;;  %v2583_v26 = vsel %vm2579_vm2, %v2354_v59, -1e+30 }
0x2d74   :  { %v4223_v3 = vpop.f32.mrb[44].mxu0  ;;  %v3118_v40 = vpop.f32.mrb[60].mxu1  ;;  %v2582_v0 = vsel %vm2579_vm2, %v2353_v61, -1e+30  ;;  %v2591_v57 = vmax.f32 %v2589_v11, %v2590_v58  ;;  %v2610_v39 = vsel %vm2588_vm3, %v2583_v26, -inf }
0x2d75   :  { %v2325_v17 = vpop.f32.mrb[45].mxu0  ;;  %v2558_v62 = vpop.f32.mrb[61].mxu1  ;;  %v2599_v7 = vrot.slane %v2598_v34, 2  ;;  %v2603_v14 = vsel %vm2588_vm3, %v2582_v0, -inf  ;;  %v2356_v52 = vadd.f32 %v4223_v3, %v2976_v24 }
0x2d76   :  { %2828 = vperm.xlu1 %3194, %v3115_v35   ;;  %2759 = vperm.xlu0 %3193, %v3115_v35   ;;  %v2355_v46 = vadd.f32 %v2976_v24, %v2325_v17  ;;  %v2592_v5 = vrot.slane %v2591_v57, 2  ;;  %v2604_v9 = vrot.slane %v2603_v14, 4 }
0x2d77   :  { %v2600_v27 = vmax.f32 %v2598_v34, %v2599_v7  ;;  %v4265_v6 = vsel %vm2579_vm2, %v2356_v52, -1e+30 }
0x2d78   :  { %v4225_v38 = vpop.f32.mrb[46].mxu0  ;;  %v3121_v28 = vpop.f32.mrb[62].mxu1  ;;  %v2584_v60 = vsel %vm2579_vm2, %v2355_v46, -1e+30  ;;  %v2593_v25 = vmax.f32 %v2591_v57, %v2592_v5  ;;  %v2605_v54 = vmax.f32 %v2603_v14, %v2604_v9  ;;  %v2624_v63 = vsel %vm2588_vm3, %v4265_v6, -inf }
0x2d79   :  { %v4227_v49 = vpop.f32.mrb[47].mxu0  ;;  %v2568_v2 = vpop.f32.mrb[63].mxu1  ;;  %v2617_v53 = vsel %vm2588_vm3, %v2584_v60, -inf  ;;  %v2601_v30 = vrot.slane %v2600_v27, 1  ;;  %v2358_v19 = vadd.f32 %v4225_v38, %v2976_v24  ;;  %v2625_v50 = vrot.slane %v2624_v63, 4 }
0x2d7a   :  { %3195 = vset.pattern.permute.xlu1 %v3521_v1  ;;  %3200 = vset.pattern.permute.xlu0 %v3525_v16  ;;  %v2594_v32 = vrot.slane %v2593_v25, 1  ;;  %v2618_v13 = vrot.slane %v2617_v53, 4  ;;  %v2357_v18 = vadd.f32 %v2976_v24, %v4227_v49 }
0x2d7b   :  { %2754 = vperm.xlu1 %3195, %v2548_v36   ;;  %2832 = vperm.xlu0 %3200, %v2558_v62   ;;  %v2602_v41 = vmax.f32 %v2600_v27, %v2601_v30  ;;  %v2587_v47 = vsel %vm2579_vm2, %v2358_v19, -1e+30 }
0x2d7c   :  { %v2595_v37 = vmax.f32 %v2593_v25, %v2594_v32  ;;  %v2619_v43 = vmax.f32 %v2617_v53, %v2618_v13  ;;  %v2586_v44 = vsel %vm2579_vm2, %v2357_v18, -1e+30  ;;  %v2638_v38 = vsel %vm2588_vm3, %v2587_v47, -inf }
0x2d7d   :  { %v2646_v56 = vsub.f32 %v2581_v22, %v2602_v41  ;;  %v2639_v48 = vrot.slane %v2638_v38, 4 }
0x2d7e   :  { %v2645_v8 = vsub.f32 %v2580_v42, %v2595_v37  ;;  %v2620_v33 = vrot.slane %v2619_v43, 2 }
0x2d7f   :  { %3196 = vset.pattern.permute.xlu1 %v3525_v16  ;;  %3201 = vset.pattern.permute.xlu0 %v3521_v1  ;;  %v2655_v35 = vmul.f32 1.442695, %v2646_v56  ;;  %v2640_v29 = vmax.f32 %v2638_v38, %v2639_v48 }
0x2d80   :  { %2824 = vperm.xlu1 %3196, %v2548_v36   ;;  %2774 = vperm.xlu0 %3201, %v2568_v2   ;;  %v2626_v36 = vmax.f32 %v2624_v63, %v2625_v50  ;;  %v2653_v3 = vmul.f32 1.442695, %v2645_v8  ;;  %v2621_v17 = vmax.f32 %v2619_v43, %v2620_v33 }
0x2d81   :  { %3489 = vpow2.f32 %v2655_v35  ;;  %v2641_v57 = vrot.slane %v2640_v29, 2 }
0x2d82   :  { %v2627_v49 = vrot.slane %v2626_v36, 2  ;;  %3491 = vpow2.f32 %v2653_v3  ;;  %v2622_v51 = vrot.slane %v2621_v17, 1 }
0x2d83   :  { %v2642_v46 = vmax.f32 %v2640_v29, %v2641_v57 }
0x2d84   :  { %3197 = vset.pattern.permute.xlu1 %v3521_v1  ;;  %3203 = vset.pattern.permute.xlu0 %v3525_v16  ;;  %v2628_v23 = vmax.f32 %v2626_v36, %v2627_v49  ;;  %v2623_v11 = vmax.f32 %v2621_v17, %v2622_v51 }
0x2d85   :  { %2769 = vperm.xlu1 %3197, %v3118_v40   ;;  %2844 = vperm.xlu0 %3203, %v3121_v28  }
0x2d86   :  { %v2629_v58 = vrot.slane %v2628_v23, 1  ;;  %v2649_v34 = vsub.f32 %v2584_v60, %v2623_v11  ;;  %v2643_v60 = vrot.slane %v2642_v46, 1 }
0x2d88   :  { %v2630_v7 = vmax.f32 %v2628_v23, %v2629_v58  ;;  %v2661_v14 = vmul.f32 1.442695, %v2649_v34 }
0x2d89   :  { %3198 = vset.pattern.permute.xlu1 %v3525_v16 }
0x2d8a   :  { %2836 = vperm.xlu1 %3198, %v3118_v40   ;;  %v2650_v25 = vsub.f32 %v4265_v6, %v2630_v7 }
0x2d8c   :  { %v2663_v32 = vmul.f32 1.442695, %v2650_v25 }
0x2d8e   :  { %3199 = vset.pattern.permute.xlu1 %v3521_v1 }
0x2d8f   :  { %2764 = vperm.xlu1 %3199, %v2558_v62   ;;  %v2631_v62 = vsel %vm2588_vm3, %v2586_v44, -inf }
0x2d93   :  { %2779 = vperm.xlu1 %3199, %v3121_v28  }
0x2d97   :  { %3202 = vset.pattern.permute.xlu1 %v3525_v16 }
0x2d98   :  { %2840 = vperm.xlu1 %3202, %v2568_v2   ;;  %v2632_v2 = vrot.slane %v2631_v62, 4 }
0x2d9a   :  { %v2633_v42 = vmax.f32 %v2631_v62, %v2632_v2 }
0x2d9c   :  { %3204 = vset.pattern.permute.xlu1 %v3521_v1  ;;  %v2611_v1 = vrot.slane %v2610_v39, 4  ;;  %v2634_v61 = vrot.slane %v2633_v42, 2 }
0x2d9d   :  { %2811 = vperm.xlu1 %3204, %v2993_v4  }
0x2d9e   :  { %v2612_v45 = vmax.f32 %v2610_v39, %v2611_v1 }
0x2da0   :  { %v2613_v10 = vrot.slane %v2612_v45, 2 }
0x2da1   :  { %3205 = vset.pattern.permute.xlu1 %v3525_v16  ;;  %v2606_v16 = vrot.slane %v2605_v54, 2 }
0x2da2   :  { %2871 = vperm.xlu1 %3205, %v2993_v4   ;;  %v2614_v12 = vmax.f32 %v2612_v45, %v2613_v10  ;;  %v4277_v4 = vpop.eup %3489  ;;  %v2644_v10 = vmax.f32 %v2642_v46, %v2643_v60 }
0x2da3   :  { %v2607_v15 = vmax.f32 %v2605_v54, %v2606_v16  ;;  %v4279_v39 = vpop.eup %3491 }
0x2da4   :  { %v2615_v31 = vrot.slane %v2614_v12, 1  ;;  %v2669_v5 = vsel %vm2588_vm3, %v4279_v39, 0.0 }
0x2da5   :  { %v2608_v55 = vrot.slane %v2607_v15, 1  ;;  %v2670_v27 = vrot.slane %v2669_v5, 4 }
0x2da6   :  { %v2616_v40 = vmax.f32 %v2614_v12, %v2615_v31  ;;  %v2652_v12 = vsub.f32 %v2587_v47, %v2644_v10 }
0x2da7   :  { %v2609_v28 = vmax.f32 %v2607_v15, %v2608_v55  ;;  %v2671_v30 = vadd.f32 %v2670_v27, %v2669_v5 }
0x2da8   :  { %v2648_v24 = vsub.f32 %v2583_v26, %v2616_v40  ;;  %v2676_v26 = vsel %vm2588_vm3, %v4277_v4, 0.0  ;;  %v2667_v50 = vmul.f32 1.442695, %v2652_v12 }
0x2da9   :  { %v2647_v22 = vsub.f32 %v2582_v0, %v2609_v28  ;;  %v2635_v0 = vmax.f32 %v2633_v42, %v2634_v61  ;;  %v2677_v1 = vrot.slane %v2676_v26, 4  ;;  %v2672_v63 = vrot.slane %v2671_v30, 2 }
0x2daa   :  { %v2659_v21 = vmul.f32 1.442695, %v2648_v24 }
0x2dab   :  { %v2657_v59 = vmul.f32 1.442695, %v2647_v22  ;;  %v2636_v9 = vrot.slane %v2635_v0, 1  ;;  %v2678_v54 = vadd.f32 %v2677_v1, %v2676_v26  ;;  %v2673_v8 = vadd.f32 %v2672_v63, %v2671_v30 }
0x2dac   :  { %3493 = vpow2.f32 %v2659_v21 }
0x2dad   :  { %3495 = vpow2.f32 %v2657_v59  ;;  %v2637_v53 = vmax.f32 %v2635_v0, %v2636_v9  ;;  %v2679_v41 = vrot.slane %v2678_v54, 2 }
0x2dae   :  { %3497 = vpow2.f32 %v2661_v14 }
0x2daf   :  { %v2651_v37 = vsub.f32 %v2586_v44, %v2637_v53  ;;  %3499 = vpow2.f32 %v2663_v32  ;;  %v2680_v18 = vadd.f32 %v2679_v41, %v2678_v54  ;;  %v2674_v44 = vrot.slane %v2673_v8, 1 }
0x2db1   :  { %v2665_v56 = vmul.f32 1.442695, %v2651_v37  ;;  %v2681_v55 = vrot.slane %v2680_v18, 1  ;;  %v2675_v62 = vadd.f32 %v2674_v44, %v2673_v8 }
0x2db3   :  { %3501 = vpow2.f32 %v2665_v56  ;;  %v2682_v40 = vadd.f32 %v2681_v55, %v2680_v18 }
0x2db4   :  { %3503 = vpow2.f32 %v2667_v50 }
0x2db5   :  { %3505 = vrcp.f32 %v2682_v40 }
0x2db6   :  { %v4286_v45 = vpop.eup %3493  ;;  %3507 = vrcp.f32 %v2675_v62 }
0x2db7   :  { %v4288_v52 = vpop.eup %3495  ;;  %v2690_v13 = vsel %vm2588_vm3, %v4286_v45, 0.0 }
0x2db8   :  { %v2683_v16 = vsel %vm2588_vm3, %v4288_v52, 0.0  ;;  %v2691_v6 = vrot.slane %v2690_v13, 4  ;;  %v4294_v15 = vpop.eup %3497 }
0x2db9   :  { %v2684_v43 = vrot.slane %v2683_v16, 4  ;;  %v2697_v33 = vsel %vm2588_vm3, %v4294_v15, 0.0  ;;  %v4298_v3 = vpop.eup %3499 }
0x2dba   :  { %v2692_v19 = vadd.f32 %v2691_v6, %v2690_v13  ;;  %v2698_v35 = vrot.slane %v2697_v33, 4  ;;  %v2704_v38 = vsel %vm2588_vm3, %v4298_v3, 0.0 }
0x2dbb   :  { %v2685_v31 = vadd.f32 %v2684_v43, %v2683_v16  ;;  %v2705_v2 = vrot.slane %v2704_v38, 4 }
0x2dbc   :  { %v2693_v36 = vrot.slane %v2692_v19, 2  ;;  %v2699_v17 = vadd.f32 %v2698_v35, %v2697_v33 }
0x2dbd   :  { %v2686_v47 = vrot.slane %v2685_v31, 2  ;;  %v4302_v48 = vpop.eup %3501  ;;  %v2706_v21 = vadd.f32 %v2705_v2, %v2704_v38 }
0x2dbe   :  { %v2694_v28 = vadd.f32 %v2693_v36, %v2692_v19  ;;  %v2700_v51 = vrot.slane %v2699_v17, 2  ;;  %v4304_v42 = vpop.eup %3503  ;;  %v2711_v23 = vsel %vm2588_vm3, %v4302_v48, 0.0 }
0x2dbf   :  { %v2687_v49 = vadd.f32 %v2686_v47, %v2685_v31  ;;  %v2718_v59 = vsel %vm2588_vm3, %v4304_v42, 0.0  ;;  %v2712_v58 = vrot.slane %v2711_v23, 4  ;;  %v3506_v34 = vpop.eup %3505  ;;  %v2707_v0 = vrot.slane %v2706_v21, 2 }
0x2dc0   :  { %v2695_v24 = vrot.slane %v2694_v28, 1  ;;  %v2701_v29 = vadd.f32 %v2700_v51, %v2699_v17  ;;  %v2719_v57 = vrot.slane %v2718_v59, 4  ;;  %v3508_v46 = vpop.eup %3507  ;;  %v2734_v1 = vmul.f32 %v3506_v34, %v4277_v4 }
0x2dc1   :  { %v2688_v22 = vrot.slane %v2687_v49, 1  ;;  %v2713_v5 = vadd.f32 %v2712_v58, %v2711_v23  ;;  %v2708_v25 = vadd.f32 %v2707_v0, %v2706_v21  ;;  %v2733_v53 = vmul.f32 %v3508_v46, %v4279_v39 }
0x2dc2   :  { %v2696_v11 = vadd.f32 %v2695_v24, %v2694_v28  ;;  %v2702_v26 = vrot.slane %v2701_v29, 1  ;;  %v2720_v9 = vadd.f32 %v2719_v57, %v2718_v59 }
0x2dc3   :  { %v2689_v61 = vadd.f32 %v2688_v22, %v2687_v49  ;;  %v2714_v16 = vrot.slane %v2713_v5, 2  ;;  %v2709_v41 = vrot.slane %v2708_v25, 1 }
0x2dc4   :  { %3509 = vrcp.f32 %v2696_v11  ;;  %v2703_v27 = vadd.f32 %v2702_v26, %v2701_v29  ;;  %v2721_v37 = vrot.slane %v2720_v9, 2 }
0x2dc5   :  { %3511 = vrcp.f32 %v2689_v61  ;;  %v2715_v50 = vadd.f32 %v2714_v16, %v2713_v5  ;;  %v2710_v8 = vadd.f32 %v2709_v41, %v2708_v25 }
0x2dc6   :  { %3513 = vrcp.f32 %v2703_v27  ;;  %v2722_v31 = vadd.f32 %v2721_v37, %v2720_v9 }
0x2dc7   :  { %v2716_v36 = vrot.slane %v2715_v50, 1  ;;  %3515 = vrcp.f32 %v2710_v8  ;;  %v2876_v8 = vand.u32 127, %v55_v20 }
0x2dc8   :  { %v2723_v17 = vrot.slane %v2722_v31, 1 }
0x2dc9   :  { %v2717_v49 = vadd.f32 %v2716_v36, %v2715_v50  ;;  %vm2877_vm4 = vcmp.lt.s32.totalorder %v2876_v8, 4 }
0x2dca   :  { %v2724_v22 = vadd.f32 %v2723_v17, %v2722_v31 }
0x2dcb   :  { %3517 = vrcp.f32 %v2717_v49 }
0x2dcc   :  { %3519 = vrcp.f32 %v2724_v22 }
0x2dce   :  { %v3510_v43 = vpop.eup %3509 }
0x2dcf   :  { %v3512_v19 = vpop.eup %3511  ;;  %v2736_v55 = vmul.f32 %v3510_v43, %v4286_v45 }
0x2dd0   :  { %v2735_v35 = vmul.f32 %v3512_v19, %v4288_v52  ;;  %v3514_v62 = vpop.eup %3513 }
0x2dd1   :  { %v2737_v45 = vmul.f32 %v3514_v62, %v4294_v15  ;;  %v3516_v34 = vpop.eup %3515 }
0x2dd5   :  { %v3518_v46 = vpop.eup %3517 }
0x2dd6   :  { %v3520_v9 = vpop.eup %3519 }
0x2dec   :  { %v2750_v7 = vpop.permute.xlu1 %2749  ;;  %v2821_v14 = vpop.permute.xlu0 %2820 }
0x2ded   :  { %v2783_v60 = vmul.f32 %v2750_v7, %v2734_v1  ;;  %v2848_v54 = vmul.f32 %v2821_v14, %v2734_v1  ;;  %v2738_v7 = vmul.f32 %v3516_v34, %v4298_v3 }
0x2def   :  { %v2791_v6 = vsel %vm2588_vm3, %v2783_v60, 0.0  ;;  %v2856_v12 = vsel %vm2588_vm3, %v2848_v54, 0.0  ;;  %v2739_v60 = vmul.f32 %v3518_v46, %v4302_v48 }
0x2df1   :  { %v2817_v30 = vpop.permute.xlu1 %2816  ;;  %v2745_v32 = vpop.permute.xlu0 %2744 }
0x2df2   :  { %v2847_v10 = vmul.f32 %v2817_v30, %v2733_v53  ;;  %v2782_v13 = vmul.f32 %v2745_v32, %v2733_v53  ;;  %v2740_v32 = vmul.f32 %v3520_v9, %v4304_v42 }
0x2df4   :  { %v2855_v4 = vsel %vm2588_vm3, %v2847_v10, 0.0  ;;  %v2790_v63 = vsel %vm2588_vm3, %v2782_v13, 0.0 }
0x2df5   :  { %v2857_v18 = vadd.f32 %v2856_v12, %v2855_v4  ;;  %v2792_v56 = vadd.f32 %v2791_v6, %v2790_v63  ;;  %v2829_v39 = vpop.permute.xlu1 %2828  ;;  %v2760_v33 = vpop.permute.xlu0 %2759 }
0x2df6   :  { %v2785_v47 = vmul.f32 %v2760_v33, %v2736_v55  ;;  %v2850_v21 = vmul.f32 %v2829_v39, %v2736_v55 }
0x2df8   :  { %v2795_v2 = vsel %vm2588_vm3, %v2785_v47, 0.0  ;;  %v2860_v61 = vsel %vm2588_vm3, %v2850_v21, 0.0 }
0x2dfa   :  { %v2755_v44 = vpop.permute.xlu1 %2754  ;;  %v2833_v24 = vpop.permute.xlu0 %2832 }
0x2dfb   :  { %v2784_v40 = vmul.f32 %v2755_v44, %v2735_v35  ;;  %v2851_v11 = vmul.f32 %v2833_v24, %v2737_v45 }
0x2dfd   :  { %v2793_v28 = vsel %vm2588_vm3, %v2784_v40, 0.0  ;;  %v2862_v26 = vsel %vm2588_vm3, %v2851_v11, 0.0 }
0x2dfe   :  { %v2794_v38 = vadd.f32 %v2793_v28, %v2792_v56 }
0x2dff   :  { %v2825_v51 = vpop.permute.xlu1 %2824  ;;  %v2775_v27 = vpop.permute.xlu0 %2774 }
0x2e00   :  { %v2849_v52 = vmul.f32 %v2825_v51, %v2735_v35  ;;  %v2796_v23 = vadd.f32 %v2795_v2, %v2794_v38  ;;  %v2788_v30 = vmul.f32 %v2775_v27, %v2739_v60 }
0x2e02   :  { %v2858_v29 = vsel %vm2588_vm3, %v2849_v52, 0.0  ;;  %v2801_v6 = vsel %vm2588_vm3, %v2788_v30, 0.0 }
0x2e03   :  { %v2859_v59 = vadd.f32 %v2858_v29, %v2857_v18 }
0x2e04   :  { %v2770_v58 = vpop.permute.xlu1 %2769  ;;  %v2845_v12 = vpop.permute.xlu0 %2844 }
0x2e05   :  { %v2861_v57 = vadd.f32 %v2860_v61, %v2859_v59  ;;  %v2787_v54 = vmul.f32 %v2770_v58, %v2738_v7  ;;  %v2854_v43 = vmul.f32 %v2845_v12, %v2740_v32 }
0x2e07   :  { %v2863_v0 = vadd.f32 %v2862_v26, %v2861_v57  ;;  %v2799_v16 = vsel %vm2588_vm3, %v2787_v54, 0.0  ;;  %v2868_v19 = vsel %vm2588_vm3, %v2854_v43, 0.0 }
0x2e09   :  { %v2837_v14 = vpop.permute.xlu1 %2836 }
0x2e0a   :  { %v2852_v15 = vmul.f32 %v2837_v14, %v2738_v7 }
0x2e0c   :  { %v2864_v5 = vsel %vm2588_vm3, %v2852_v15, 0.0 }
0x2e0d   :  { %v2865_v1 = vadd.f32 %v2864_v5, %v2863_v0 }
0x2e0e   :  { %v2765_v25 = vpop.permute.xlu1 %2764 }
0x2e0f   :  { %v2786_v53 = vmul.f32 %v2765_v25, %v2737_v45 }
0x2e11   :  { %v2797_v10 = vsel %vm2588_vm3, %v2786_v53, 0.0 }
0x2e12   :  { %v2798_v13 = vadd.f32 %v2797_v10, %v2796_v23  ;;  %v2780_v3 = vpop.permute.xlu1 %2779 }
0x2e13   :  { %v2789_v41 = vmul.f32 %v2780_v3, %v2740_v32 }
0x2e14   :  { %v2800_v37 = vadd.f32 %v2799_v16, %v2798_v13 }
0x2e15   :  { %v2803_v63 = vsel %vm2588_vm3, %v2789_v41, 0.0 }
0x2e16   :  { %v2802_v4 = vadd.f32 %v2801_v6, %v2800_v37 }
0x2e17   :  { %v2841_v48 = vpop.permute.xlu1 %2840 }
0x2e18   :  { %v2853_v18 = vmul.f32 %v2841_v48, %v2739_v60  ;;  %v2804_v56 = vadd.f32 %v2803_v63, %v2802_v4 }
0x2e1a   :  { %v2866_v42 = vsel %vm2588_vm3, %v2853_v18, 0.0 }
0x2e1b   :  { %v2867_v39 = vadd.f32 %v2866_v42, %v2865_v1 }
0x2e1c   :  { %v2812_v50 = vpop.permute.xlu1 %2811 }
0x2e1d   :  { %v2869_v31 = vadd.f32 %v2868_v19, %v2867_v39  ;;  %v2814_v55 = vadd.f32 %v2812_v50, %v2804_v56 }
0x2e21   :  { %v2872_v33 = vpop.permute.xlu1 %2871 }
0x2e22   :  { %v2874_v35 = vadd.f32 %v2872_v33, %v2869_v31 }
0x2e24   :  { %v2878_v44 = vsel %vm2877_vm4, %v2814_v55, %v2874_v35 }
0x2e25   :  { %2879 = vst.msk [vmem:[%s4350_s11] sm:$0xff] %vm2588_vm3, %v2878_v44 }

</bundles_post_ra>
